<compile_context>
chip_gen: v7x
topology: tpu7x:2x2x1
jax: 0.10.0
libtpu: 0.0.40
codegen_flags: <defaults>
</compile_context>

<pallas_src>
import functools

import jax
import jax.numpy as jnp
from jax.experimental import pallas as pl
from jax.experimental.pallas import tpu as pltpu


# ----------------------------------------------------------------------------
# Pallas kernel: tiled GEMM + fused bias + activation (ELU / clamp / none)
# ----------------------------------------------------------------------------
def _conv_gemm_kernel(p_ref, w_ref, b_ref, o_ref, acc_ref, *, activation):
    # p_ref:   (tm, tk)  bf16 patches tile
    # w_ref:   (tk, tn)  bf16 weight tile
    # b_ref:   (1, tn)   f32 bias tile
    # o_ref:   (tm, tn)  output tile (bf16 or f32)
    # acc_ref: (tm, tn)  f32 accumulator, resident across the k grid axis
    k = pl.program_id(2)

    @pl.when(k == 0)
    def _init():
        # Fold the bias into the accumulator init (no separate VPU add later).
        acc_ref[...] = jnp.broadcast_to(b_ref[...], acc_ref.shape)

    acc_ref[...] += jnp.dot(p_ref[...], w_ref[...],
                            preferred_element_type=jnp.float32)

    @pl.when(k == pl.num_programs(2) - 1)
    def _finalize():
        acc = acc_ref[...]
        if activation == "elu":
            # ELU(alpha=1): x if x > 0 else exp(x) - 1  (min() guards overflow)
            acc = jnp.where(acc > 0.0, acc, jnp.exp(jnp.minimum(acc, 0.0)) - 1.0)
        elif activation == "clamp":
            # conv8_out: activation='none' followed by torch.clamp(x, -1, 1)
            acc = jnp.clip(acc, -1.0, 1.0)
        # activation == "none": passthrough
        o_ref[...] = acc.astype(o_ref.dtype)


# ----------------------------------------------------------------------------
# Tiling helpers
# ----------------------------------------------------------------------------
def _round_up(x, m):
    return ((x + m - 1) // m) * m


def _tile_dim(dim, target, align):
    """Pick (tile, padded_total, num_tiles) so tile is align-multiple,
    tile <= ~target, and padded_total = tile * num_tiles >= dim."""
    padded = _round_up(dim, align)
    num = max(1, -(-padded // target))          # ceil(padded / target)
    tile = _round_up(-(-padded // num), align)  # ceil(padded / num), aligned
    return tile, tile * num, num


# Tile targets: MXU-shaped, v7x-VMEM-safe (bf16 double-buffered inputs + f32
# acc ~2 MiB live per grid step).
_TM, _TK, _TN = 256, 512, 256
_VMEM_LIMIT_BYTES = 32 * 1024 * 1024


def _fused_conv_gemm(patches, w2d, bias, *, activation, out_dtype):
    """patches: (M, K); w2d: (K, Cout); bias: (Cout,)  ->  (M, Cout)."""
    M, K = patches.shape
    _, Cout = w2d.shape

    tm, Mp, num_m = _tile_dim(M, _TM, 16)      # sublane-aligned (bf16 pack = 16)
    tk, Kp, num_k = _tile_dim(K, _TK, 128)     # lane of patches / sublane of W
    tn, Np, num_n = _tile_dim(Cout, _TN, 128)  # lane-dense output

    p_pad = jnp.pad(patches, ((0, Mp - M), (0, Kp - K))).astype(jnp.bfloat16)
    w_pad = jnp.pad(w2d, ((0, Kp - K), (0, Np - Cout))).astype(jnp.bfloat16)
    b_pad = jnp.pad(bias, ((0, Np - Cout),)).astype(jnp.float32).reshape(1, Np)

    cost = pl.CostEstimate(
        flops=2 * Mp * Kp * Np,
        transcendentals=Mp * Np if activation == "elu" else 0,
        bytes_accessed=(Mp * Kp + Kp * Np) * 2 + Np * 4
        + Mp * Np * jnp.dtype(out_dtype).itemsize,
    )

    # Grid order (n, m, k): k innermost (reduction), weight tile stays resident
    # across the m sweep when num_k == 1 (weight-stationary).
    out = pl.pallas_call(
        functools.partial(_conv_gemm_kernel, activation=activation),
        out_shape=jax.ShapeDtypeStruct((Mp, Np), out_dtype),
        grid_spec=pltpu.PrefetchScalarGridSpec(
            num_scalar_prefetch=0,
            grid=(num_n, num_m, num_k),
            in_specs=[
                pl.BlockSpec((tm, tk), lambda j, i, k: (i, k)),   # patches
                pl.BlockSpec((tk, tn), lambda j, i, k: (k, j)),   # weights
                pl.BlockSpec((1, tn), lambda j, i, k: (0, j)),    # bias
            ],
            out_specs=pl.BlockSpec((tm, tn), lambda j, i, k: (i, j)),
            scratch_shapes=[pltpu.VMEM((tm, tn), jnp.float32)],
        ),
        compiler_params=pltpu.CompilerParams(
            dimension_semantics=("parallel", "parallel", "arbitrary"),
            vmem_limit_bytes=_VMEM_LIMIT_BYTES,
        ),
        cost_estimate=cost,
    )(p_pad, w_pad, b_pad)

    return out[:M, :Cout]


# ----------------------------------------------------------------------------
# Conv glue: im2col (NHWC) + GEMM kernel
# ----------------------------------------------------------------------------
def _im2col(x, k, stride, pad):
    """x: (N, H, W, C) -> patches (N*Ho*Wo, k*k*C). Pure-JAX glue, keeps dtype."""
    N, H, W, C = x.shape
    xp = jnp.pad(x, ((0, 0), (pad, pad), (pad, pad), (0, 0)))
    Ho = (H + 2 * pad - k) // stride + 1
    Wo = (W + 2 * pad - k) // stride + 1
    cols = []
    for kh in range(k):
        for kw in range(k):
            sl = xp[:, kh:kh + (Ho - 1) * stride + 1:stride,
                       kw:kw + (Wo - 1) * stride + 1:stride, :]
            cols.append(sl)
    patches = jnp.concatenate(cols, axis=-1)            # (N, Ho, Wo, k*k*C)
    return patches.reshape(N * Ho * Wo, k * k * C), (N, Ho, Wo)


def gen_conv_pallas(x, w, b, *, k, stride, pad, activation="elu",
                    out_dtype=jnp.bfloat16):
    """x: (N, H, W, Cin) NHWC; w: (k, k, Cin, Cout); b: (Cout,)."""
    patches, (N, Ho, Wo) = _im2col(x, k, stride, pad)
    cin, cout = w.shape[2], w.shape[3]
    w2d = w.reshape(k * k * cin, cout)
    out = _fused_conv_gemm(patches, w2d, b, activation=activation,
                           out_dtype=out_dtype)
    return out.reshape(N, Ho, Wo, cout)


# ----------------------------------------------------------------------------
# Model definition (layer table mirrors CoarseGenerator.__init__)
# ----------------------------------------------------------------------------
OUT_CHANNEL = 3


def make_layer_configs(input_dim, cnum):
    # name: (cin, cout, ksize, stride, pad, activation)
    return {
        "conv1_1":    (input_dim, cnum,        5, 1, 2, "elu"),
        "conv1_2":    (cnum,      cnum,        3, 1, 1, "elu"),
        "conv1_down": (cnum,      cnum * 2,    3, 2, 1, "elu"),
        "conv2_1":    (cnum * 2,  cnum * 2,    3, 1, 1, "elu"),
        "conv2_2":    (cnum * 2,  cnum * 2,    3, 1, 1, "elu"),
        "conv2_down": (cnum * 2,  cnum * 4,    3, 2, 1, "elu"),
        "conv3_1":    (cnum * 4,  cnum * 4,    3, 1, 1, "elu"),
        "conv3_2":    (cnum * 4,  cnum * 4,    3, 1, 1, "elu"),
        "conv3_down": (cnum * 4,  cnum * 8,    3, 2, 1, "elu"),
        "conv4_1":    (cnum * 8,  cnum * 8,    3, 1, 1, "elu"),
        "conv4_2":    (cnum * 8,  cnum * 8,    3, 1, 1, "elu"),
        "conv5_1":    (cnum * 8,  cnum * 4,    3, 1, 1, "elu"),
        "conv5_2":    (cnum * 4,  cnum * 4,    3, 1, 1, "elu"),
        "conv6_1":    (cnum * 4,  cnum * 2,    3, 1, 1, "elu"),
        "conv6_2":    (cnum * 2,  cnum * 2,    3, 1, 1, "elu"),
        "conv7_1":    (cnum * 2,  cnum,        3, 1, 1, "elu"),
        "conv7_2":    (cnum,      cnum,        3, 1, 1, "elu"),
        "conv8_1":    (cnum,      cnum // 2,   3, 1, 1, "elu"),
        "conv8_2":    (cnum // 2, cnum // 2,   3, 1, 1, "elu"),
        # activation='none' in PyTorch, clamp fused into the kernel:
        "conv8_out":  (cnum // 2, OUT_CHANNEL, 3, 1, 1, "clamp"),
    }


def init_params(key, configs):
    """Deterministic synthetic weights (no checkpoint load)."""
    params = {}
    for i, (name, (cin, cout, k, _, _, _)) in enumerate(sorted(configs.items())):
        kw, kb = jax.random.split(jax.random.fold_in(key, i))
        scale = 1.0 / jnp.sqrt(jnp.float32(cin * k * k))
        w = jax.random.normal(kw, (k, k, cin, cout), jnp.float32) * scale
        b = jax.random.normal(kb, (cout,), jnp.float32) * 0.01
        params[name] = (w, b)
    return params


def _upsample_nearest_2x(x):
    # F.interpolate(scale_factor=2, mode='nearest') on NHWC
    return jnp.repeat(jnp.repeat(x, 2, axis=1), 2, axis=2)


def coarse_generator_forward(params, configs, x_nchw, mask_nchw):
    # Inputs are NCHW (PyTorch convention); convert to NHWC internally.
    x = jnp.transpose(x_nchw, (0, 2, 3, 1)).astype(jnp.float32)
    mask = jnp.transpose(mask_nchw, (0, 2, 3, 1)).astype(jnp.float32)
    ones = jnp.ones(x.shape[:3] + (1,), jnp.float32)
    # Inter-layer activations in bf16 (matmul accumulates in f32 inside kernel).
    h = jnp.concatenate([x, ones, mask], axis=-1).astype(jnp.bfloat16)

    def conv(name, t, out_dtype=jnp.bfloat16):
        cin, cout, k, s, p, act = configs[name]
        w, b = params[name]
        return gen_conv_pallas(t, w, b, k=k, stride=s, pad=p, activation=act,
                               out_dtype=out_dtype)

    for name in ["conv1_1", "conv1_2", "conv1_down",
                 "conv2_1", "conv2_2", "conv2_down",
                 "conv3_1", "conv3_2", "conv3_down",
                 "conv4_1", "conv4_2",
                 "conv5_1", "conv5_2"]:
        h = conv(name, h)
    h = _upsample_nearest_2x(h)
    for name in ["conv6_1", "conv6_2"]:
        h = conv(name, h)
    h = _upsample_nearest_2x(h)
    for name in ["conv7_1", "conv7_2"]:
        h = conv(name, h)
    h = _upsample_nearest_2x(h)
    for name in ["conv8_1", "conv8_2"]:
        h = conv(name, h)
    h = conv("conv8_out", h, out_dtype=jnp.float32)

    # back to NCHW to match the PyTorch return layout
    return jnp.transpose(h, (0, 3, 1, 2))


# ----------------------------------------------------------------------------
# Demo
# ----------------------------------------------------------------------------
if __name__ == "__main__":
    key = jax.random.PRNGKey(0)
    k_img, k_mask, k_params = jax.random.split(key, 3)

    # Small demo shapes: batch=2, image channels=3, spatial=16, cnum=8.
    # cat([x, ones, mask]) -> input_dim = 3 + 1 + 1 = 5 channels.
    N, C, H, W = 2, 3, 16, 16
    cnum = 8
    input_dim = C + 2

    x = jax.random.normal(k_img, (N, C, H, W), jnp.float32)
    mask = (jax.random.uniform(k_mask, (N, 1, H, W)) > 0.5).astype(jnp.float32)

    configs = make_layer_configs(input_dim, cnum)
    params = init_params(k_params, configs)

    fwd = jax.jit(lambda p, xi, mi: coarse_generator_forward(p, configs, xi, mi))
    out = fwd(params, x, mask)
    out = jax.block_until_ready(out)

    assert out.shape == (N, OUT_CHANNEL, H, W), out.shape
    assert bool(jnp.all(jnp.isfinite(out)))
    assert bool(jnp.all(out <= 1.0)) and bool(jnp.all(out >= -1.0))
    print("KERNEL_OK")
</pallas_src>

<mosaic_0001>
module attributes {stable_mosaic.version = 11 : i64} {
  func.func @_conv_gemm_kernel(%arg0: i32, %arg1: i32, %arg2: i32, %arg3: memref<256x128xbf16, #tpu.memory_space<vmem>>, %arg4: memref<128x128xbf16, #tpu.memory_space<vmem>>, %arg5: memref<1x128xf32, #tpu.memory_space<vmem>>, %arg6: memref<256x128xbf16, #tpu.memory_space<vmem>>, %arg7: memref<256x128xf32, #tpu.memory_space<vmem>>) attributes {dimension_semantics = [#tpu.dimension_semantics<parallel>, #tpu.dimension_semantics<parallel>, #tpu.dimension_semantics<arbitrary>], iteration_bounds = array<i64: 1, 2, 1>, scalar_prefetch = 0 : i64, scratch_operands = 1 : i64, tpu.core_type = #tpu.core_type<tc>, window_params = [{transform_indices = @transform_0, window_bounds = array<i64: 256, 128>}, {transform_indices = @transform_1, window_bounds = array<i64: 128, 128>}, {transform_indices = @transform_2, window_bounds = array<i64: 1, 128>}, {transform_indices = @transform_3, window_bounds = array<i64: 256, 128>}]} {
    %c0_i32 = arith.constant 0 : i32
    %0 = arith.cmpi eq, %arg2, %c0_i32 : i32
    %1 = arith.extui %0 : i1 to i32
    %c0_i32_0 = arith.constant 0 : i32
    %2 = arith.cmpi ne, %1, %c0_i32_0 : i32
    scf.if %2 {
      %c0_10 = arith.constant 0 : index
      %c0_11 = arith.constant 0 : index
      %12 = vector.load %arg5[%c0_10, %c0_11] : memref<1x128xf32, #tpu.memory_space<vmem>>, vector<1x128xf32>
      %13 = vector.shape_cast %12 : vector<1x128xf32> to vector<1x128xf32>
      %14 = vector.broadcast %13 : vector<1x128xf32> to vector<256x128xf32>
      %c0_12 = arith.constant 0 : index
      %c0_13 = arith.constant 0 : index
      %15 = vector.load %arg7[%c0_12, %c0_13] : memref<256x128xf32, #tpu.memory_space<vmem>>, vector<256x128xf32>
      tpu.vector_store %arg7[%c0_12, %c0_13], %14 {strides = array<i32>} : memref<256x128xf32, #tpu.memory_space<vmem>>, vector<256x128xf32>,
    } else {
    }
    %c0 = arith.constant 0 : index
    %c0_1 = arith.constant 0 : index
    %3 = vector.load %arg7[%c0, %c0_1] : memref<256x128xf32, #tpu.memory_space<vmem>>, vector<256x128xf32>
    %c0_2 = arith.constant 0 : index
    %c0_3 = arith.constant 0 : index
    %4 = vector.load %arg3[%c0_2, %c0_3] : memref<256x128xbf16, #tpu.memory_space<vmem>>, vector<256x128xbf16>
    %c0_4 = arith.constant 0 : index
    %c0_5 = arith.constant 0 : index
    %5 = vector.load %arg4[%c0_4, %c0_5] : memref<128x128xbf16, #tpu.memory_space<vmem>>, vector<128x128xbf16>
    %cst = arith.constant dense<0.000000e+00> : vector<256x128xf32>
    %6 = tpu.matmul %4, %5, %cst {dimension_numbers = #tpu.dot_dimension_numbers<[1], [0], [0], [1], [0, 0, 1, 1], [], []>} : vector<256x128xbf16>, vector<128x128xbf16>, vector<256x128xf32> -> vector<256x128xf32>
    %7 = arith.addf %3, %6 : vector<256x128xf32>
    %c0_6 = arith.constant 0 : index
    %c0_7 = arith.constant 0 : index
    %8 = vector.load %arg7[%c0_6, %c0_7] : memref<256x128xf32, #tpu.memory_space<vmem>>, vector<256x128xf32>
    tpu.vector_store %arg7[%c0_6, %c0_7], %7 {strides = array<i32>} : memref<256x128xf32, #tpu.memory_space<vmem>>, vector<256x128xf32>,
    %c0_i32_8 = arith.constant 0 : i32
    %9 = arith.cmpi eq, %arg2, %c0_i32_8 : i32
    %10 = arith.extui %9 : i1 to i32
    %c0_i32_9 = arith.constant 0 : i32
    %11 = arith.cmpi ne, %10, %c0_i32_9 : i32
    scf.if %11 {
      %c0_10 = arith.constant 0 : index
      %c0_11 = arith.constant 0 : index
      %12 = vector.load %arg7[%c0_10, %c0_11] : memref<256x128xf32, #tpu.memory_space<vmem>>, vector<256x128xf32>
      %cst_12 = arith.constant 0.000000e+00 : f32
      %13 = vector.broadcast %cst_12 : f32 to vector<256x128xf32>
      %14 = arith.cmpf ogt, %12, %13 : vector<256x128xf32>
      %cst_13 = arith.constant 0.000000e+00 : f32
      %15 = vector.broadcast %cst_13 : f32 to vector<256x128xf32>
      %16 = arith.minimumf %12, %15 : vector<256x128xf32>
      %17 = math.exp %16 : vector<256x128xf32>
      %cst_14 = arith.constant 1.000000e+00 : f32
      %18 = vector.broadcast %cst_14 : f32 to vector<256x128xf32>
      %19 = arith.subf %17, %18 : vector<256x128xf32>
      %20 = arith.select %14, %12, %19 : vector<256x128xi1>, vector<256x128xf32>
      %21 = arith.truncf %20 : vector<256x128xf32> to vector<256x128xbf16>
      %c0_15 = arith.constant 0 : index
      %c0_16 = arith.constant 0 : index
      %22 = vector.load %arg6[%c0_15, %c0_16] : memref<256x128xbf16, #tpu.memory_space<vmem>>, vector<256x128xbf16>
      tpu.vector_store %arg6[%c0_15, %c0_16], %21 {strides = array<i32>} : memref<256x128xbf16, #tpu.memory_space<vmem>>, vector<256x128xbf16>,
    } else {
    }
    return
  }
  func.func @transform_0(%arg0: i32, %arg1: i32, %arg2: i32) -> (i32, i32) {
    %c0_i32 = arith.constant 0 : i32
    return %arg1, %arg2 : i32, i32
  }
  func.func @transform_1(%arg0: i32, %arg1: i32, %arg2: i32) -> (i32, i32) {
    %c0_i32 = arith.constant 0 : i32
    return %arg2, %arg0 : i32, i32
  }
  func.func @transform_2(%arg0: i32, %arg1: i32, %arg2: i32) -> (i32, i32) {
    %c0_i32 = arith.constant 0 : i32
    %c0_i32_0 = arith.constant 0 : i32
    return %c0_i32, %arg0 : i32, i32
  }
  func.func @transform_3(%arg0: i32, %arg1: i32, %arg2: i32) -> (i32, i32) {
    %c0_i32 = arith.constant 0 : i32
    return %arg1, %arg0 : i32, i32
  }
}

module attributes {stable_mosaic.version = 11 : i64} {
  func.func @_conv_gemm_kernel(%arg0: i32, %arg1: i32, %arg2: i32, %arg3: memref<128x128xbf16, #tpu.memory_space<vmem>>, %arg4: memref<128x128xbf16, #tpu.memory_space<vmem>>, %arg5: memref<1x128xf32, #tpu.memory_space<vmem>>, %arg6: memref<128x128xbf16, #tpu.memory_space<vmem>>, %arg7: memref<128x128xf32, #tpu.memory_space<vmem>>) attributes {dimension_semantics = [#tpu.dimension_semantics<parallel>, #tpu.dimension_semantics<parallel>, #tpu.dimension_semantics<arbitrary>], iteration_bounds = array<i64: 1, 1, 1>, scalar_prefetch = 0 : i64, scratch_operands = 1 : i64, tpu.core_type = #tpu.core_type<tc>, window_params = [{transform_indices = @transform_0, window_bounds = array<i64: 128, 128>}, {transform_indices = @transform_1, window_bounds = array<i64: 128, 128>}, {transform_indices = @transform_2, window_bounds = array<i64: 1, 128>}, {transform_indices = @transform_3, window_bounds = array<i64: 128, 128>}]} {
    %c0_i32 = arith.constant 0 : i32
    %0 = arith.cmpi eq, %arg2, %c0_i32 : i32
    %1 = arith.extui %0 : i1 to i32
    %c0_i32_0 = arith.constant 0 : i32
    %2 = arith.cmpi ne, %1, %c0_i32_0 : i32
    scf.if %2 {
      %c0_10 = arith.constant 0 : index
      %c0_11 = arith.constant 0 : index
      %12 = vector.load %arg5[%c0_10, %c0_11] : memref<1x128xf32, #tpu.memory_space<vmem>>, vector<1x128xf32>
      %13 = vector.shape_cast %12 : vector<1x128xf32> to vector<1x128xf32>
      %14 = vector.broadcast %13 : vector<1x128xf32> to vector<128x128xf32>
      %c0_12 = arith.constant 0 : index
      %c0_13 = arith.constant 0 : index
      %15 = vector.load %arg7[%c0_12, %c0_13] : memref<128x128xf32, #tpu.memory_space<vmem>>, vector<128x128xf32>
      tpu.vector_store %arg7[%c0_12, %c0_13], %14 {strides = array<i32>} : memref<128x128xf32, #tpu.memory_space<vmem>>, vector<128x128xf32>,
    } else {
    }
    %c0 = arith.constant 0 : index
    %c0_1 = arith.constant 0 : index
    %3 = vector.load %arg7[%c0, %c0_1] : memref<128x128xf32, #tpu.memory_space<vmem>>, vector<128x128xf32>
    %c0_2 = arith.constant 0 : index
    %c0_3 = arith.constant 0 : index
    %4 = vector.load %arg3[%c0_2, %c0_3] : memref<128x128xbf16, #tpu.memory_space<vmem>>, vector<128x128xbf16>
    %c0_4 = arith.constant 0 : index
    %c0_5 = arith.constant 0 : index
    %5 = vector.load %arg4[%c0_4, %c0_5] : memref<128x128xbf16, #tpu.memory_space<vmem>>, vector<128x128xbf16>
    %cst = arith.constant dense<0.000000e+00> : vector<128x128xf32>
    %6 = tpu.matmul %4, %5, %cst {dimension_numbers = #tpu.dot_dimension_numbers<[1], [0], [0], [1], [0, 0, 1, 1], [], []>} : vector<128x128xbf16>, vector<128x128xbf16>, vector<128x128xf32> -> vector<128x128xf32>
    %7 = arith.addf %3, %6 : vector<128x128xf32>
    %c0_6 = arith.constant 0 : index
    %c0_7 = arith.constant 0 : index
    %8 = vector.load %arg7[%c0_6, %c0_7] : memref<128x128xf32, #tpu.memory_space<vmem>>, vector<128x128xf32>
    tpu.vector_store %arg7[%c0_6, %c0_7], %7 {strides = array<i32>} : memref<128x128xf32, #tpu.memory_space<vmem>>, vector<128x128xf32>,
    %c0_i32_8 = arith.constant 0 : i32
    %9 = arith.cmpi eq, %arg2, %c0_i32_8 : i32
    %10 = arith.extui %9 : i1 to i32
    %c0_i32_9 = arith.constant 0 : i32
    %11 = arith.cmpi ne, %10, %c0_i32_9 : i32
    scf.if %11 {
      %c0_10 = arith.constant 0 : index
      %c0_11 = arith.constant 0 : index
      %12 = vector.load %arg7[%c0_10, %c0_11] : memref<128x128xf32, #tpu.memory_space<vmem>>, vector<128x128xf32>
      %cst_12 = arith.constant 0.000000e+00 : f32
      %13 = vector.broadcast %cst_12 : f32 to vector<128x128xf32>
      %14 = arith.cmpf ogt, %12, %13 : vector<128x128xf32>
      %cst_13 = arith.constant 0.000000e+00 : f32
      %15 = vector.broadcast %cst_13 : f32 to vector<128x128xf32>
      %16 = arith.minimumf %12, %15 : vector<128x128xf32>
      %17 = math.exp %16 : vector<128x128xf32>
      %cst_14 = arith.constant 1.000000e+00 : f32
      %18 = vector.broadcast %cst_14 : f32 to vector<128x128xf32>
      %19 = arith.subf %17, %18 : vector<128x128xf32>
      %20 = arith.select %14, %12, %19 : vector<128x128xi1>, vector<128x128xf32>
      %21 = arith.truncf %20 : vector<128x128xf32> to vector<128x128xbf16>
      %c0_15 = arith.constant 0 : index
      %c0_16 = arith.constant 0 : index
      %22 = vector.load %arg6[%c0_15, %c0_16] : memref<128x128xbf16, #tpu.memory_space<vmem>>, vector<128x128xbf16>
      tpu.vector_store %arg6[%c0_15, %c0_16], %21 {strides = array<i32>} : memref<128x128xbf16, #tpu.memory_space<vmem>>, vector<128x128xbf16>,
    } else {
    }
    return
  }
  func.func @transform_0(%arg0: i32, %arg1: i32, %arg2: i32) -> (i32, i32) {
    %c0_i32 = arith.constant 0 : i32
    return %arg1, %arg2 : i32, i32
  }
  func.func @transform_1(%arg0: i32, %arg1: i32, %arg2: i32) -> (i32, i32) {
    %c0_i32 = arith.constant 0 : i32
    return %arg2, %arg0 : i32, i32
  }
  func.func @transform_2(%arg0: i32, %arg1: i32, %arg2: i32) -> (i32, i32) {
    %c0_i32 = arith.constant 0 : i32
    %c0_i32_0 = arith.constant 0 : i32
    return %c0_i32, %arg0 : i32, i32
  }
  func.func @transform_3(%arg0: i32, %arg1: i32, %arg2: i32) -> (i32, i32) {
    %c0_i32 = arith.constant 0 : i32
    return %arg1, %arg0 : i32, i32
  }
}

module attributes {stable_mosaic.version = 11 : i64} {
  func.func @_conv_gemm_kernel(%arg0: i32, %arg1: i32, %arg2: i32, %arg3: memref<128x256xbf16, #tpu.memory_space<vmem>>, %arg4: memref<256x128xbf16, #tpu.memory_space<vmem>>, %arg5: memref<1x128xf32, #tpu.memory_space<vmem>>, %arg6: memref<128x128xbf16, #tpu.memory_space<vmem>>, %arg7: memref<128x128xf32, #tpu.memory_space<vmem>>) attributes {dimension_semantics = [#tpu.dimension_semantics<parallel>, #tpu.dimension_semantics<parallel>, #tpu.dimension_semantics<arbitrary>], iteration_bounds = array<i64: 1, 1, 1>, scalar_prefetch = 0 : i64, scratch_operands = 1 : i64, tpu.core_type = #tpu.core_type<tc>, window_params = [{transform_indices = @transform_0, window_bounds = array<i64: 128, 256>}, {transform_indices = @transform_1, window_bounds = array<i64: 256, 128>}, {transform_indices = @transform_2, window_bounds = array<i64: 1, 128>}, {transform_indices = @transform_3, window_bounds = array<i64: 128, 128>}]} {
    %c0_i32 = arith.constant 0 : i32
    %0 = arith.cmpi eq, %arg2, %c0_i32 : i32
    %1 = arith.extui %0 : i1 to i32
    %c0_i32_0 = arith.constant 0 : i32
    %2 = arith.cmpi ne, %1, %c0_i32_0 : i32
    scf.if %2 {
      %c0_10 = arith.constant 0 : index
      %c0_11 = arith.constant 0 : index
      %12 = vector.load %arg5[%c0_10, %c0_11] : memref<1x128xf32, #tpu.memory_space<vmem>>, vector<1x128xf32>
      %13 = vector.shape_cast %12 : vector<1x128xf32> to vector<1x128xf32>
      %14 = vector.broadcast %13 : vector<1x128xf32> to vector<128x128xf32>
      %c0_12 = arith.constant 0 : index
      %c0_13 = arith.constant 0 : index
      %15 = vector.load %arg7[%c0_12, %c0_13] : memref<128x128xf32, #tpu.memory_space<vmem>>, vector<128x128xf32>
      tpu.vector_store %arg7[%c0_12, %c0_13], %14 {strides = array<i32>} : memref<128x128xf32, #tpu.memory_space<vmem>>, vector<128x128xf32>,
    } else {
    }
    %c0 = arith.constant 0 : index
    %c0_1 = arith.constant 0 : index
    %3 = vector.load %arg7[%c0, %c0_1] : memref<128x128xf32, #tpu.memory_space<vmem>>, vector<128x128xf32>
    %c0_2 = arith.constant 0 : index
    %c0_3 = arith.constant 0 : index
    %4 = vector.load %arg3[%c0_2, %c0_3] : memref<128x256xbf16, #tpu.memory_space<vmem>>, vector<128x256xbf16>
    %c0_4 = arith.constant 0 : index
    %c0_5 = arith.constant 0 : index
    %5 = vector.load %arg4[%c0_4, %c0_5] : memref<256x128xbf16, #tpu.memory_space<vmem>>, vector<256x128xbf16>
    %cst = arith.constant dense<0.000000e+00> : vector<128x128xf32>
    %6 = tpu.matmul %4, %5, %cst {dimension_numbers = #tpu.dot_dimension_numbers<[1], [0], [0], [1], [0, 0, 1, 1], [], []>} : vector<128x256xbf16>, vector<256x128xbf16>, vector<128x128xf32> -> vector<128x128xf32>
    %7 = arith.addf %3, %6 : vector<128x128xf32>
    %c0_6 = arith.constant 0 : index
    %c0_7 = arith.constant 0 : index
    %8 = vector.load %arg7[%c0_6, %c0_7] : memref<128x128xf32, #tpu.memory_space<vmem>>, vector<128x128xf32>
    tpu.vector_store %arg7[%c0_6, %c0_7], %7 {strides = array<i32>} : memref<128x128xf32, #tpu.memory_space<vmem>>, vector<128x128xf32>,
    %c0_i32_8 = arith.constant 0 : i32
    %9 = arith.cmpi eq, %arg2, %c0_i32_8 : i32
    %10 = arith.extui %9 : i1 to i32
    %c0_i32_9 = arith.constant 0 : i32
    %11 = arith.cmpi ne, %10, %c0_i32_9 : i32
    scf.if %11 {
      %c0_10 = arith.constant 0 : index
      %c0_11 = arith.constant 0 : index
      %12 = vector.load %arg7[%c0_10, %c0_11] : memref<128x128xf32, #tpu.memory_space<vmem>>, vector<128x128xf32>
      %cst_12 = arith.constant 0.000000e+00 : f32
      %13 = vector.broadcast %cst_12 : f32 to vector<128x128xf32>
      %14 = arith.cmpf ogt, %12, %13 : vector<128x128xf32>
      %cst_13 = arith.constant 0.000000e+00 : f32
      %15 = vector.broadcast %cst_13 : f32 to vector<128x128xf32>
      %16 = arith.minimumf %12, %15 : vector<128x128xf32>
      %17 = math.exp %16 : vector<128x128xf32>
      %cst_14 = arith.constant 1.000000e+00 : f32
      %18 = vector.broadcast %cst_14 : f32 to vector<128x128xf32>
      %19 = arith.subf %17, %18 : vector<128x128xf32>
      %20 = arith.select %14, %12, %19 : vector<128x128xi1>, vector<128x128xf32>
      %21 = arith.truncf %20 : vector<128x128xf32> to vector<128x128xbf16>
      %c0_15 = arith.constant 0 : index
      %c0_16 = arith.constant 0 : index
      %22 = vector.load %arg6[%c0_15, %c0_16] : memref<128x128xbf16, #tpu.memory_space<vmem>>, vector<128x128xbf16>
      tpu.vector_store %arg6[%c0_15, %c0_16], %21 {strides = array<i32>} : memref<128x128xbf16, #tpu.memory_space<vmem>>, vector<128x128xbf16>,
    } else {
    }
    return
  }
  func.func @transform_0(%arg0: i32, %arg1: i32, %arg2: i32) -> (i32, i32) {
    %c0_i32 = arith.constant 0 : i32
    return %arg1, %arg2 : i32, i32
  }
  func.func @transform_1(%arg0: i32, %arg1: i32, %arg2: i32) -> (i32, i32) {
    %c0_i32 = arith.constant 0 : i32
    return %arg2, %arg0 : i32, i32
  }
  func.func @transform_2(%arg0: i32, %arg1: i32, %arg2: i32) -> (i32, i32) {
    %c0_i32 = arith.constant 0 : i32
    %c0_i32_0 = arith.constant 0 : i32
    return %c0_i32, %arg0 : i32, i32
  }
  func.func @transform_3(%arg0: i32, %arg1: i32, %arg2: i32) -> (i32, i32) {
    %c0_i32 = arith.constant 0 : i32
    return %arg1, %arg0 : i32, i32
  }
}

module attributes {stable_mosaic.version = 11 : i64} {
  func.func @_conv_gemm_kernel(%arg0: i32, %arg1: i32, %arg2: i32, %arg3: memref<32x256xbf16, #tpu.memory_space<vmem>>, %arg4: memref<256x128xbf16, #tpu.memory_space<vmem>>, %arg5: memref<1x128xf32, #tpu.memory_space<vmem>>, %arg6: memref<32x128xbf16, #tpu.memory_space<vmem>>, %arg7: memref<32x128xf32, #tpu.memory_space<vmem>>) attributes {dimension_semantics = [#tpu.dimension_semantics<parallel>, #tpu.dimension_semantics<parallel>, #tpu.dimension_semantics<arbitrary>], iteration_bounds = array<i64: 1, 1, 1>, scalar_prefetch = 0 : i64, scratch_operands = 1 : i64, tpu.core_type = #tpu.core_type<tc>, window_params = [{transform_indices = @transform_0, window_bounds = array<i64: 32, 256>}, {transform_indices = @transform_1, window_bounds = array<i64: 256, 128>}, {transform_indices = @transform_2, window_bounds = array<i64: 1, 128>}, {transform_indices = @transform_3, window_bounds = array<i64: 32, 128>}]} {
    %c0_i32 = arith.constant 0 : i32
    %0 = arith.cmpi eq, %arg2, %c0_i32 : i32
    %1 = arith.extui %0 : i1 to i32
    %c0_i32_0 = arith.constant 0 : i32
    %2 = arith.cmpi ne, %1, %c0_i32_0 : i32
    scf.if %2 {
      %c0_10 = arith.constant 0 : index
      %c0_11 = arith.constant 0 : index
      %12 = vector.load %arg5[%c0_10, %c0_11] : memref<1x128xf32, #tpu.memory_space<vmem>>, vector<1x128xf32>
      %13 = vector.shape_cast %12 : vector<1x128xf32> to vector<1x128xf32>
      %14 = vector.broadcast %13 : vector<1x128xf32> to vector<32x128xf32>
      %c0_12 = arith.constant 0 : index
      %c0_13 = arith.constant 0 : index
      %15 = vector.load %arg7[%c0_12, %c0_13] : memref<32x128xf32, #tpu.memory_space<vmem>>, vector<32x128xf32>
      tpu.vector_store %arg7[%c0_12, %c0_13], %14 {strides = array<i32>} : memref<32x128xf32, #tpu.memory_space<vmem>>, vector<32x128xf32>,
    } else {
    }
    %c0 = arith.constant 0 : index
    %c0_1 = arith.constant 0 : index
    %3 = vector.load %arg7[%c0, %c0_1] : memref<32x128xf32, #tpu.memory_space<vmem>>, vector<32x128xf32>
    %c0_2 = arith.constant 0 : index
    %c0_3 = arith.constant 0 : index
    %4 = vector.load %arg3[%c0_2, %c0_3] : memref<32x256xbf16, #tpu.memory_space<vmem>>, vector<32x256xbf16>
    %c0_4 = arith.constant 0 : index
    %c0_5 = arith.constant 0 : index
    %5 = vector.load %arg4[%c0_4, %c0_5] : memref<256x128xbf16, #tpu.memory_space<vmem>>, vector<256x128xbf16>
    %cst = arith.constant dense<0.000000e+00> : vector<32x128xf32>
    %6 = tpu.matmul %4, %5, %cst {dimension_numbers = #tpu.dot_dimension_numbers<[1], [0], [0], [1], [0, 0, 1, 1], [], []>} : vector<32x256xbf16>, vector<256x128xbf16>, vector<32x128xf32> -> vector<32x128xf32>
    %7 = arith.addf %3, %6 : vector<32x128xf32>
    %c0_6 = arith.constant 0 : index
    %c0_7 = arith.constant 0 : index
    %8 = vector.load %arg7[%c0_6, %c0_7] : memref<32x128xf32, #tpu.memory_space<vmem>>, vector<32x128xf32>
    tpu.vector_store %arg7[%c0_6, %c0_7], %7 {strides = array<i32>} : memref<32x128xf32, #tpu.memory_space<vmem>>, vector<32x128xf32>,
    %c0_i32_8 = arith.constant 0 : i32
    %9 = arith.cmpi eq, %arg2, %c0_i32_8 : i32
    %10 = arith.extui %9 : i1 to i32
    %c0_i32_9 = arith.constant 0 : i32
    %11 = arith.cmpi ne, %10, %c0_i32_9 : i32
    scf.if %11 {
      %c0_10 = arith.constant 0 : index
      %c0_11 = arith.constant 0 : index
      %12 = vector.load %arg7[%c0_10, %c0_11] : memref<32x128xf32, #tpu.memory_space<vmem>>, vector<32x128xf32>
      %cst_12 = arith.constant 0.000000e+00 : f32
      %13 = vector.broadcast %cst_12 : f32 to vector<32x128xf32>
      %14 = arith.cmpf ogt, %12, %13 : vector<32x128xf32>
      %cst_13 = arith.constant 0.000000e+00 : f32
      %15 = vector.broadcast %cst_13 : f32 to vector<32x128xf32>
      %16 = arith.minimumf %12, %15 : vector<32x128xf32>
      %17 = math.exp %16 : vector<32x128xf32>
      %cst_14 = arith.constant 1.000000e+00 : f32
      %18 = vector.broadcast %cst_14 : f32 to vector<32x128xf32>
      %19 = arith.subf %17, %18 : vector<32x128xf32>
      %20 = arith.select %14, %12, %19 : vector<32x128xi1>, vector<32x128xf32>
      %21 = arith.truncf %20 : vector<32x128xf32> to vector<32x128xbf16>
      %c0_15 = arith.constant 0 : index
      %c0_16 = arith.constant 0 : index
      %22 = vector.load %arg6[%c0_15, %c0_16] : memref<32x128xbf16, #tpu.memory_space<vmem>>, vector<32x128xbf16>
      tpu.vector_store %arg6[%c0_15, %c0_16], %21 {strides = array<i32>} : memref<32x128xbf16, #tpu.memory_space<vmem>>, vector<32x128xbf16>,
    } else {
    }
    return
  }
  func.func @transform_0(%arg0: i32, %arg1: i32, %arg2: i32) -> (i32, i32) {
    %c0_i32 = arith.constant 0 : i32
    return %arg1, %arg2 : i32, i32
  }
  func.func @transform_1(%arg0: i32, %arg1: i32, %arg2: i32) -> (i32, i32) {
    %c0_i32 = arith.constant 0 : i32
    return %arg2, %arg0 : i32, i32
  }
  func.func @transform_2(%arg0: i32, %arg1: i32, %arg2: i32) -> (i32, i32) {
    %c0_i32 = arith.constant 0 : i32
    %c0_i32_0 = arith.constant 0 : i32
    return %c0_i32, %arg0 : i32, i32
  }
  func.func @transform_3(%arg0: i32, %arg1: i32, %arg2: i32) -> (i32, i32) {
    %c0_i32 = arith.constant 0 : i32
    return %arg1, %arg0 : i32, i32
  }
}

module attributes {stable_mosaic.version = 11 : i64} {
  func.func @_conv_gemm_kernel(%arg0: i32, %arg1: i32, %arg2: i32, %arg3: memref<32x384xbf16, #tpu.memory_space<vmem>>, %arg4: memref<384x128xbf16, #tpu.memory_space<vmem>>, %arg5: memref<1x128xf32, #tpu.memory_space<vmem>>, %arg6: memref<32x128xbf16, #tpu.memory_space<vmem>>, %arg7: memref<32x128xf32, #tpu.memory_space<vmem>>) attributes {dimension_semantics = [#tpu.dimension_semantics<parallel>, #tpu.dimension_semantics<parallel>, #tpu.dimension_semantics<arbitrary>], iteration_bounds = array<i64: 1, 1, 1>, scalar_prefetch = 0 : i64, scratch_operands = 1 : i64, tpu.core_type = #tpu.core_type<tc>, window_params = [{transform_indices = @transform_0, window_bounds = array<i64: 32, 384>}, {transform_indices = @transform_1, window_bounds = array<i64: 384, 128>}, {transform_indices = @transform_2, window_bounds = array<i64: 1, 128>}, {transform_indices = @transform_3, window_bounds = array<i64: 32, 128>}]} {
    %c0_i32 = arith.constant 0 : i32
    %0 = arith.cmpi eq, %arg2, %c0_i32 : i32
    %1 = arith.extui %0 : i1 to i32
    %c0_i32_0 = arith.constant 0 : i32
    %2 = arith.cmpi ne, %1, %c0_i32_0 : i32
    scf.if %2 {
      %c0_10 = arith.constant 0 : index
      %c0_11 = arith.constant 0 : index
      %12 = vector.load %arg5[%c0_10, %c0_11] : memref<1x128xf32, #tpu.memory_space<vmem>>, vector<1x128xf32>
      %13 = vector.shape_cast %12 : vector<1x128xf32> to vector<1x128xf32>
      %14 = vector.broadcast %13 : vector<1x128xf32> to vector<32x128xf32>
      %c0_12 = arith.constant 0 : index
      %c0_13 = arith.constant 0 : index
      %15 = vector.load %arg7[%c0_12, %c0_13] : memref<32x128xf32, #tpu.memory_space<vmem>>, vector<32x128xf32>
      tpu.vector_store %arg7[%c0_12, %c0_13], %14 {strides = array<i32>} : memref<32x128xf32, #tpu.memory_space<vmem>>, vector<32x128xf32>,
    } else {
    }
    %c0 = arith.constant 0 : index
    %c0_1 = arith.constant 0 : index
    %3 = vector.load %arg7[%c0, %c0_1] : memref<32x128xf32, #tpu.memory_space<vmem>>, vector<32x128xf32>
    %c0_2 = arith.constant 0 : index
    %c0_3 = arith.constant 0 : index
    %4 = vector.load %arg3[%c0_2, %c0_3] : memref<32x384xbf16, #tpu.memory_space<vmem>>, vector<32x384xbf16>
    %c0_4 = arith.constant 0 : index
    %c0_5 = arith.constant 0 : index
    %5 = vector.load %arg4[%c0_4, %c0_5] : memref<384x128xbf16, #tpu.memory_space<vmem>>, vector<384x128xbf16>
    %cst = arith.constant dense<0.000000e+00> : vector<32x128xf32>
    %6 = tpu.matmul %4, %5, %cst {dimension_numbers = #tpu.dot_dimension_numbers<[1], [0], [0], [1], [0, 0, 1, 1], [], []>} : vector<32x384xbf16>, vector<384x128xbf16>, vector<32x128xf32> -> vector<32x128xf32>
    %7 = arith.addf %3, %6 : vector<32x128xf32>
    %c0_6 = arith.constant 0 : index
    %c0_7 = arith.constant 0 : index
    %8 = vector.load %arg7[%c0_6, %c0_7] : memref<32x128xf32, #tpu.memory_space<vmem>>, vector<32x128xf32>
    tpu.vector_store %arg7[%c0_6, %c0_7], %7 {strides = array<i32>} : memref<32x128xf32, #tpu.memory_space<vmem>>, vector<32x128xf32>,
    %c0_i32_8 = arith.constant 0 : i32
    %9 = arith.cmpi eq, %arg2, %c0_i32_8 : i32
    %10 = arith.extui %9 : i1 to i32
    %c0_i32_9 = arith.constant 0 : i32
    %11 = arith.cmpi ne, %10, %c0_i32_9 : i32
    scf.if %11 {
      %c0_10 = arith.constant 0 : index
      %c0_11 = arith.constant 0 : index
      %12 = vector.load %arg7[%c0_10, %c0_11] : memref<32x128xf32, #tpu.memory_space<vmem>>, vector<32x128xf32>
      %cst_12 = arith.constant 0.000000e+00 : f32
      %13 = vector.broadcast %cst_12 : f32 to vector<32x128xf32>
      %14 = arith.cmpf ogt, %12, %13 : vector<32x128xf32>
      %cst_13 = arith.constant 0.000000e+00 : f32
      %15 = vector.broadcast %cst_13 : f32 to vector<32x128xf32>
      %16 = arith.minimumf %12, %15 : vector<32x128xf32>
      %17 = math.exp %16 : vector<32x128xf32>
      %cst_14 = arith.constant 1.000000e+00 : f32
      %18 = vector.broadcast %cst_14 : f32 to vector<32x128xf32>
      %19 = arith.subf %17, %18 : vector<32x128xf32>
      %20 = arith.select %14, %12, %19 : vector<32x128xi1>, vector<32x128xf32>
      %21 = arith.truncf %20 : vector<32x128xf32> to vector<32x128xbf16>
      %c0_15 = arith.constant 0 : index
      %c0_16 = arith.constant 0 : index
      %22 = vector.load %arg6[%c0_15, %c0_16] : memref<32x128xbf16, #tpu.memory_space<vmem>>, vector<32x128xbf16>
      tpu.vector_store %arg6[%c0_15, %c0_16], %21 {strides = array<i32>} : memref<32x128xbf16, #tpu.memory_space<vmem>>, vector<32x128xbf16>,
    } else {
    }
    return
  }
  func.func @transform_0(%arg0: i32, %arg1: i32, %arg2: i32) -> (i32, i32) {
    %c0_i32 = arith.constant 0 : i32
    return %arg1, %arg2 : i32, i32
  }
  func.func @transform_1(%arg0: i32, %arg1: i32, %arg2: i32) -> (i32, i32) {
    %c0_i32 = arith.constant 0 : i32
    return %arg2, %arg0 : i32, i32
  }
  func.func @transform_2(%arg0: i32, %arg1: i32, %arg2: i32) -> (i32, i32) {
    %c0_i32 = arith.constant 0 : i32
    %c0_i32_0 = arith.constant 0 : i32
    return %c0_i32, %arg0 : i32, i32
  }
  func.func @transform_3(%arg0: i32, %arg1: i32, %arg2: i32) -> (i32, i32) {
    %c0_i32 = arith.constant 0 : i32
    return %arg1, %arg0 : i32, i32
  }
}

module attributes {stable_mosaic.version = 11 : i64} {
  func.func @_conv_gemm_kernel(%arg0: i32, %arg1: i32, %arg2: i32, %arg3: memref<16x384xbf16, #tpu.memory_space<vmem>>, %arg4: memref<384x128xbf16, #tpu.memory_space<vmem>>, %arg5: memref<1x128xf32, #tpu.memory_space<vmem>>, %arg6: memref<16x128xbf16, #tpu.memory_space<vmem>>, %arg7: memref<16x128xf32, #tpu.memory_space<vmem>>) attributes {dimension_semantics = [#tpu.dimension_semantics<parallel>, #tpu.dimension_semantics<parallel>, #tpu.dimension_semantics<arbitrary>], iteration_bounds = array<i64: 1, 1, 1>, scalar_prefetch = 0 : i64, scratch_operands = 1 : i64, tpu.core_type = #tpu.core_type<tc>, window_params = [{transform_indices = @transform_0, window_bounds = array<i64: 16, 384>}, {transform_indices = @transform_1, window_bounds = array<i64: 384, 128>}, {transform_indices = @transform_2, window_bounds = array<i64: 1, 128>}, {transform_indices = @transform_3, window_bounds = array<i64: 16, 128>}]} {
    %c0_i32 = arith.constant 0 : i32
    %0 = arith.cmpi eq, %arg2, %c0_i32 : i32
    %1 = arith.extui %0 : i1 to i32
    %c0_i32_0 = arith.constant 0 : i32
    %2 = arith.cmpi ne, %1, %c0_i32_0 : i32
    scf.if %2 {
      %c0_10 = arith.constant 0 : index
      %c0_11 = arith.constant 0 : index
      %12 = vector.load %arg5[%c0_10, %c0_11] : memref<1x128xf32, #tpu.memory_space<vmem>>, vector<1x128xf32>
      %13 = vector.shape_cast %12 : vector<1x128xf32> to vector<1x128xf32>
      %14 = vector.broadcast %13 : vector<1x128xf32> to vector<16x128xf32>
      %c0_12 = arith.constant 0 : index
      %c0_13 = arith.constant 0 : index
      %15 = vector.load %arg7[%c0_12, %c0_13] : memref<16x128xf32, #tpu.memory_space<vmem>>, vector<16x128xf32>
      tpu.vector_store %arg7[%c0_12, %c0_13], %14 {strides = array<i32>} : memref<16x128xf32, #tpu.memory_space<vmem>>, vector<16x128xf32>,
    } else {
    }
    %c0 = arith.constant 0 : index
    %c0_1 = arith.constant 0 : index
    %3 = vector.load %arg7[%c0, %c0_1] : memref<16x128xf32, #tpu.memory_space<vmem>>, vector<16x128xf32>
    %c0_2 = arith.constant 0 : index
    %c0_3 = arith.constant 0 : index
    %4 = vector.load %arg3[%c0_2, %c0_3] : memref<16x384xbf16, #tpu.memory_space<vmem>>, vector<16x384xbf16>
    %c0_4 = arith.constant 0 : index
    %c0_5 = arith.constant 0 : index
    %5 = vector.load %arg4[%c0_4, %c0_5] : memref<384x128xbf16, #tpu.memory_space<vmem>>, vector<384x128xbf16>
    %cst = arith.constant dense<0.000000e+00> : vector<16x128xf32>
    %6 = tpu.matmul %4, %5, %cst {dimension_numbers = #tpu.dot_dimension_numbers<[1], [0], [0], [1], [0, 0, 1, 1], [], []>} : vector<16x384xbf16>, vector<384x128xbf16>, vector<16x128xf32> -> vector<16x128xf32>
    %7 = arith.addf %3, %6 : vector<16x128xf32>
    %c0_6 = arith.constant 0 : index
    %c0_7 = arith.constant 0 : index
    %8 = vector.load %arg7[%c0_6, %c0_7] : memref<16x128xf32, #tpu.memory_space<vmem>>, vector<16x128xf32>
    tpu.vector_store %arg7[%c0_6, %c0_7], %7 {strides = array<i32>} : memref<16x128xf32, #tpu.memory_space<vmem>>, vector<16x128xf32>,
    %c0_i32_8 = arith.constant 0 : i32
    %9 = arith.cmpi eq, %arg2, %c0_i32_8 : i32
    %10 = arith.extui %9 : i1 to i32
    %c0_i32_9 = arith.constant 0 : i32
    %11 = arith.cmpi ne, %10, %c0_i32_9 : i32
    scf.if %11 {
      %c0_10 = arith.constant 0 : index
      %c0_11 = arith.constant 0 : index
      %12 = vector.load %arg7[%c0_10, %c0_11] : memref<16x128xf32, #tpu.memory_space<vmem>>, vector<16x128xf32>
      %cst_12 = arith.constant 0.000000e+00 : f32
      %13 = vector.broadcast %cst_12 : f32 to vector<16x128xf32>
      %14 = arith.cmpf ogt, %12, %13 : vector<16x128xf32>
      %cst_13 = arith.constant 0.000000e+00 : f32
      %15 = vector.broadcast %cst_13 : f32 to vector<16x128xf32>
      %16 = arith.minimumf %12, %15 : vector<16x128xf32>
      %17 = math.exp %16 : vector<16x128xf32>
      %cst_14 = arith.constant 1.000000e+00 : f32
      %18 = vector.broadcast %cst_14 : f32 to vector<16x128xf32>
      %19 = arith.subf %17, %18 : vector<16x128xf32>
      %20 = arith.select %14, %12, %19 : vector<16x128xi1>, vector<16x128xf32>
      %21 = arith.truncf %20 : vector<16x128xf32> to vector<16x128xbf16>
      %c0_15 = arith.constant 0 : index
      %c0_16 = arith.constant 0 : index
      %22 = vector.load %arg6[%c0_15, %c0_16] : memref<16x128xbf16, #tpu.memory_space<vmem>>, vector<16x128xbf16>
      tpu.vector_store %arg6[%c0_15, %c0_16], %21 {strides = array<i32>} : memref<16x128xbf16, #tpu.memory_space<vmem>>, vector<16x128xbf16>,
    } else {
    }
    return
  }
  func.func @transform_0(%arg0: i32, %arg1: i32, %arg2: i32) -> (i32, i32) {
    %c0_i32 = arith.constant 0 : i32
    return %arg1, %arg2 : i32, i32
  }
  func.func @transform_1(%arg0: i32, %arg1: i32, %arg2: i32) -> (i32, i32) {
    %c0_i32 = arith.constant 0 : i32
    return %arg2, %arg0 : i32, i32
  }
  func.func @transform_2(%arg0: i32, %arg1: i32, %arg2: i32) -> (i32, i32) {
    %c0_i32 = arith.constant 0 : i32
    %c0_i32_0 = arith.constant 0 : i32
    return %c0_i32, %arg0 : i32, i32
  }
  func.func @transform_3(%arg0: i32, %arg1: i32, %arg2: i32) -> (i32, i32) {
    %c0_i32 = arith.constant 0 : i32
    return %arg1, %arg0 : i32, i32
  }
}

module attributes {stable_mosaic.version = 11 : i64} {
  func.func @_conv_gemm_kernel(%arg0: i32, %arg1: i32, %arg2: i32, %arg3: memref<16x384xbf16, #tpu.memory_space<vmem>>, %arg4: memref<384x128xbf16, #tpu.memory_space<vmem>>, %arg5: memref<1x128xf32, #tpu.memory_space<vmem>>, %arg6: memref<16x128xbf16, #tpu.memory_space<vmem>>, %arg7: memref<16x128xf32, #tpu.memory_space<vmem>>) attributes {dimension_semantics = [#tpu.dimension_semantics<parallel>, #tpu.dimension_semantics<parallel>, #tpu.dimension_semantics<arbitrary>], iteration_bounds = array<i64: 1, 1, 2>, scalar_prefetch = 0 : i64, scratch_operands = 1 : i64, tpu.core_type = #tpu.core_type<tc>, window_params = [{transform_indices = @transform_0, window_bounds = array<i64: 16, 384>}, {transform_indices = @transform_1, window_bounds = array<i64: 384, 128>}, {transform_indices = @transform_2, window_bounds = array<i64: 1, 128>}, {transform_indices = @transform_3, window_bounds = array<i64: 16, 128>}]} {
    %c0_i32 = arith.constant 0 : i32
    %0 = arith.cmpi eq, %arg2, %c0_i32 : i32
    %1 = arith.extui %0 : i1 to i32
    %c0_i32_0 = arith.constant 0 : i32
    %2 = arith.cmpi ne, %1, %c0_i32_0 : i32
    scf.if %2 {
      %c0_9 = arith.constant 0 : index
      %c0_10 = arith.constant 0 : index
      %12 = vector.load %arg5[%c0_9, %c0_10] : memref<1x128xf32, #tpu.memory_space<vmem>>, vector<1x128xf32>
      %13 = vector.shape_cast %12 : vector<1x128xf32> to vector<1x128xf32>
      %14 = vector.broadcast %13 : vector<1x128xf32> to vector<16x128xf32>
      %c0_11 = arith.constant 0 : index
      %c0_12 = arith.constant 0 : index
      %15 = vector.load %arg7[%c0_11, %c0_12] : memref<16x128xf32, #tpu.memory_space<vmem>>, vector<16x128xf32>
      tpu.vector_store %arg7[%c0_11, %c0_12], %14 {strides = array<i32>} : memref<16x128xf32, #tpu.memory_space<vmem>>, vector<16x128xf32>,
    } else {
    }
    %c0 = arith.constant 0 : index
    %c0_1 = arith.constant 0 : index
    %3 = vector.load %arg7[%c0, %c0_1] : memref<16x128xf32, #tpu.memory_space<vmem>>, vector<16x128xf32>
    %c0_2 = arith.constant 0 : index
    %c0_3 = arith.constant 0 : index
    %4 = vector.load %arg3[%c0_2, %c0_3] : memref<16x384xbf16, #tpu.memory_space<vmem>>, vector<16x384xbf16>
    %c0_4 = arith.constant 0 : index
    %c0_5 = arith.constant 0 : index
    %5 = vector.load %arg4[%c0_4, %c0_5] : memref<384x128xbf16, #tpu.memory_space<vmem>>, vector<384x128xbf16>
    %cst = arith.constant dense<0.000000e+00> : vector<16x128xf32>
    %6 = tpu.matmul %4, %5, %cst {dimension_numbers = #tpu.dot_dimension_numbers<[1], [0], [0], [1], [0, 0, 1, 1], [], []>} : vector<16x384xbf16>, vector<384x128xbf16>, vector<16x128xf32> -> vector<16x128xf32>
    %7 = arith.addf %3, %6 : vector<16x128xf32>
    %c0_6 = arith.constant 0 : index
    %c0_7 = arith.constant 0 : index
    %8 = vector.load %arg7[%c0_6, %c0_7] : memref<16x128xf32, #tpu.memory_space<vmem>>, vector<16x128xf32>
    tpu.vector_store %arg7[%c0_6, %c0_7], %7 {strides = array<i32>} : memref<16x128xf32, #tpu.memory_space<vmem>>, vector<16x128xf32>,
    %c1_i32 = arith.constant 1 : i32
    %9 = arith.cmpi eq, %arg2, %c1_i32 : i32
    %10 = arith.extui %9 : i1 to i32
    %c0_i32_8 = arith.constant 0 : i32
    %11 = arith.cmpi ne, %10, %c0_i32_8 : i32
    scf.if %11 {
      %c0_9 = arith.constant 0 : index
      %c0_10 = arith.constant 0 : index
      %12 = vector.load %arg7[%c0_9, %c0_10] : memref<16x128xf32, #tpu.memory_space<vmem>>, vector<16x128xf32>
      %cst_11 = arith.constant 0.000000e+00 : f32
      %13 = vector.broadcast %cst_11 : f32 to vector<16x128xf32>
      %14 = arith.cmpf ogt, %12, %13 : vector<16x128xf32>
      %cst_12 = arith.constant 0.000000e+00 : f32
      %15 = vector.broadcast %cst_12 : f32 to vector<16x128xf32>
      %16 = arith.minimumf %12, %15 : vector<16x128xf32>
      %17 = math.exp %16 : vector<16x128xf32>
      %cst_13 = arith.constant 1.000000e+00 : f32
      %18 = vector.broadcast %cst_13 : f32 to vector<16x128xf32>
      %19 = arith.subf %17, %18 : vector<16x128xf32>
      %20 = arith.select %14, %12, %19 : vector<16x128xi1>, vector<16x128xf32>
      %21 = arith.truncf %20 : vector<16x128xf32> to vector<16x128xbf16>
      %c0_14 = arith.constant 0 : index
      %c0_15 = arith.constant 0 : index
      %22 = vector.load %arg6[%c0_14, %c0_15] : memref<16x128xbf16, #tpu.memory_space<vmem>>, vector<16x128xbf16>
      tpu.vector_store %arg6[%c0_14, %c0_15], %21 {strides = array<i32>} : memref<16x128xbf16, #tpu.memory_space<vmem>>, vector<16x128xbf16>,
    } else {
    }
    return
  }
  func.func @transform_0(%arg0: i32, %arg1: i32, %arg2: i32) -> (i32, i32) {
    %c0_i32 = arith.constant 0 : i32
    return %arg1, %arg2 : i32, i32
  }
  func.func @transform_1(%arg0: i32, %arg1: i32, %arg2: i32) -> (i32, i32) {
    %c0_i32 = arith.constant 0 : i32
    return %arg2, %arg0 : i32, i32
  }
  func.func @transform_2(%arg0: i32, %arg1: i32, %arg2: i32) -> (i32, i32) {
    %c0_i32 = arith.constant 0 : i32
    %c0_i32_0 = arith.constant 0 : i32
    return %c0_i32, %arg0 : i32, i32
  }
  func.func @transform_3(%arg0: i32, %arg1: i32, %arg2: i32) -> (i32, i32) {
    %c0_i32 = arith.constant 0 : i32
    return %arg1, %arg0 : i32, i32
  }
}

module attributes {stable_mosaic.version = 11 : i64} {
  func.func @_conv_gemm_kernel(%arg0: i32, %arg1: i32, %arg2: i32, %arg3: memref<256x128xbf16, #tpu.memory_space<vmem>>, %arg4: memref<128x128xbf16, #tpu.memory_space<vmem>>, %arg5: memref<1x128xf32, #tpu.memory_space<vmem>>, %arg6: memref<256x128xf32, #tpu.memory_space<vmem>>, %arg7: memref<256x128xf32, #tpu.memory_space<vmem>>) attributes {dimension_semantics = [#tpu.dimension_semantics<parallel>, #tpu.dimension_semantics<parallel>, #tpu.dimension_semantics<arbitrary>], iteration_bounds = array<i64: 1, 2, 1>, scalar_prefetch = 0 : i64, scratch_operands = 1 : i64, tpu.core_type = #tpu.core_type<tc>, window_params = [{transform_indices = @transform_0, window_bounds = array<i64: 256, 128>}, {transform_indices = @transform_1, window_bounds = array<i64: 128, 128>}, {transform_indices = @transform_2, window_bounds = array<i64: 1, 128>}, {transform_indices = @transform_3, window_bounds = array<i64: 256, 128>}]} {
    %c0_i32 = arith.constant 0 : i32
    %0 = arith.cmpi eq, %arg2, %c0_i32 : i32
    %1 = arith.extui %0 : i1 to i32
    %c0_i32_0 = arith.constant 0 : i32
    %2 = arith.cmpi ne, %1, %c0_i32_0 : i32
    scf.if %2 {
      %c0_10 = arith.constant 0 : index
      %c0_11 = arith.constant 0 : index
      %12 = vector.load %arg5[%c0_10, %c0_11] : memref<1x128xf32, #tpu.memory_space<vmem>>, vector<1x128xf32>
      %13 = vector.shape_cast %12 : vector<1x128xf32> to vector<1x128xf32>
      %14 = vector.broadcast %13 : vector<1x128xf32> to vector<256x128xf32>
      %c0_12 = arith.constant 0 : index
      %c0_13 = arith.constant 0 : index
      %15 = vector.load %arg7[%c0_12, %c0_13] : memref<256x128xf32, #tpu.memory_space<vmem>>, vector<256x128xf32>
      tpu.vector_store %arg7[%c0_12, %c0_13], %14 {strides = array<i32>} : memref<256x128xf32, #tpu.memory_space<vmem>>, vector<256x128xf32>,
    } else {
    }
    %c0 = arith.constant 0 : index
    %c0_1 = arith.constant 0 : index
    %3 = vector.load %arg7[%c0, %c0_1] : memref<256x128xf32, #tpu.memory_space<vmem>>, vector<256x128xf32>
    %c0_2 = arith.constant 0 : index
    %c0_3 = arith.constant 0 : index
    %4 = vector.load %arg3[%c0_2, %c0_3] : memref<256x128xbf16, #tpu.memory_space<vmem>>, vector<256x128xbf16>
    %c0_4 = arith.constant 0 : index
    %c0_5 = arith.constant 0 : index
    %5 = vector.load %arg4[%c0_4, %c0_5] : memref<128x128xbf16, #tpu.memory_space<vmem>>, vector<128x128xbf16>
    %cst = arith.constant dense<0.000000e+00> : vector<256x128xf32>
    %6 = tpu.matmul %4, %5, %cst {dimension_numbers = #tpu.dot_dimension_numbers<[1], [0], [0], [1], [0, 0, 1, 1], [], []>} : vector<256x128xbf16>, vector<128x128xbf16>, vector<256x128xf32> -> vector<256x128xf32>
    %7 = arith.addf %3, %6 : vector<256x128xf32>
    %c0_6 = arith.constant 0 : index
    %c0_7 = arith.constant 0 : index
    %8 = vector.load %arg7[%c0_6, %c0_7] : memref<256x128xf32, #tpu.memory_space<vmem>>, vector<256x128xf32>
    tpu.vector_store %arg7[%c0_6, %c0_7], %7 {strides = array<i32>} : memref<256x128xf32, #tpu.memory_space<vmem>>, vector<256x128xf32>,
    %c0_i32_8 = arith.constant 0 : i32
    %9 = arith.cmpi eq, %arg2, %c0_i32_8 : i32
    %10 = arith.extui %9 : i1 to i32
    %c0_i32_9 = arith.constant 0 : i32
    %11 = arith.cmpi ne, %10, %c0_i32_9 : i32
    scf.if %11 {
      %c0_10 = arith.constant 0 : index
      %c0_11 = arith.constant 0 : index
      %12 = vector.load %arg7[%c0_10, %c0_11] : memref<256x128xf32, #tpu.memory_space<vmem>>, vector<256x128xf32>
      %cst_12 = arith.constant -1.000000e+00 : f32
      %cst_13 = arith.constant 1.000000e+00 : f32
      %13 = vector.broadcast %cst_12 : f32 to vector<256x128xf32>
      %14 = arith.maximumf %13, %12 : vector<256x128xf32>
      %15 = vector.broadcast %cst_13 : f32 to vector<256x128xf32>
      %16 = arith.minimumf %15, %14 : vector<256x128xf32>
      %c0_14 = arith.constant 0 : index
      %c0_15 = arith.constant 0 : index
      %17 = vector.load %arg6[%c0_14, %c0_15] : memref<256x128xf32, #tpu.memory_space<vmem>>, vector<256x128xf32>
      tpu.vector_store %arg6[%c0_14, %c0_15], %16 {strides = array<i32>} : memref<256x128xf32, #tpu.memory_space<vmem>>, vector<256x128xf32>,
    } else {
    }
    return
  }
  func.func @transform_0(%arg0: i32, %arg1: i32, %arg2: i32) -> (i32, i32) {
    %c0_i32 = arith.constant 0 : i32
    return %arg1, %arg2 : i32, i32
  }
  func.func @transform_1(%arg0: i32, %arg1: i32, %arg2: i32) -> (i32, i32) {
    %c0_i32 = arith.constant 0 : i32
    return %arg2, %arg0 : i32, i32
  }
  func.func @transform_2(%arg0: i32, %arg1: i32, %arg2: i32) -> (i32, i32) {
    %c0_i32 = arith.constant 0 : i32
    %c0_i32_0 = arith.constant 0 : i32
    return %c0_i32, %arg0 : i32, i32
  }
  func.func @transform_3(%arg0: i32, %arg1: i32, %arg2: i32) -> (i32, i32) {
    %c0_i32 = arith.constant 0 : i32
    return %arg1, %arg0 : i32, i32
  }
}

</mosaic_0001>

<bundles_post_ra>
// kernel: _lambda_.20
= control target key start
LH: loop header
LB: loop body
LE: loop exit
PB: predicated region body
PF: predicated region fallthrough
CT: control target
= control target key end

     0   :  { %s1723_s12 = smov 0   ;;  %s1725_s13 = smov 0   ;;  %s2104_s0 = inlined_call_operand.vmem [shape: bf16[512,128], index: 0, kind: input, shape index: {}]   ;;  %s2105_s1 = inlined_call_operand.vmem [shape: bf16[128,128], index: 1, kind: input, shape index: {}]   ;;  %s2106_s2 = inlined_call_operand.vmem [shape: f32[1,128], index: 2, kind: input, shape index: {}]   ;;  %s2107_s3 = inlined_call_operand.vmem [shape: bf16[512,128], index: 3, kind: output, shape index: {}]  }
   0x1   :  { %s1727_s14 = smov 0  }
   0x2 LB: > { %s28_s15 = sadd.s32 1, %s1697_s13  ;;  %p1256_p0 = scmp.ge.s32.totalorder %s1701_s14, 1  ;;  %s1701_s14 = sphi %s1727_s14, %s13_s14   ;;  %s1697_s13 = sphi %s1725_s13, %s2109_s13   ;;  %s1693_s12 = sphi %s1723_s12, %s2108_s12  }
   0x3   : > { %p30_p1 = scmp.ge.s32.totalorder %s28_s15, 2  ;;  %p188_p2 = scmp.lt.s32.totalorder %s1701_s14, 3 }
   0x5   : > { %s2111_s15 = smov (%p30_p1, %s28_s15), 0  ;;  %p189_p3 = pnand %p1256_p0, %p188_p2 }
   0x6   : > { %v1591_v0 = vld [vmem:[%s2105_s1] sm:$0xff] (!%p189_p3)   ;;  %s1257_s18 = sshll.u32 (!%p189_p3), %s1693_s12, 5  ;;  %v1592_v1 = vld [vmem:[%s2105_s1 + $0x8] sm:$0xff] (!%p189_p3)   ;;  %v1593_v2 = vld [vmem:[%s2105_s1 + $0x10] sm:$0xff] (!%p189_p3)  }
   0x7   : > { %192 = sbr.rel (%p189_p3) target bundleno = 321 (0x141), region = 32  ;;  %p230_p4 = scmp.lt.s32.totalorder (!%p189_p3), %s1257_s18, 63  ;;  %1503 = vmatprep.subr.bf16.mxu0 (!%p189_p3), %v1591_v0  ;;  %1551 = vmatprep.subr.bf16.mxu1 (!%p189_p3), %v1591_v0  ;;  %v1594_v3 = vld [vmem:[%s2105_s1 + $0x18] sm:$0xff] (!%p189_p3)   ;;  %v1595_v6 = vld [vmem:[%s2105_s1 + $0x20] sm:$0xff] (!%p189_p3)   ;;  %v1596_v7 = vld [vmem:[%s2105_s1 + $0x28] sm:$0xff] (!%p189_p3)  }
   0x8   : > { %1504 = vmatpush3.bf16.msra.mxu0 (!%p189_p3), %v1591_v0  ;;  %1559 = vmatpush3.bf16.msra.mxu1 (!%p189_p3), %v1591_v0  ;;  %v1597_v8 = vld [vmem:[%s2105_s1 + $0x30] sm:$0xff] (!%p189_p3)   ;;  %v1598_v9 = vld [vmem:[%s2105_s1 + $0x38] sm:$0xff] (!%p189_p3)   ;;  %v1794_v24 = vld [vmem:[%s2106_s2] ss:$0 sm:$0xff] (!%p189_p3) }
   0x9   : > { %1505 = vmatprep.subr.bf16.mxu0 (!%p189_p3), %v1592_v1  ;;  %1552 = vmatprep.subr.bf16.mxu1 (!%p189_p3), %v1592_v1 }
   0xc   : > { %1506 = vmatpush3.bf16.msra.mxu0 (!%p189_p3), %v1592_v1  ;;  %1560 = vmatpush3.bf16.msra.mxu1 (!%p189_p3), %v1592_v1 }
   0xd   : > { %1507 = vmatprep.subr.bf16.mxu0 (!%p189_p3), %v1593_v2  ;;  %1553 = vmatprep.subr.bf16.mxu1 (!%p189_p3), %v1593_v2 }
   0xe   : > { %s2113_s18 = smov (!%p230_p4, %s1257_s18), 63 }
   0xf   : > { %s1258_s23 = sshll.u32 %s2113_s18, 2 }
  0x10   : > { %s1758_s26 = scalar_lea.vmem %s2104_s0, %s1258_s23  ;;  %1508 = vmatpush3.bf16.msra.mxu0 %v1593_v2  ;;  %1561 = vmatpush3.bf16.msra.mxu1 %v1593_v2  ;;  %s1898_s17 = scalar_lea.vmem %s2107_s3, %s1258_s23 }
  0x11   : > { %v1599_v4 = vld [vmem:[%s1758_s26] sm:$0xff]   ;;  %1509 = vmatprep.subr.bf16.mxu0 %v1594_v3  ;;  %1554 = vmatprep.subr.bf16.mxu1 %v1594_v3  ;;  %v1601_v10 = vld [vmem:[%s1758_s26 + $0x8] sm:$0xff]   ;;  %v1603_v12 = vld [vmem:[%s1758_s26 + $0x10] sm:$0xff]  }
  0x12   : > { %v1600_v5 = vld [vmem:[%s1758_s26 + $0x40] sm:$0xff]   ;;  %1519 = vmatprep.mubr.bf16.mxu0 %v1599_v4  ;;  %v1602_v11 = vld [vmem:[%s1758_s26 + $0x48] sm:$0xff]   ;;  %v1604_v13 = vld [vmem:[%s1758_s26 + $0x50] sm:$0xff]  }
  0x13   : > { %1535 = vmatprep.mubr.bf16.mxu1 %v1600_v5  ;;  %v1605_v14 = vld [vmem:[%s1758_s26 + $0x18] sm:$0xff]   ;;  %v1607_v16 = vld [vmem:[%s1758_s26 + $0x20] sm:$0xff]   ;;  %v1609_v18 = vld [vmem:[%s1758_s26 + $0x28] sm:$0xff]  }
  0x14   : > { %1510 = vmatpush3.bf16.msra.mxu0 %v1594_v3  ;;  %1562 = vmatpush3.bf16.msra.mxu1 %v1594_v3  ;;  %v1606_v15 = vld [vmem:[%s1758_s26 + $0x58] sm:$0xff]   ;;  %v1608_v17 = vld [vmem:[%s1758_s26 + $0x60] sm:$0xff]   ;;  %v1610_v19 = vld [vmem:[%s1758_s26 + $0x68] sm:$0xff]  }
  0x15   : > { %1511 = vmatprep.subr.bf16.mxu0 %v1595_v6  ;;  %1555 = vmatprep.subr.bf16.mxu1 %v1595_v6  ;;  %v1611_v20 = vld [vmem:[%s1758_s26 + $0x30] sm:$0xff]   ;;  %v1613_v22 = vld [vmem:[%s1758_s26 + $0x38] sm:$0xff]  }
  0x16   : > { %v1612_v21 = vld [vmem:[%s1758_s26 + $0x70] sm:$0xff]   ;;  %v1614_v23 = vld [vmem:[%s1758_s26 + $0x78] sm:$0xff]  }
  0x18   : > { %1512 = vmatpush3.bf16.msra.mxu0 %v1595_v6  ;;  %1563 = vmatpush3.bf16.msra.mxu1 %v1595_v6 }
  0x19   : > { %1513 = vmatprep.subr.bf16.mxu0 %v1596_v7  ;;  %1556 = vmatprep.subr.bf16.mxu1 %v1596_v7 }
  0x1c   : > { %1514 = vmatpush3.bf16.msra.mxu0 %v1596_v7  ;;  %1564 = vmatpush3.bf16.msra.mxu1 %v1596_v7 }
  0x1d   : > { %1515 = vmatprep.subr.bf16.mxu0 %v1597_v8  ;;  %1557 = vmatprep.subr.bf16.mxu1 %v1597_v8 }
  0x20   : > { %1516 = vmatpush3.bf16.msra.mxu0 %v1597_v8  ;;  %1565 = vmatpush3.bf16.msra.mxu1 %v1597_v8 }
  0x21   : > { %1517 = vmatprep.subr.bf16.mxu0 %v1598_v9  ;;  %1558 = vmatprep.subr.bf16.mxu1 %v1598_v9 }
  0x24   : > { %1518 = vmatpush3.bf16.msra.mxu0 %v1598_v9  ;;  %1566 = vmatpush3.bf16.msra.mxu1 %v1598_v9 }
  0x27   : > { %1520 = vmatmul.mubr.bf16.vlgmr.msra.gmra.mrb[0].mxu0 %v1601_v10  ;;  %1536 = vmatmul.mubr.bf16.vlgmr.msra.gmra.mrb[0].mxu1 %v1602_v11 }
  0x28   : > { %1523 = vmatprep.mubr.bf16.mxu0 %v1603_v12  ;;  %1539 = vmatprep.mubr.bf16.mxu1 %v1604_v13 }
  0x2f   : > { %1524 = vmatmul.mubr.bf16.gmra.mrb[4].mxu0 %v1605_v14  ;;  %1540 = vmatmul.mubr.bf16.gmra.mrb[4].mxu1 %v1606_v15 }
  0x30   : > { %1527 = vmatprep.mubr.bf16.mxu0 %v1607_v16  ;;  %1543 = vmatprep.mubr.bf16.mxu1 %v1608_v17 }
  0x37   : > { %1528 = vmatmul.mubr.bf16.gmra.mrb[8].mxu0 %v1609_v18  ;;  %1544 = vmatmul.mubr.bf16.gmra.mrb[8].mxu1 %v1610_v19 }
  0x38   : > { %1531 = vmatprep.mubr.bf16.mxu0 %v1611_v20  ;;  %1547 = vmatprep.mubr.bf16.mxu1 %v1612_v21 }
  0x3f   : > { %1532 = vmatmul.mubr.bf16.gmra.mrb[12].mxu0 %v1613_v22  ;;  %1548 = vmatmul.mubr.bf16.gmra.mrb[12].mxu1 %v1614_v23 }
  0xfa   : > { %v1521_v25 = vpop.f32.mrb[0].mxu0  ;;  %v1537_v26 = vpop.f32.mrb[0].mxu1 }
  0xfb   : > { %v1797_v27 = vadd.f32 %v1521_v25, %v1794_v24  ;;  %v1800_v28 = vadd.f32 %v1537_v26, %v1794_v24  ;;  %v561_v29 = vpop.f32.mrb[1].mxu0  ;;  %v625_v30 = vpop.f32.mrb[1].mxu1 }
  0xfc   : > { %v1803_v31 = vadd.f32 %v1794_v24, %v561_v29  ;;  %v1806_v32 = vadd.f32 %v1794_v24, %v625_v30  ;;  %v1522_v33 = vpop.f32.mrb[2].mxu0  ;;  %v1538_v34 = vpop.f32.mrb[2].mxu1 }
  0xfd   : > { %v821_v35 = vmin.f32 %v1797_v27, 0.0  ;;  %v837_v36 = vmin.f32 %v1800_v28, 0.0  ;;  %v564_v37 = vpop.f32.mrb[3].mxu0  ;;  %v628_v38 = vpop.f32.mrb[3].mxu1  ;;  %v1813_v43 = vadd.f32 %v1522_v33, %v1794_v24  ;;  %v1816_v44 = vadd.f32 %v1538_v34, %v1794_v24 }
  0xfe   : > { %v819_v39 = vmin.f32 %v1803_v31, 0.0  ;;  %v835_v40 = vmin.f32 %v1806_v32, 0.0  ;;  %v1819_v47 = vadd.f32 %v1794_v24, %v564_v37  ;;  %v1822_v48 = vadd.f32 %v1794_v24, %v628_v38 }
  0xff   : > { %v855_v41 = vmul.f32 1.442695, %v821_v35  ;;  %v887_v42 = vmul.f32 1.442695, %v837_v36  ;;  %v822_v49 = vmin.f32 %v1813_v43, 0.0  ;;  %v838_v50 = vmin.f32 %v1816_v44, 0.0 }
 0x100   : > { %v851_v45 = vmul.f32 1.442695, %v819_v39  ;;  %v883_v46 = vmul.f32 1.442695, %v835_v40  ;;  %v820_v51 = vmin.f32 %v1819_v47, 0.0  ;;  %v836_v55 = vmin.f32 %v1822_v48, 0.0 }
 0x101   : > { %1615 = vpow2.f32 %v855_v41  ;;  %v857_v54 = vmul.f32 1.442695, %v822_v49  ;;  %v889_v58 = vmul.f32 1.442695, %v838_v50  ;;  %vm789_vm0 = vcmp.gt.f32.partialorder %v1797_v27, 0.0 }
 0x102   : > { %1617 = vpow2.f32 %v887_v42  ;;  %v1525_v52 = vpop.f32.mrb[4].mxu0  ;;  %v1541_v53 = vpop.f32.mrb[4].mxu1  ;;  %v853_v59 = vmul.f32 1.442695, %v820_v51  ;;  %v885_v63 = vmul.f32 1.442695, %v836_v55 }
 0x103   : > { %1619 = vpow2.f32 %v851_v45  ;;  %v577_v56 = vpop.f32.mrb[5].mxu0  ;;  %v641_v57 = vpop.f32.mrb[5].mxu1  ;;  %v1829_v60 = vadd.f32 %v1525_v52, %v1794_v24  ;;  %v1832_v0 = vadd.f32 %v1541_v53, %v1794_v24  ;;  %vm805_vm1 = vcmp.gt.f32.partialorder %v1800_v28, 0.0 }
 0x104   : > { %1621 = vpow2.f32 %v883_v46  ;;  %v1526_v61 = vpop.f32.mrb[6].mxu0  ;;  %v1542_v62 = vpop.f32.mrb[6].mxu1  ;;  %v1835_v1 = vadd.f32 %v1794_v24, %v577_v56  ;;  %v1839_v5 = vadd.f32 %v1794_v24, %v641_v57  ;;  %vm787_vm2 = vcmp.gt.f32.partialorder %v1803_v31, 0.0 }
 0x105   : > { %1623 = vpow2.f32 %v857_v54  ;;  %v580_v2 = vpop.f32.mrb[7].mxu0  ;;  %v644_v3 = vpop.f32.mrb[7].mxu1  ;;  %v825_v4 = vmin.f32 %v1829_v60, 0.0  ;;  %v841_v6 = vmin.f32 %v1832_v0, 0.0  ;;  %v1847_v11 = vadd.f32 %v1526_v61, %v1794_v24 }
 0x106   : > { %1625 = vpow2.f32 %v889_v58  ;;  %v823_v8 = vmin.f32 %v1835_v1, 0.0  ;;  %v839_v10 = vmin.f32 %v1839_v5, 0.0  ;;  %v1850_v12 = vadd.f32 %v1542_v62, %v1794_v24 }
 0x107   : > { %1627 = vpow2.f32 %v853_v59  ;;  %v863_v7 = vmul.f32 1.442695, %v825_v4  ;;  %v895_v9 = vmul.f32 1.442695, %v841_v6  ;;  %v1854_v14 = vadd.f32 %v1794_v24, %v580_v2 }
 0x108   : > { %1629 = vpow2.f32 %v885_v63  ;;  %v859_v13 = vmul.f32 1.442695, %v823_v8  ;;  %vm803_vm3 = vcmp.gt.f32.partialorder %v1806_v32, 0.0  ;;  %vm790_vm4 = vcmp.gt.f32.partialorder %v1813_v43, 0.0 }
 0x109   : > { %1631 = vpow2.f32 %v863_v7  ;;  %v891_v18 = vmul.f32 1.442695, %v839_v10  ;;  %v826_v19 = vmin.f32 %v1847_v11, 0.0  ;;  %vm806_vm5 = vcmp.gt.f32.partialorder %v1816_v44, 0.0 }
 0x10a   : > { %v1529_v15 = vpop.f32.mrb[8].mxu0  ;;  %v1545_v16 = vpop.f32.mrb[8].mxu1  ;;  %1633 = vpow2.f32 %v895_v9  ;;  %v842_v25 = vmin.f32 %v1850_v12, 0.0  ;;  %v1870_v35 = vadd.f32 %v1794_v24, %v644_v3  ;;  %vm788_vm6 = vcmp.gt.f32.partialorder %v1819_v47, 0.0 }
 0x10b   : > { %v1616_v17 = vpop.eup %1615  ;;  %v1859_v20 = vpop.f32.mrb[9].mxu0  ;;  %1635 = vpow2.f32 %v859_v13  ;;  %v865_v34 = vmul.f32 1.442695, %v826_v19  ;;  %v824_v41 = vmin.f32 %v1854_v14, 0.0  ;;  %vm804_vm7 = vcmp.gt.f32.partialorder %v1822_v48, 0.0 }
 0x10c   : > { %v1861_v21 = vpop.f32.mrb[9].mxu1  ;;  %v1618_v22 = vpop.eup %1617  ;;  %v1288_v23 = vadd.f32 -1.0, %v1616_v17  ;;  %1637 = vpow2.f32 %v891_v18  ;;  %v897_v40 = vmul.f32 1.442695, %v842_v25  ;;  %vm793_vm8 = vcmp.gt.f32.partialorder %v1829_v60, 0.0 }
 0x10d   : > { %v1865_v26 = vpop.f32.mrb[10].mxu0  ;;  %v1867_v29 = vpop.f32.mrb[10].mxu1  ;;  %v1304_v33 = vadd.f32 -1.0, %v1618_v22  ;;  %1639 = vpow2.f32 %v865_v34  ;;  %v861_v52 = vmul.f32 1.442695, %v824_v41  ;;  %v840_v55 = vmin.f32 %v1870_v35, 0.0 }
 0x10e   : > { %v1620_v30 = vpop.eup %1619  ;;  %v1872_v36 = vpop.f32.mrb[11].mxu0  ;;  %v949_v45 = vsel %vm789_vm0, %v1797_v27, %v1288_v23  ;;  %1641 = vpow2.f32 %v897_v40  ;;  %vm809_vm9 = vcmp.gt.f32.partialorder %v1832_v0, 0.0  ;;  %vm791_vm10 = vcmp.gt.f32.partialorder %v1835_v1, 0.0 }
 0x10f   : > { %v1874_v37 = vpop.f32.mrb[11].mxu1  ;;  %v1622_v38 = vpop.eup %1621  ;;  %v1286_v39 = vadd.f32 -1.0, %v1620_v30  ;;  %v965_v46 = vsel %vm805_vm1, %v1800_v28, %v1304_v33  ;;  %v1891_v28 = vadd.f32 %v1529_v15, %v1794_v24  ;;  %1643 = vpow2.f32 %v861_v52 }
 0x110   : > { %v1624_v42 = vpop.eup %1623  ;;  %v1302_v50 = vadd.f32 -1.0, %v1622_v38  ;;  %v893_v3 = vmul.f32 1.442695, %v840_v55  ;;  %vm807_vm11 = vcmp.gt.f32.partialorder %v1839_v5, 0.0  ;;  %vm794_vm12 = vcmp.gt.f32.partialorder %v1847_v11, 0.0 }
 0x111   : > { %v1626_v49 = vpop.eup %1625  ;;  %v1289_v51 = vadd.f32 -1.0, %v1624_v42  ;;  %v947_v27 = vsel %vm787_vm2, %v1803_v31, %v1286_v39  ;;  %v1904_v31 = vadd.f32 %v1545_v16, %v1794_v24  ;;  %v829_v10 = vmin.f32 %v1891_v28, 0.0 }
 0x112   : > { %v1628_v53 = vpop.eup %1627  ;;  %v1305_v54 = vadd.f32 -1.0, %v1626_v49  ;;  %v1906_v59 = vpop.f32.mrb[12].mxu0  ;;  %v963_v7 = vsel %vm803_vm3, %v1806_v32, %v1302_v50  ;;  %1645 = vpow2.f32 %v893_v3  ;;  %v1945_v30 = vadd.f32 %v1794_v24, %v1859_v20 }
 0x113   : > { %v1630_v56 = vpop.eup %1629  ;;  %v950_v57 = vsel %vm790_vm4, %v1813_v43, %v1289_v51  ;;  %v1287_v58 = vadd.f32 -1.0, %v1628_v53  ;;  %v1908_v61 = vpop.f32.mrb[12].mxu1  ;;  %v871_v23 = vmul.f32 1.442695, %v829_v10  ;;  %vm810_vm13 = vcmp.gt.f32.partialorder %v1850_v12, 0.0 }
 0x114   : > { %v1392_v62 = vpack.c.bf16 %v950_v57, %v949_v45  ;;  %v966_v63 = vsel %vm806_vm5, %v1816_v44, %v1305_v54  ;;  %v1303_v2 = vadd.f32 -1.0, %v1630_v56  ;;  %v1913_v4 = vpop.f32.mrb[13].mxu0  ;;  %v1915_v43 = vpop.f32.mrb[13].mxu1  ;;  %vm792_vm14 = vcmp.gt.f32.partialorder %v1854_v14, 0.0 }
 0x115   : > { %v1632_v6 = vpop.eup %1631  ;;  %v1432_v8 = vpack.c.bf16 %v966_v63, %v965_v46  ;;  %v948_v9 = vsel %vm788_vm6, %v1819_v47, %v1287_v58  ;;  %v1924_v44 = vpop.f32.mrb[14].mxu0  ;;  %v1952_v34 = vadd.f32 %v1794_v24, %v1861_v21  ;;  %vm808_vm15 = vcmp.gt.f32.partialorder %v1870_v35, 0.0 }
 0x116   : > { %v1926_v13 = vpop.f32.mrb[14].mxu1  ;;  %v1634_v15 = vpop.eup %1633  ;;  %1464 = vst [vmem:[%s1898_s17 + $0x8] sm:$0xff] %v1392_v62   ;;  %v1387_v16 = vpack.c.bf16 %v948_v9, %v947_v27  ;;  %v964_v17 = vsel %vm804_vm7, %v1822_v48, %v1303_v2  ;;  %v1292_v32 = vadd.f32 -1.0, %v1632_v6  ;;  %v845_v48 = vmin.f32 %v1904_v31, 0.0 }
 0x117   : > { %v1932_v18 = vpop.f32.mrb[15].mxu0  ;;  %v1934_v47 = vpop.f32.mrb[15].mxu1  ;;  %1472 = vst [vmem:[%s1898_s17 + $0x48] sm:$0xff] %v1432_v8   ;;  %v1427_v22 = vpack.c.bf16 %v964_v17, %v963_v7  ;;  %v1308_v33 = vadd.f32 -1.0, %v1634_v15  ;;  %v827_v41 = vmin.f32 %v1945_v30, 0.0  ;;  %1647 = vpow2.f32 %v871_v23 }
 0x118   : > { %v1636_v19 = vpop.eup %1635  ;;  %1388 = vst [vmem:[%s1898_s17] sm:$0xff] %v1387_v16   ;;  %v953_v39 = vsel %vm793_vm8, %v1829_v60, %v1292_v32  ;;  %v903_v20 = vmul.f32 1.442695, %v845_v48  ;;  %v843_v49 = vmin.f32 %v1952_v34, 0.0  ;;  %v1962_v51 = vadd.f32 %v1865_v26, %v1794_v24 }
 0x119   : > { %v1638_v25 = vpop.eup %1637  ;;  %1471 = vst [vmem:[%s1898_s17 + $0x40] sm:$0xff] %v1427_v22   ;;  %v1290_v40 = vadd.f32 -1.0, %v1636_v19  ;;  %v867_v21 = vmul.f32 1.442695, %v827_v41  ;;  %v1969_v27 = vadd.f32 %v1867_v29, %v1794_v24  ;;  %v1973_v54 = vadd.f32 %v1794_v24, %v1872_v36 }
 0x11a   : > { %v1640_v38 = vpop.eup %1639  ;;  %v1306_v45 = vadd.f32 -1.0, %v1638_v25  ;;  %1649 = vpow2.f32 %v903_v20  ;;  %v899_v53 = vmul.f32 1.442695, %v843_v49  ;;  %v969_v26 = vsel %vm809_vm9, %v1832_v0, %v1308_v33 }
 0x11b   : > { %v1642_v42 = vpop.eup %1641  ;;  %v1293_v46 = vadd.f32 -1.0, %v1640_v38  ;;  %v951_v29 = vsel %vm791_vm10, %v1835_v1, %v1290_v40  ;;  %1651 = vpow2.f32 %v867_v21  ;;  %v830_v58 = vmin.f32 %v1962_v51, 0.0 }
 0x11c   : > { %v1309_v50 = vadd.f32 -1.0, %v1642_v42  ;;  %v1644_v60 = vpop.eup %1643  ;;  %v967_v0 = vsel %vm807_vm11, %v1839_v5, %v1306_v45  ;;  %1653 = vpow2.f32 %v899_v53  ;;  %v846_v62 = vmin.f32 %v1969_v27, 0.0 }
 0x11d   : > { %v954_v52 = vsel %vm794_vm12, %v1847_v11, %v1293_v46  ;;  %v1291_v11 = vadd.f32 -1.0, %v1644_v60  ;;  %v1646_v36 = vpop.eup %1645  ;;  %v873_v2 = vmul.f32 1.442695, %v830_v58  ;;  %v828_v3 = vmin.f32 %v1973_v54, 0.0 }
 0x11e   : > { %v1402_v55 = vpack.c.bf16 %v954_v52, %v953_v39  ;;  %v970_v56 = vsel %vm810_vm13, %v1850_v12, %v1309_v50  ;;  %v1307_v63 = vadd.f32 -1.0, %v1646_v36  ;;  %v905_v6 = vmul.f32 1.442695, %v846_v62 }
 0x11f   : > { %v1442_v57 = vpack.c.bf16 %v970_v56, %v969_v26  ;;  %v952_v12 = vsel %vm792_vm14, %v1854_v14, %v1291_v11  ;;  %v1997_v7 = vadd.f32 %v1794_v24, %v1874_v37  ;;  %v2001_v5 = vadd.f32 %v1906_v59, %v1794_v24 }
 0x120   : > { %1466 = vst [vmem:[%s1898_s17 + $0x18] sm:$0xff] %v1402_v55   ;;  %v1397_v1 = vpack.c.bf16 %v952_v12, %v951_v29  ;;  %v2005_v14 = vadd.f32 %v1908_v61, %v1794_v24  ;;  %v968_v8 = vsel %vm808_vm15, %v1870_v35, %v1307_v63  ;;  %1655 = vpow2.f32 %v873_v2 }
 0x121   : > { %1474 = vst [vmem:[%s1898_s17 + $0x58] sm:$0xff] %v1442_v57   ;;  %v869_v9 = vmul.f32 1.442695, %v828_v3  ;;  %v2013_v10 = vadd.f32 %v1794_v24, %v1913_v4  ;;  %v1437_v37 = vpack.c.bf16 %v968_v8, %v967_v0  ;;  %1657 = vpow2.f32 %v905_v6  ;;  %v1648_v15 = vpop.eup %1647 }
 0x122   : > { %1465 = vst [vmem:[%s1898_s17 + $0x10] sm:$0xff] %v1397_v1   ;;  %v844_v59 = vmin.f32 %v1997_v7, 0.0  ;;  %v833_v61 = vmin.f32 %v2001_v5, 0.0  ;;  %v849_v17 = vmin.f32 %v2005_v14, 0.0  ;;  %v1296_v22 = vadd.f32 -1.0, %v1648_v15 }
 0x123   : > { %1659 = vpow2.f32 %v869_v9  ;;  %1473 = vst [vmem:[%s1898_s17 + $0x50] sm:$0xff] %v1437_v37   ;;  %v831_v19 = vmin.f32 %v2013_v10, 0.0  ;;  %v2022_v4 = vadd.f32 %v1794_v24, %v1915_v43  ;;  %v2026_v25 = vadd.f32 %v1924_v44, %v1794_v24 }
 0x124   : > { %v1650_v16 = vpop.eup %1649  ;;  %v901_v32 = vmul.f32 1.442695, %v844_v59  ;;  %v879_v35 = vmul.f32 1.442695, %v833_v61  ;;  %v911_v23 = vmul.f32 1.442695, %v849_v17  ;;  %v2032_v33 = vadd.f32 %v1926_v13, %v1794_v24 }
 0x125   : > { %v1652_v48 = vpop.eup %1651  ;;  %vm797_vm0 = vcmp.gt.f32.partialorder %v1891_v28, 0.0  ;;  %vm813_vm1 = vcmp.gt.f32.partialorder %v1904_v31, 0.0  ;;  %v1312_v39 = vadd.f32 -1.0, %v1650_v16  ;;  %vm795_vm2 = vcmp.gt.f32.partialorder %v1945_v30, 0.0 }
 0x126   : > { %1661 = vpow2.f32 %v901_v32  ;;  %v1654_v38 = vpop.eup %1653  ;;  %v875_v43 = vmul.f32 1.442695, %v831_v19  ;;  %v847_v40 = vmin.f32 %v2022_v4, 0.0  ;;  %vm798_vm3 = vcmp.gt.f32.partialorder %v1962_v51, 0.0 }
 0x127   : > { %vm814_vm4 = vcmp.gt.f32.partialorder %v1969_v27, 0.0  ;;  %1663 = vpow2.f32 %v879_v35  ;;  %v834_v44 = vmin.f32 %v2026_v25, 0.0  ;;  %v957_v20 = vsel %vm797_vm0, %v1891_v28, %v1296_v22 }
 0x128   : > { %vm796_vm5 = vcmp.gt.f32.partialorder %v1973_v54, 0.0  ;;  %1665 = vpow2.f32 %v911_v23  ;;  %v907_v13 = vmul.f32 1.442695, %v847_v40  ;;  %v850_v45 = vmin.f32 %v2032_v33, 0.0 }
 0x129   : > { %v881_v42 = vmul.f32 1.442695, %v834_v44  ;;  %v2044_v46 = vadd.f32 %v1794_v24, %v1932_v18  ;;  %v2048_v49 = vadd.f32 %v1794_v24, %v1934_v47  ;;  %v973_v28 = vsel %vm813_vm1, %v1904_v31, %v1312_v39 }
 0x12a   : > { %v1656_v41 = vpop.eup %1655  ;;  %v1294_v21 = vadd.f32 -1.0, %v1652_v48  ;;  %1667 = vpow2.f32 %v875_v43  ;;  %v1310_v53 = vadd.f32 -1.0, %v1654_v38  ;;  %v913_v55 = vmul.f32 1.442695, %v850_v45 }
 0x12b   : > { %v1658_v50 = vpop.eup %1657  ;;  %v1297_v60 = vadd.f32 -1.0, %v1656_v41  ;;  %1669 = vpow2.f32 %v881_v42  ;;  %v832_v47 = vmin.f32 %v2044_v46, 0.0  ;;  %v848_v11 = vmin.f32 %v2048_v49, 0.0 }
 0x12c   : > { %v1313_v26 = vadd.f32 -1.0, %v1658_v50  ;;  %1671 = vpow2.f32 %v907_v13  ;;  %v955_v29 = vsel %vm795_vm2, %v1945_v30, %v1294_v21  ;;  %vm811_vm6 = vcmp.gt.f32.partialorder %v1952_v34, 0.0 }
 0x12d   : > { %v1660_v52 = vpop.eup %1659  ;;  %v958_v18 = vsel %vm798_vm3, %v1962_v51, %v1297_v60  ;;  %1673 = vpow2.f32 %v913_v55  ;;  %v877_v58 = vmul.f32 1.442695, %v832_v47  ;;  %v909_v12 = vmul.f32 1.442695, %v848_v11 }
 0x12e   : > { %v1295_v24 = vadd.f32 -1.0, %v1660_v52  ;;  %v1412_v56 = vpack.c.bf16 %v958_v18, %v957_v20  ;;  %v974_v31 = vsel %vm814_vm4, %v1969_v27, %v1313_v26  ;;  %vm812_vm7 = vcmp.gt.f32.partialorder %v1997_v7, 0.0 }
 0x12f   : > { %v1452_v57 = vpack.c.bf16 %v974_v31, %v973_v28  ;;  %1675 = vpow2.f32 %v877_v58  ;;  %v971_v1 = vsel %vm811_vm6, %v1952_v34, %v1310_v53  ;;  %vm801_vm8 = vcmp.gt.f32.partialorder %v2001_v5, 0.0 }
 0x130   : > { %v956_v51 = vsel %vm796_vm5, %v1973_v54, %v1295_v24  ;;  %v1662_v36 = vpop.eup %1661  ;;  %1468 = vst [vmem:[%s1898_s17 + $0x28] sm:$0xff] %v1412_v56   ;;  %1677 = vpow2.f32 %v909_v12  ;;  %vm802_vm9 = vcmp.gt.f32.partialorder %v2026_v25, 0.0  ;;  %vm817_vm10 = vcmp.gt.f32.partialorder %v2005_v14, 0.0 }
 0x131   : > { %v1407_v0 = vpack.c.bf16 %v956_v51, %v955_v29  ;;  %1476 = vst [vmem:[%s1898_s17 + $0x68] sm:$0xff] %v1452_v57   ;;  %v1311_v27 = vadd.f32 -1.0, %v1662_v36  ;;  %v1664_v62 = vpop.eup %1663  ;;  %vm818_vm11 = vcmp.gt.f32.partialorder %v2032_v33, 0.0  ;;  %vm799_vm12 = vcmp.gt.f32.partialorder %v2013_v10, 0.0 }
 0x132   : > { %v1666_v30 = vpop.eup %1665  ;;  %v1300_v3 = vadd.f32 -1.0, %v1664_v62  ;;  %vm800_vm13 = vcmp.gt.f32.partialorder %v2044_v46, 0.0  ;;  %vm815_vm14 = vcmp.gt.f32.partialorder %v2022_v4, 0.0  ;;  %vm816_vm15 = vcmp.gt.f32.partialorder %v2048_v49, 0.0 }
 0x133   : > { %1467 = vst [vmem:[%s1898_s17 + $0x20] sm:$0xff] %v1407_v0   ;;  %v972_v54 = vsel %vm812_vm7, %v1997_v7, %v1311_v27  ;;  %v1316_v9 = vadd.f32 -1.0, %v1666_v30 }
 0x134   : > { %v1447_v63 = vpack.c.bf16 %v972_v54, %v971_v1  ;;  %v1668_v2 = vpop.eup %1667  ;;  %v961_v59 = vsel %vm801_vm8, %v2001_v5, %v1300_v3 }
 0x135   : > { %v1670_v6 = vpop.eup %1669  ;;  %v1298_v7 = vadd.f32 -1.0, %v1668_v2  ;;  %v977_v32 = vsel %vm817_vm10, %v2005_v14, %v1316_v9 }
 0x136   : > { %1475 = vst [vmem:[%s1898_s17 + $0x60] sm:$0xff] %v1447_v63   ;;  %v1672_v8 = vpop.eup %1671  ;;  %v1301_v37 = vadd.f32 -1.0, %v1670_v6 }
 0x137   : > { %v1674_v15 = vpop.eup %1673  ;;  %v1314_v35 = vadd.f32 -1.0, %v1672_v8  ;;  %v959_v48 = vsel %vm799_vm12, %v2013_v10, %v1298_v7 }
 0x138   : > { %v962_v34 = vsel %vm802_vm9, %v2026_v25, %v1301_v37  ;;  %v1317_v61 = vadd.f32 -1.0, %v1674_v15 }
 0x139   : > { %v1422_v16 = vpack.c.bf16 %v962_v34, %v961_v59  ;;  %v1676_v17 = vpop.eup %1675 }
 0x13a   : > { %v978_v19 = vsel %vm818_vm11, %v2032_v33, %v1317_v61  ;;  %v1678_v22 = vpop.eup %1677  ;;  %v1299_v23 = vadd.f32 -1.0, %v1676_v17  ;;  %v975_v33 = vsel %vm815_vm14, %v2022_v4, %v1314_v35 }
 0x13b   : > { %1470 = vst [vmem:[%s1898_s17 + $0x38] sm:$0xff] %v1422_v16   ;;  %v1462_v5 = vpack.c.bf16 %v978_v19, %v977_v32  ;;  %v1315_v25 = vadd.f32 -1.0, %v1678_v22 }
 0x13c   : > { %v960_v14 = vsel %vm800_vm13, %v2044_v46, %v1299_v23 }
 0x13d   : > { %1478 = vst [vmem:[%s1898_s17 + $0x78] sm:$0xff] %v1462_v5   ;;  %v1417_v38 = vpack.c.bf16 %v960_v14, %v959_v48  ;;  %v976_v39 = vsel %vm816_vm15, %v2048_v49, %v1315_v25 }
 0x13e   : > { %v1457_v43 = vpack.c.bf16 %v976_v39, %v975_v33 }
 0x13f   : > { %1469 = vst [vmem:[%s1898_s17 + $0x30] sm:$0xff] %v1417_v38  }
 0x140   : > { %1477 = vst [vmem:[%s1898_s17 + $0x70] sm:$0xff] %v1457_v43  }
 0x141 PF: > { %s13_s14 = sadd.s32 1, %s1701_s14   ;;  %s2108_s12 = smov %s1697_s13 }
 0x142   : > { %p10_p5 = scmp.ge.s32.totalorder %s13_s14, 4   ;;  %s2109_s13 = smov %s2111_s15 }
 0x144   :  { %12 = sbr.rel (!%p10_p5) target bundleno = 2 (0x2), region = 76 }

// kernel: _lambda_.22
= control target key start
LH: loop header
LB: loop body
LE: loop exit
PB: predicated region body
PF: predicated region fallthrough
CT: control target
= control target key end

     0   :  { %s945_s1 = inlined_call_operand.vmem [shape: bf16[128,128], index: 1, kind: input, shape index: {}]   ;;  %s946_s0 = inlined_call_operand.vmem [shape: bf16[128,128], index: 0, kind: input, shape index: {}]   ;;  %s947_s2 = inlined_call_operand.vmem [shape: f32[1,128], index: 2, kind: input, shape index: {}]   ;;  %s948_s3 = inlined_call_operand.vmem [shape: bf16[128,128], index: 3, kind: output, shape index: {}]  }
   0x1   :  { %v690_v0 = vld [vmem:[%s945_s1] sm:$0xff]   ;;  %v691_v1 = vld [vmem:[%s945_s1 + $0x8] sm:$0xff]   ;;  %v692_v2 = vld [vmem:[%s945_s1 + $0x10] sm:$0xff]  }
   0x2   :  { %642 = vmatprep.subr.bf16.mxu0 %v690_v0  ;;  %674 = vmatprep.subr.bf16.mxu1 %v690_v0  ;;  %v693_v3 = vld [vmem:[%s945_s1 + $0x18] sm:$0xff]   ;;  %v698_v4 = vld [vmem:[%s946_s0] sm:$0xff]   ;;  %v695_v7 = vld [vmem:[%s945_s1 + $0x28] sm:$0xff]  }
   0x3   :  { %643 = vmatpush3.bf16.msra.mxu0 %v690_v0  ;;  %682 = vmatpush3.bf16.msra.mxu1 %v690_v0  ;;  %v699_v5 = vld [vmem:[%s946_s0 + $0x20] sm:$0xff]   ;;  %v696_v8 = vld [vmem:[%s945_s1 + $0x30] sm:$0xff]   ;;  %v697_v9 = vld [vmem:[%s945_s1 + $0x38] sm:$0xff]  }
   0x4   :  { %644 = vmatprep.subr.bf16.mxu0 %v691_v1  ;;  %675 = vmatprep.subr.bf16.mxu1 %v691_v1  ;;  %v694_v6 = vld [vmem:[%s945_s1 + $0x20] sm:$0xff]   ;;  %v700_v10 = vld [vmem:[%s946_s0 + $0x8] sm:$0xff]   ;;  %v702_v12 = vld [vmem:[%s946_s0 + $0x10] sm:$0xff]  }
   0x5   :  { %658 = vmatprep.mubr.bf16.mxu0 %v698_v4  ;;  %666 = vmatprep.mubr.bf16.mxu1 %v699_v5  ;;  %v701_v11 = vld [vmem:[%s946_s0 + $0x28] sm:$0xff]   ;;  %v703_v13 = vld [vmem:[%s946_s0 + $0x30] sm:$0xff]   ;;  %v704_v14 = vld [vmem:[%s946_s0 + $0x18] sm:$0xff]  }
   0x6   :  { %v705_v15 = vld [vmem:[%s946_s0 + $0x38] sm:$0xff]   ;;  %v809_v16 = vld [vmem:[%s947_s2] ss:$0 sm:$0xff] }
   0x7   :  { %645 = vmatpush3.bf16.msra.mxu0 %v691_v1  ;;  %683 = vmatpush3.bf16.msra.mxu1 %v691_v1 }
   0x8   :  { %646 = vmatprep.subr.bf16.mxu0 %v692_v2  ;;  %676 = vmatprep.subr.bf16.mxu1 %v692_v2 }
   0xb   :  { %647 = vmatpush3.bf16.msra.mxu0 %v692_v2  ;;  %684 = vmatpush3.bf16.msra.mxu1 %v692_v2 }
   0xc   :  { %648 = vmatprep.subr.bf16.mxu0 %v693_v3  ;;  %677 = vmatprep.subr.bf16.mxu1 %v693_v3 }
   0xf   :  { %649 = vmatpush3.bf16.msra.mxu0 %v693_v3  ;;  %685 = vmatpush3.bf16.msra.mxu1 %v693_v3 }
  0x10   :  { %650 = vmatprep.subr.bf16.mxu0 %v694_v6  ;;  %678 = vmatprep.subr.bf16.mxu1 %v694_v6 }
  0x13   :  { %651 = vmatpush3.bf16.msra.mxu0 %v694_v6  ;;  %686 = vmatpush3.bf16.msra.mxu1 %v694_v6 }
  0x14   :  { %652 = vmatprep.subr.bf16.mxu0 %v695_v7  ;;  %679 = vmatprep.subr.bf16.mxu1 %v695_v7 }
  0x17   :  { %653 = vmatpush3.bf16.msra.mxu0 %v695_v7  ;;  %687 = vmatpush3.bf16.msra.mxu1 %v695_v7 }
  0x18   :  { %654 = vmatprep.subr.bf16.mxu0 %v696_v8  ;;  %680 = vmatprep.subr.bf16.mxu1 %v696_v8 }
  0x1b   :  { %655 = vmatpush3.bf16.msra.mxu0 %v696_v8  ;;  %688 = vmatpush3.bf16.msra.mxu1 %v696_v8 }
  0x1c   :  { %656 = vmatprep.subr.bf16.mxu0 %v697_v9  ;;  %681 = vmatprep.subr.bf16.mxu1 %v697_v9 }
  0x1f   :  { %657 = vmatpush3.bf16.msra.mxu0 %v697_v9  ;;  %689 = vmatpush3.bf16.msra.mxu1 %v697_v9 }
  0x22   :  { %659 = vmatmul.mubr.bf16.vlgmr.msra.gmra.mrb[0].mxu0 %v700_v10  ;;  %667 = vmatmul.mubr.bf16.vlgmr.msra.gmra.mrb[0].mxu1 %v701_v11 }
  0x23   :  { %662 = vmatprep.mubr.bf16.mxu0 %v702_v12  ;;  %670 = vmatprep.mubr.bf16.mxu1 %v703_v13 }
  0x2a   :  { %663 = vmatmul.mubr.bf16.gmra.mrb[4].mxu0 %v704_v14  ;;  %671 = vmatmul.mubr.bf16.gmra.mrb[4].mxu1 %v705_v15 }
  0xf5   :  { %v660_v17 = vpop.f32.mrb[0].mxu0  ;;  %v668_v18 = vpop.f32.mrb[0].mxu1 }
  0xf6   :  { %v812_v19 = vadd.f32 %v660_v17, %v809_v16  ;;  %v815_v20 = vadd.f32 %v668_v18, %v809_v16  ;;  %v220_v21 = vpop.f32.mrb[1].mxu0  ;;  %v252_v22 = vpop.f32.mrb[1].mxu1 }
  0xf7   :  { %v818_v23 = vadd.f32 %v809_v16, %v220_v21  ;;  %v821_v24 = vadd.f32 %v809_v16, %v252_v22  ;;  %v661_v25 = vpop.f32.mrb[2].mxu0  ;;  %v669_v26 = vpop.f32.mrb[2].mxu1 }
  0xf8   :  { %v352_v27 = vmin.f32 %v812_v19, 0.0  ;;  %v360_v28 = vmin.f32 %v815_v20, 0.0  ;;  %v223_v29 = vpop.f32.mrb[3].mxu0  ;;  %v255_v30 = vpop.f32.mrb[3].mxu1  ;;  %v828_v35 = vadd.f32 %v661_v25, %v809_v16  ;;  %v831_v36 = vadd.f32 %v669_v26, %v809_v16 }
  0xf9   :  { %v350_v31 = vmin.f32 %v818_v23, 0.0  ;;  %v358_v32 = vmin.f32 %v821_v24, 0.0  ;;  %v834_v39 = vadd.f32 %v809_v16, %v223_v29  ;;  %v837_v40 = vadd.f32 %v809_v16, %v255_v30 }
  0xfa   :  { %v370_v33 = vmul.f32 1.442695, %v352_v27  ;;  %v386_v34 = vmul.f32 1.442695, %v360_v28  ;;  %v353_v41 = vmin.f32 %v828_v35, 0.0  ;;  %v361_v42 = vmin.f32 %v831_v36, 0.0 }
  0xfb   :  { %v366_v37 = vmul.f32 1.442695, %v350_v31  ;;  %v382_v38 = vmul.f32 1.442695, %v358_v32  ;;  %v351_v43 = vmin.f32 %v834_v39, 0.0  ;;  %v359_v47 = vmin.f32 %v837_v40, 0.0 }
  0xfc   :  { %706 = vpow2.f32 %v370_v33  ;;  %v372_v46 = vmul.f32 1.442695, %v353_v41  ;;  %v388_v50 = vmul.f32 1.442695, %v361_v42  ;;  %vm336_vm0 = vcmp.gt.f32.partialorder %v812_v19, 0.0 }
  0xfd   :  { %708 = vpow2.f32 %v386_v34  ;;  %v664_v44 = vpop.f32.mrb[4].mxu0  ;;  %v672_v45 = vpop.f32.mrb[4].mxu1  ;;  %v368_v51 = vmul.f32 1.442695, %v351_v43  ;;  %v384_v55 = vmul.f32 1.442695, %v359_v47 }
  0xfe   :  { %710 = vpow2.f32 %v366_v37  ;;  %v236_v48 = vpop.f32.mrb[5].mxu0  ;;  %v268_v49 = vpop.f32.mrb[5].mxu1  ;;  %v844_v52 = vadd.f32 %v664_v44, %v809_v16  ;;  %v847_v56 = vadd.f32 %v672_v45, %v809_v16  ;;  %vm344_vm1 = vcmp.gt.f32.partialorder %v815_v20, 0.0 }
  0xff   :  { %712 = vpow2.f32 %v382_v38  ;;  %v665_v53 = vpop.f32.mrb[6].mxu0  ;;  %v673_v54 = vpop.f32.mrb[6].mxu1  ;;  %v850_v57 = vadd.f32 %v809_v16, %v236_v48  ;;  %v854_v61 = vadd.f32 %v809_v16, %v268_v49  ;;  %vm334_vm2 = vcmp.gt.f32.partialorder %v818_v23, 0.0 }
 0x100   :  { %714 = vpow2.f32 %v372_v46  ;;  %v239_v58 = vpop.f32.mrb[7].mxu0  ;;  %v271_v59 = vpop.f32.mrb[7].mxu1  ;;  %v356_v60 = vmin.f32 %v844_v52, 0.0  ;;  %v364_v62 = vmin.f32 %v847_v56, 0.0  ;;  %v860_v3 = vadd.f32 %v665_v53, %v809_v16 }
 0x101   :  { %716 = vpow2.f32 %v388_v50  ;;  %v354_v0 = vmin.f32 %v850_v57, 0.0  ;;  %v362_v2 = vmin.f32 %v854_v61, 0.0  ;;  %v863_v4 = vadd.f32 %v673_v54, %v809_v16 }
 0x102   :  { %718 = vpow2.f32 %v368_v51  ;;  %v378_v63 = vmul.f32 1.442695, %v356_v60  ;;  %v394_v1 = vmul.f32 1.442695, %v364_v62  ;;  %v867_v6 = vadd.f32 %v809_v16, %v239_v58 }
 0x103   :  { %720 = vpow2.f32 %v384_v55  ;;  %v374_v5 = vmul.f32 1.442695, %v354_v0  ;;  %v390_v8 = vmul.f32 1.442695, %v362_v2  ;;  %v357_v9 = vmin.f32 %v860_v3, 0.0 }
 0x104   :  { %722 = vpow2.f32 %v378_v63  ;;  %vm342_vm3 = vcmp.gt.f32.partialorder %v821_v24, 0.0  ;;  %v365_v11 = vmin.f32 %v863_v4, 0.0  ;;  %v875_v15 = vadd.f32 %v809_v16, %v271_v59 }
 0x105   :  { %724 = vpow2.f32 %v394_v1  ;;  %v380_v14 = vmul.f32 1.442695, %v357_v9  ;;  %v355_v22 = vmin.f32 %v867_v6, 0.0  ;;  %vm337_vm4 = vcmp.gt.f32.partialorder %v828_v35, 0.0 }
 0x106   :  { %v707_v7 = vpop.eup %706  ;;  %726 = vpow2.f32 %v374_v5  ;;  %v396_v21 = vmul.f32 1.442695, %v365_v11  ;;  %vm345_vm5 = vcmp.gt.f32.partialorder %v831_v36, 0.0  ;;  %vm335_vm6 = vcmp.gt.f32.partialorder %v834_v39, 0.0 }
 0x107   :  { %v709_v10 = vpop.eup %708  ;;  %v533_v13 = vadd.f32 -1.0, %v707_v7  ;;  %728 = vpow2.f32 %v390_v8  ;;  %v376_v16 = vmul.f32 1.442695, %v355_v22  ;;  %v363_v33 = vmin.f32 %v875_v15, 0.0 }
 0x108   :  { %v711_v12 = vpop.eup %710  ;;  %v541_v18 = vadd.f32 -1.0, %v709_v10  ;;  %730 = vpow2.f32 %v380_v14  ;;  %vm343_vm7 = vcmp.gt.f32.partialorder %v837_v40, 0.0  ;;  %vm340_vm8 = vcmp.gt.f32.partialorder %v844_v52, 0.0 }
 0x109   :  { %v713_v17 = vpop.eup %712  ;;  %v531_v27 = vadd.f32 -1.0, %v711_v12  ;;  %732 = vpow2.f32 %v396_v21  ;;  %v416_v30 = vsel %vm336_vm0, %v812_v19, %v533_v13  ;;  %v392_v44 = vmul.f32 1.442695, %v363_v33 }
 0x10a   :  { %v715_v25 = vpop.eup %714  ;;  %v539_v31 = vadd.f32 -1.0, %v713_v17  ;;  %v424_v37 = vsel %vm344_vm1, %v815_v20, %v541_v18  ;;  %734 = vpow2.f32 %v376_v16  ;;  %vm341_vm9 = vcmp.gt.f32.partialorder %v860_v3, 0.0 }
 0x10b   :  { %v717_v26 = vpop.eup %716  ;;  %v534_v28 = vadd.f32 -1.0, %v715_v25  ;;  %v414_v45 = vsel %vm334_vm2, %v818_v23, %v531_v27  ;;  %736 = vpow2.f32 %v392_v44  ;;  %vm348_vm10 = vcmp.gt.f32.partialorder %v847_v56, 0.0 }
 0x10c   :  { %v719_v29 = vpop.eup %718  ;;  %v542_v32 = vadd.f32 -1.0, %v717_v26  ;;  %v422_v47 = vsel %vm342_vm3, %v821_v24, %v539_v31  ;;  %vm349_vm11 = vcmp.gt.f32.partialorder %v863_v4, 0.0  ;;  %vm338_vm12 = vcmp.gt.f32.partialorder %v850_v57, 0.0 }
 0x10d   :  { %v721_v34 = vpop.eup %720  ;;  %v417_v38 = vsel %vm337_vm4, %v828_v35, %v534_v28  ;;  %v532_v41 = vadd.f32 -1.0, %v719_v29  ;;  %vm339_vm13 = vcmp.gt.f32.partialorder %v867_v6, 0.0  ;;  %vm346_vm14 = vcmp.gt.f32.partialorder %v854_v61, 0.0 }
 0x10e   :  { %v587_v42 = vpack.c.bf16 %v417_v38, %v416_v30  ;;  %v425_v19 = vsel %vm345_vm5, %v831_v36, %v542_v32  ;;  %v540_v43 = vadd.f32 -1.0, %v721_v34  ;;  %v723_v35 = vpop.eup %722  ;;  %vm347_vm15 = vcmp.gt.f32.partialorder %v875_v15, 0.0 }
 0x10f   :  { %v607_v46 = vpack.c.bf16 %v425_v19, %v424_v37  ;;  %v415_v20 = vsel %vm335_vm6, %v834_v39, %v532_v41  ;;  %v725_v23 = vpop.eup %724  ;;  %v537_v50 = vadd.f32 -1.0, %v723_v35 }
 0x110   :  { %619 = vst [vmem:[%s948_s3 + $0x8] sm:$0xff] %v587_v42   ;;  %v582_v36 = vpack.c.bf16 %v415_v20, %v414_v45  ;;  %v423_v48 = vsel %vm343_vm7, %v837_v40, %v540_v43  ;;  %v727_v49 = vpop.eup %726  ;;  %v545_v40 = vadd.f32 -1.0, %v725_v23 }
 0x111   :  { %623 = vst [vmem:[%s948_s3 + $0x28] sm:$0xff] %v607_v46   ;;  %v602_v39 = vpack.c.bf16 %v423_v48, %v422_v47  ;;  %v729_v24 = vpop.eup %728  ;;  %v535_v55 = vadd.f32 -1.0, %v727_v49  ;;  %v420_v60 = vsel %vm340_vm8, %v844_v52, %v537_v50 }
 0x112   :  { %583 = vst [vmem:[%s948_s3] sm:$0xff] %v582_v36   ;;  %v731_v51 = vpop.eup %730  ;;  %v428_v63 = vsel %vm348_vm10, %v847_v56, %v545_v40  ;;  %v543_v5 = vadd.f32 -1.0, %v729_v24 }
 0x113   :  { %622 = vst [vmem:[%s948_s3 + $0x20] sm:$0xff] %v602_v39   ;;  %v733_v53 = vpop.eup %732  ;;  %v538_v54 = vadd.f32 -1.0, %v731_v51  ;;  %v418_v52 = vsel %vm338_vm12, %v850_v57, %v535_v55 }
 0x114   :  { %v546_v58 = vadd.f32 -1.0, %v733_v53  ;;  %v735_v59 = vpop.eup %734  ;;  %v426_v9 = vsel %vm346_vm14, %v854_v61, %v543_v5 }
 0x115   :  { %v421_v62 = vsel %vm341_vm9, %v860_v3, %v538_v54  ;;  %v536_v2 = vadd.f32 -1.0, %v735_v59  ;;  %v737_v8 = vpop.eup %736 }
 0x116   :  { %v597_v0 = vpack.c.bf16 %v421_v62, %v420_v60  ;;  %v429_v1 = vsel %vm349_vm11, %v863_v4, %v546_v58  ;;  %v544_v4 = vadd.f32 -1.0, %v737_v8 }
 0x117   :  { %v617_v7 = vpack.c.bf16 %v429_v1, %v428_v63  ;;  %v419_v3 = vsel %vm339_vm13, %v867_v6, %v536_v2 }
 0x118   :  { %621 = vst [vmem:[%s948_s3 + $0x18] sm:$0xff] %v597_v0   ;;  %v592_v56 = vpack.c.bf16 %v419_v3, %v418_v52  ;;  %v427_v57 = vsel %vm347_vm15, %v875_v15, %v544_v4 }
 0x119   :  { %625 = vst [vmem:[%s948_s3 + $0x38] sm:$0xff] %v617_v7   ;;  %v612_v10 = vpack.c.bf16 %v427_v57, %v426_v9 }
 0x11a   :  { %620 = vst [vmem:[%s948_s3 + $0x10] sm:$0xff] %v592_v56  }
 0x11b   :  { %624 = vst [vmem:[%s948_s3 + $0x30] sm:$0xff] %v612_v10  }

// kernel: _lambda_.23
= control target key start
LH: loop header
LB: loop body
LE: loop exit
PB: predicated region body
PF: predicated region fallthrough
CT: control target
= control target key end

     0   :  { %s1134_s1 = inlined_call_operand.vmem [shape: bf16[256,128], index: 1, kind: input, shape index: {}]   ;;  %s1135_s0 = inlined_call_operand.vmem [shape: bf16[128,256], index: 0, kind: input, shape index: {}]   ;;  %s1136_s2 = inlined_call_operand.vmem [shape: f32[1,128], index: 2, kind: input, shape index: {}]   ;;  %s1137_s3 = inlined_call_operand.vmem [shape: bf16[128,128], index: 3, kind: output, shape index: {}]  }
   0x1   :  { %v818_v0 = vld [vmem:[%s1134_s1 + $0x40] sm:$0xff]   ;;  %v820_v2 = vld [vmem:[%s1134_s1 + $0x48] sm:$0xff]   ;;  %v822_v4 = vld [vmem:[%s1134_s1 + $0x50] sm:$0xff]  }
   0x2   :  { %v819_v1 = vld [vmem:[%s1134_s1] sm:$0xff]   ;;  %738 = vmatprep.subr.bf16.mxu0 %v818_v0  ;;  %802 = vmatprep.subr.bf16.mxu1 %v818_v0  ;;  %v821_v3 = vld [vmem:[%s1134_s1 + $0x8] sm:$0xff]   ;;  %v823_v5 = vld [vmem:[%s1134_s1 + $0x10] sm:$0xff]  }
   0x3   :  { %739 = vmatpush3.bf16.msra.mxu0 %v819_v1  ;;  %810 = vmatpush3.bf16.msra.mxu1 %v819_v1  ;;  %v824_v6 = vld [vmem:[%s1134_s1 + $0x58] sm:$0xff]   ;;  %v826_v8 = vld [vmem:[%s1134_s1 + $0x60] sm:$0xff]   ;;  %v828_v10 = vld [vmem:[%s1134_s1 + $0x68] sm:$0xff]  }
   0x4   :  { %740 = vmatprep.subr.bf16.mxu0 %v820_v2  ;;  %803 = vmatprep.subr.bf16.mxu1 %v820_v2  ;;  %v825_v7 = vld [vmem:[%s1134_s1 + $0x18] sm:$0xff]   ;;  %v827_v9 = vld [vmem:[%s1134_s1 + $0x20] sm:$0xff]   ;;  %v829_v13 = vld [vmem:[%s1134_s1 + $0x28] sm:$0xff]  }
   0x5   :  { %v836_v11 = vld [vmem:[%s1135_s0 + $0x4] ss:$8 sps:$4 sm:$0xff]   ;;  %v830_v14 = vld [vmem:[%s1134_s1 + $0x70] sm:$0xff]   ;;  %v832_v16 = vld [vmem:[%s1134_s1 + $0x78] sm:$0xff]  }
   0x6   :  { %v839_v12 = vld [vmem:[%s1135_s0 + $0x44] ss:$8 sps:$4 sm:$0xff]   ;;  %314 = vmatprep.mubr.bf16.mxu0 %v836_v11  ;;  %v831_v15 = vld [vmem:[%s1134_s1 + $0x30] sm:$0xff]   ;;  %v833_v17 = vld [vmem:[%s1134_s1 + $0x38] sm:$0xff]  }
   0x7   :  { %741 = vmatpush3.bf16.msra.mxu0 %v821_v3  ;;  %811 = vmatpush3.bf16.msra.mxu1 %v821_v3  ;;  %v834_v18 = vld [vmem:[%s1135_s0] ss:$8 sps:$4 sm:$0xff]   ;;  %v840_v20 = vld [vmem:[%s1135_s0 + $0x14] ss:$8 sps:$4 sm:$0xff]   ;;  %v844_v22 = vld [vmem:[%s1135_s0 + $0x10] ss:$8 sps:$4 sm:$0xff]  }
   0x8   :  { %742 = vmatprep.subr.bf16.mxu0 %v822_v4  ;;  %804 = vmatprep.subr.bf16.mxu1 %v822_v4  ;;  %v837_v19 = vld [vmem:[%s1135_s0 + $0x40] ss:$8 sps:$4 sm:$0xff]   ;;  %v842_v21 = vld [vmem:[%s1135_s0 + $0x54] ss:$8 sps:$4 sm:$0xff]   ;;  %v845_v23 = vld [vmem:[%s1135_s0 + $0x50] ss:$8 sps:$4 sm:$0xff]  }
   0x9   :  { %346 = vmatprep.mubr.bf16.mxu1 %v839_v12  ;;  %v846_v24 = vld [vmem:[%s1135_s0 + $0x24] ss:$8 sps:$4 sm:$0xff]   ;;  %v850_v26 = vld [vmem:[%s1135_s0 + $0x20] ss:$8 sps:$4 sm:$0xff]   ;;  %v852_v28 = vld [vmem:[%s1135_s0 + $0x34] ss:$8 sps:$4 sm:$0xff]  }
   0xa   :  { %v848_v25 = vld [vmem:[%s1135_s0 + $0x64] ss:$8 sps:$4 sm:$0xff]   ;;  %v851_v27 = vld [vmem:[%s1135_s0 + $0x60] ss:$8 sps:$4 sm:$0xff]   ;;  %v854_v29 = vld [vmem:[%s1135_s0 + $0x74] ss:$8 sps:$4 sm:$0xff]  }
   0xb   :  { %743 = vmatpush3.bf16.msra.mxu0 %v823_v5  ;;  %812 = vmatpush3.bf16.msra.mxu1 %v823_v5  ;;  %v856_v30 = vld [vmem:[%s1135_s0 + $0x30] ss:$8 sps:$4 sm:$0xff]   ;;  %v1009_v34 = vld [vmem:[%s1136_s2] ss:$0 sm:$0xff] }
   0xc   :  { %744 = vmatprep.subr.bf16.mxu0 %v824_v6  ;;  %805 = vmatprep.subr.bf16.mxu1 %v824_v6  ;;  %v857_v31 = vld [vmem:[%s1135_s0 + $0x70] ss:$8 sps:$4 sm:$0xff]  }
   0xf   :  { %745 = vmatpush3.bf16.msra.mxu0 %v825_v7  ;;  %813 = vmatpush3.bf16.msra.mxu1 %v825_v7 }
  0x10   :  { %746 = vmatprep.subr.bf16.mxu0 %v826_v8  ;;  %806 = vmatprep.subr.bf16.mxu1 %v826_v8 }
  0x13   :  { %747 = vmatpush3.bf16.msra.mxu0 %v827_v9  ;;  %814 = vmatpush3.bf16.msra.mxu1 %v827_v9 }
  0x14   :  { %748 = vmatprep.subr.bf16.mxu0 %v828_v10  ;;  %807 = vmatprep.subr.bf16.mxu1 %v828_v10 }
  0x17   :  { %749 = vmatpush3.bf16.msra.mxu0 %v829_v13  ;;  %815 = vmatpush3.bf16.msra.mxu1 %v829_v13 }
  0x18   :  { %750 = vmatprep.subr.bf16.mxu0 %v830_v14  ;;  %808 = vmatprep.subr.bf16.mxu1 %v830_v14 }
  0x1b   :  { %751 = vmatpush3.bf16.msra.mxu0 %v831_v15  ;;  %816 = vmatpush3.bf16.msra.mxu1 %v831_v15 }
  0x1c   :  { %752 = vmatprep.subr.bf16.mxu0 %v832_v16  ;;  %809 = vmatprep.subr.bf16.mxu1 %v832_v16 }
  0x1f   :  { %753 = vmatpush3.bf16.msra.mxu0 %v833_v17  ;;  %817 = vmatpush3.bf16.msra.mxu1 %v833_v17 }
  0x22   :  { %315 = vmatmul.mubr.bf16.vlgmr.msra.gmra.mrb[0].mxu0 %v834_v18  ;;  %347 = vmatmul.mubr.bf16.vlgmr.msra.gmra.mrb[0].mxu1 %v837_v19 }
  0x23   :  { %322 = vmatprep.mubr.bf16.mxu0 %v840_v20  ;;  %354 = vmatprep.mubr.bf16.mxu1 %v842_v21 }
  0x2a   :  { %323 = vmatmul.mubr.bf16.gmra.mrb[4].mxu0 %v844_v22  ;;  %355 = vmatmul.mubr.bf16.gmra.mrb[4].mxu1 %v845_v23 }
  0x2b   :  { %330 = vmatprep.mubr.bf16.mxu0 %v846_v24  ;;  %362 = vmatprep.mubr.bf16.mxu1 %v848_v25 }
  0x32   :  { %331 = vmatmul.mubr.bf16.gmra.mrb[8].mxu0 %v850_v26  ;;  %363 = vmatmul.mubr.bf16.gmra.mrb[8].mxu1 %v851_v27 }
  0x33   :  { %338 = vmatprep.mubr.bf16.mxu0 %v852_v28  ;;  %370 = vmatprep.mubr.bf16.mxu1 %v854_v29 }
  0x3a   :  { %339 = vmatmul.mubr.bf16.gmra.mrb[12].mxu0 %v856_v30  ;;  %371 = vmatmul.mubr.bf16.gmra.mrb[12].mxu1 %v857_v31 }
  0xf5   :  { %v754_v32 = vpop.f32.mrb[0].mxu0  ;;  %v778_v33 = vpop.f32.mrb[0].mxu1 }
  0xf6   :  { %v755_v35 = vpop.f32.mrb[1].mxu0  ;;  %v779_v36 = vpop.f32.mrb[1].mxu1 }
  0xf7   :  { %v756_v37 = vadd.f32 %v755_v35, %v754_v32  ;;  %v780_v38 = vadd.f32 %v779_v36, %v778_v33  ;;  %v757_v39 = vpop.f32.mrb[2].mxu0  ;;  %v781_v40 = vpop.f32.mrb[2].mxu1 }
  0xf8   :  { %v758_v41 = vpop.f32.mrb[3].mxu0  ;;  %v782_v42 = vpop.f32.mrb[3].mxu1 }
  0xf9   :  { %v1012_v43 = vadd.f32 %v756_v37, %v1009_v34  ;;  %v1015_v44 = vadd.f32 %v780_v38, %v1009_v34  ;;  %v759_v45 = vadd.f32 %v758_v41, %v757_v39  ;;  %v783_v46 = vadd.f32 %v782_v42, %v781_v40 }
  0xfb   :  { %v446_v47 = vmin.f32 %v1012_v43, 0.0  ;;  %v454_v48 = vmin.f32 %v1015_v44, 0.0  ;;  %v1020_v49 = vadd.f32 %v759_v45, %v1009_v34  ;;  %v1023_v50 = vadd.f32 %v783_v46, %v1009_v34 }
  0xfc   :  { %vm430_vm0 = vcmp.gt.f32.partialorder %v1012_v43, 0.0  ;;  %vm438_vm1 = vcmp.gt.f32.partialorder %v1015_v44, 0.0 }
  0xfd   :  { %v462_v51 = vmul.f32 1.442695, %v446_v47  ;;  %v478_v52 = vmul.f32 1.442695, %v454_v48  ;;  %v760_v53 = vpop.f32.mrb[4].mxu0  ;;  %v784_v54 = vpop.f32.mrb[4].mxu1 }
  0xfe   :  { %v447_v55 = vmin.f32 %v1020_v49, 0.0  ;;  %v455_v56 = vmin.f32 %v1023_v50, 0.0  ;;  %v761_v57 = vpop.f32.mrb[5].mxu0  ;;  %v785_v58 = vpop.f32.mrb[5].mxu1  ;;  %vm431_vm2 = vcmp.gt.f32.partialorder %v1020_v49, 0.0  ;;  %vm439_vm3 = vcmp.gt.f32.partialorder %v1023_v50, 0.0 }
  0xff   :  { %858 = vpow2.f32 %v462_v51  ;;  %v762_v59 = vadd.f32 %v761_v57, %v760_v53  ;;  %v786_v60 = vadd.f32 %v785_v58, %v784_v54  ;;  %v763_v61 = vpop.f32.mrb[6].mxu0  ;;  %v787_v62 = vpop.f32.mrb[6].mxu1 }
 0x100   :  { %860 = vpow2.f32 %v478_v52  ;;  %v464_v63 = vmul.f32 1.442695, %v447_v55  ;;  %v480_v0 = vmul.f32 1.442695, %v455_v56  ;;  %v764_v1 = vpop.f32.mrb[7].mxu0  ;;  %v788_v2 = vpop.f32.mrb[7].mxu1 }
 0x101   :  { %v1028_v3 = vadd.f32 %v762_v59, %v1009_v34  ;;  %v1031_v4 = vadd.f32 %v786_v60, %v1009_v34  ;;  %v765_v5 = vadd.f32 %v764_v1, %v763_v61  ;;  %v789_v6 = vadd.f32 %v788_v2, %v787_v62 }
 0x102   :  { %862 = vpow2.f32 %v464_v63 }
 0x103   :  { %864 = vpow2.f32 %v480_v0  ;;  %v448_v7 = vmin.f32 %v1028_v3, 0.0  ;;  %v456_v8 = vmin.f32 %v1031_v4, 0.0  ;;  %v1036_v9 = vadd.f32 %v765_v5, %v1009_v34 }
 0x104   :  { %v1039_v10 = vadd.f32 %v789_v6, %v1009_v34  ;;  %vm432_vm4 = vcmp.gt.f32.partialorder %v1028_v3, 0.0  ;;  %vm440_vm5 = vcmp.gt.f32.partialorder %v1031_v4, 0.0 }
 0x105   :  { %v466_v11 = vmul.f32 1.442695, %v448_v7  ;;  %v766_v12 = vpop.f32.mrb[8].mxu0  ;;  %v790_v13 = vpop.f32.mrb[8].mxu1  ;;  %v482_v14 = vmul.f32 1.442695, %v456_v8 }
 0x106   :  { %v449_v15 = vmin.f32 %v1036_v9, 0.0  ;;  %v767_v16 = vpop.f32.mrb[9].mxu0  ;;  %v457_v17 = vmin.f32 %v1039_v10, 0.0  ;;  %v791_v19 = vpop.f32.mrb[9].mxu1  ;;  %vm433_vm6 = vcmp.gt.f32.partialorder %v1036_v9, 0.0  ;;  %vm441_vm7 = vcmp.gt.f32.partialorder %v1039_v10, 0.0 }
 0x107   :  { %866 = vpow2.f32 %v466_v11  ;;  %v768_v18 = vadd.f32 %v767_v16, %v766_v12  ;;  %v769_v20 = vpop.f32.mrb[10].mxu0  ;;  %v792_v22 = vadd.f32 %v791_v19, %v790_v13  ;;  %v793_v23 = vpop.f32.mrb[10].mxu1 }
 0x108   :  { %868 = vpow2.f32 %v482_v14  ;;  %v468_v21 = vmul.f32 1.442695, %v449_v15  ;;  %v770_v24 = vpop.f32.mrb[11].mxu0  ;;  %v484_v26 = vmul.f32 1.442695, %v457_v17  ;;  %v794_v29 = vpop.f32.mrb[11].mxu1 }
 0x109   :  { %v859_v25 = vpop.eup %858  ;;  %v1044_v27 = vadd.f32 %v768_v18, %v1009_v34  ;;  %v771_v28 = vadd.f32 %v770_v24, %v769_v20  ;;  %v1047_v32 = vadd.f32 %v792_v22, %v1009_v34  ;;  %v795_v33 = vadd.f32 %v794_v29, %v793_v23 }
 0x10a   :  { %v861_v30 = vpop.eup %860  ;;  %v643_v31 = vadd.f32 -1.0, %v859_v25  ;;  %870 = vpow2.f32 %v468_v21 }
 0x10b   :  { %v651_v35 = vadd.f32 -1.0, %v861_v30  ;;  %872 = vpow2.f32 %v484_v26  ;;  %v450_v36 = vmin.f32 %v1044_v27, 0.0  ;;  %v458_v38 = vmin.f32 %v1047_v32, 0.0 }
 0x10c   :  { %v863_v37 = vpop.eup %862  ;;  %v1055_v39 = vadd.f32 %v771_v28, %v1009_v34  ;;  %v1059_v45 = vadd.f32 %v795_v33, %v1009_v34  ;;  %v510_v48 = vsel %vm430_vm0, %v1012_v43, %v643_v31  ;;  %vm434_vm8 = vcmp.gt.f32.partialorder %v1044_v27, 0.0 }
 0x10d   :  { %v865_v40 = vpop.eup %864  ;;  %v644_v41 = vadd.f32 -1.0, %v863_v37  ;;  %v470_v42 = vmul.f32 1.442695, %v450_v36  ;;  %v772_v46 = vpop.f32.mrb[12].mxu0  ;;  %v486_v52 = vmul.f32 1.442695, %v458_v38  ;;  %v518_v55 = vsel %vm438_vm1, %v1015_v44, %v651_v35 }
 0x10e   :  { %v796_v47 = vpop.f32.mrb[12].mxu1  ;;  %v652_v51 = vadd.f32 -1.0, %v865_v40  ;;  %v451_v53 = vmin.f32 %v1055_v39, 0.0  ;;  %v773_v54 = vpop.f32.mrb[13].mxu0  ;;  %v459_v57 = vmin.f32 %v1059_v45, 0.0  ;;  %vm435_vm9 = vcmp.gt.f32.partialorder %v1055_v39, 0.0 }
 0x10f   :  { %v511_v56 = vsel %vm431_vm2, %v1020_v49, %v644_v41  ;;  %874 = vpow2.f32 %v470_v42  ;;  %v797_v58 = vpop.f32.mrb[13].mxu1  ;;  %v775_v59 = vpop.f32.mrb[14].mxu0  ;;  %v774_v2 = vadd.f32 %v773_v54, %v772_v46  ;;  %vm442_vm10 = vcmp.gt.f32.partialorder %v1047_v32, 0.0 }
 0x110   :  { %v694_v60 = vpack.c.bf16 %v511_v56, %v510_v48  ;;  %v519_v43 = vsel %vm439_vm3, %v1023_v50, %v652_v51  ;;  %876 = vpow2.f32 %v486_v52  ;;  %v472_v61 = vmul.f32 1.442695, %v451_v53  ;;  %v799_v62 = vpop.f32.mrb[14].mxu1  ;;  %v776_v63 = vpop.f32.mrb[15].mxu0 }
 0x111   :  { %v867_v0 = vpop.eup %866  ;;  %v714_v44 = vpack.c.bf16 %v519_v43, %v518_v55  ;;  %v488_v1 = vmul.f32 1.442695, %v459_v57  ;;  %v798_v5 = vadd.f32 %v797_v58, %v796_v47  ;;  %v800_v49 = vpop.f32.mrb[15].mxu1  ;;  %v777_v8 = vadd.f32 %v776_v63, %v775_v59 }
 0x112   :  { %v869_v6 = vpop.eup %868  ;;  %695 = vst [vmem:[%s1137_s3] sm:$0xff] %v694_v60   ;;  %v645_v7 = vadd.f32 -1.0, %v867_v0  ;;  %878 = vpow2.f32 %v472_v61  ;;  %v801_v11 = vadd.f32 %v800_v49, %v799_v62  ;;  %v1082_v12 = vadd.f32 %v774_v2, %v1009_v34 }
 0x113   :  { %734 = vst [vmem:[%s1137_s3 + $0x20] sm:$0xff] %v714_v44   ;;  %v653_v50 = vadd.f32 -1.0, %v869_v6  ;;  %880 = vpow2.f32 %v488_v1  ;;  %v1085_v13 = vadd.f32 %v798_v5, %v1009_v34  ;;  %v386_v15 = vadd.f32 %v777_v8, %v1009_v34 }
 0x114   :  { %v871_v14 = vpop.eup %870  ;;  %v1090_v16 = vadd.f32 %v801_v11, %v1009_v34  ;;  %v452_v19 = vmin.f32 %v1082_v12, 0.0  ;;  %v512_v20 = vsel %vm432_vm4, %v1028_v3, %v645_v7  ;;  %vm443_vm11 = vcmp.gt.f32.partialorder %v1059_v45, 0.0 }
 0x115   :  { %v873_v17 = vpop.eup %872  ;;  %v646_v18 = vadd.f32 -1.0, %v871_v14  ;;  %v460_v22 = vmin.f32 %v1085_v13, 0.0  ;;  %v520_v23 = vsel %vm440_vm5, %v1031_v4, %v653_v50  ;;  %v453_v25 = vmin.f32 %v386_v15, 0.0 }
 0x116   :  { %v654_v21 = vadd.f32 -1.0, %v873_v17  ;;  %v474_v24 = vmul.f32 1.442695, %v452_v19  ;;  %v461_v30 = vmin.f32 %v1090_v16, 0.0  ;;  %vm436_vm12 = vcmp.gt.f32.partialorder %v1082_v12, 0.0 }
 0x117   :  { %v513_v34 = vsel %vm433_vm6, %v1036_v9, %v646_v18  ;;  %v490_v29 = vmul.f32 1.442695, %v460_v22  ;;  %v476_v3 = vmul.f32 1.442695, %v453_v25  ;;  %vm437_vm13 = vcmp.gt.f32.partialorder %v386_v15, 0.0 }
 0x118   :  { %v699_v26 = vpack.c.bf16 %v513_v34, %v512_v20  ;;  %v521_v28 = vsel %vm441_vm7, %v1039_v10, %v654_v21  ;;  %882 = vpow2.f32 %v474_v24  ;;  %v492_v4 = vmul.f32 1.442695, %v461_v30 }
 0x119   :  { %v875_v31 = vpop.eup %874  ;;  %v719_v33 = vpack.c.bf16 %v521_v28, %v520_v23  ;;  %884 = vpow2.f32 %v490_v29  ;;  %vm444_vm14 = vcmp.gt.f32.partialorder %v1085_v13, 0.0  ;;  %vm445_vm15 = vcmp.gt.f32.partialorder %v1090_v16, 0.0 }
 0x11a   :  { %v877_v35 = vpop.eup %876  ;;  %731 = vst [vmem:[%s1137_s3 + $0x8] sm:$0xff] %v699_v26   ;;  %v647_v9 = vadd.f32 -1.0, %v875_v31  ;;  %886 = vpow2.f32 %v476_v3 }
 0x11b   :  { %735 = vst [vmem:[%s1137_s3 + $0x28] sm:$0xff] %v719_v33   ;;  %v655_v36 = vadd.f32 -1.0, %v877_v35  ;;  %888 = vpow2.f32 %v492_v4 }
 0x11c   :  { %v879_v10 = vpop.eup %878  ;;  %v514_v41 = vsel %vm434_vm8, %v1044_v27, %v647_v9 }
 0x11d   :  { %v881_v37 = vpop.eup %880  ;;  %v648_v38 = vadd.f32 -1.0, %v879_v10  ;;  %v522_v46 = vsel %vm442_vm10, %v1047_v32, %v655_v36 }
 0x11e   :  { %v656_v40 = vadd.f32 -1.0, %v881_v37 }
 0x11f   :  { %v515_v42 = vsel %vm435_vm9, %v1055_v39, %v648_v38 }
 0x120   :  { %v704_v47 = vpack.c.bf16 %v515_v42, %v514_v41  ;;  %v523_v48 = vsel %vm443_vm11, %v1059_v45, %v656_v40 }
 0x121   :  { %v724_v51 = vpack.c.bf16 %v523_v48, %v522_v46 }
 0x122   :  { %732 = vst [vmem:[%s1137_s3 + $0x10] sm:$0xff] %v704_v47   ;;  %v883_v52 = vpop.eup %882 }
 0x123   :  { %736 = vst [vmem:[%s1137_s3 + $0x30] sm:$0xff] %v724_v51   ;;  %v885_v27 = vpop.eup %884  ;;  %v649_v53 = vadd.f32 -1.0, %v883_v52 }
 0x124   :  { %v887_v39 = vpop.eup %886  ;;  %v657_v54 = vadd.f32 -1.0, %v885_v27 }
 0x125   :  { %v889_v55 = vpop.eup %888  ;;  %v650_v56 = vadd.f32 -1.0, %v887_v39  ;;  %v516_v45 = vsel %vm436_vm12, %v1082_v12, %v649_v53 }
 0x126   :  { %v658_v32 = vadd.f32 -1.0, %v889_v55  ;;  %v524_v58 = vsel %vm444_vm14, %v1085_v13, %v657_v54 }
 0x127   :  { %v517_v57 = vsel %vm437_vm13, %v386_v15, %v650_v56 }
 0x128   :  { %v709_v59 = vpack.c.bf16 %v517_v57, %v516_v45  ;;  %v525_v60 = vsel %vm445_vm15, %v1090_v16, %v658_v32 }
 0x129   :  { %v729_v43 = vpack.c.bf16 %v525_v60, %v524_v58 }
 0x12a   :  { %733 = vst [vmem:[%s1137_s3 + $0x18] sm:$0xff] %v709_v59  }
 0x12b   :  { %737 = vst [vmem:[%s1137_s3 + $0x38] sm:$0xff] %v729_v43  }

// kernel: _lambda_.25
= control target key start
LH: loop header
LB: loop body
LE: loop exit
PB: predicated region body
PF: predicated region fallthrough
CT: control target
= control target key end

     0   :  { %s505_s1 = inlined_call_operand.vmem [shape: bf16[256,128], index: 1, kind: input, shape index: {}]   ;;  %s506_s0 = inlined_call_operand.vmem [shape: bf16[32,256], index: 0, kind: input, shape index: {}]   ;;  %s507_s2 = inlined_call_operand.vmem [shape: f32[1,128], index: 2, kind: input, shape index: {}]   ;;  %s508_s3 = inlined_call_operand.vmem [shape: bf16[32,128], index: 3, kind: output, shape index: {}]  }
   0x1   :  { %v386_v0 = vld [vmem:[%s505_s1 + $0x40] sm:$0xff]   ;;  %v388_v2 = vld [vmem:[%s505_s1 + $0x48] sm:$0xff]   ;;  %v390_v4 = vld [vmem:[%s505_s1 + $0x50] sm:$0xff]  }
   0x2   :  { %v387_v1 = vld [vmem:[%s505_s1] sm:$0xff]   ;;  %342 = vmatprep.subr.bf16.mxu0 %v386_v0  ;;  %370 = vmatprep.subr.bf16.mxu1 %v386_v0  ;;  %v389_v3 = vld [vmem:[%s505_s1 + $0x8] sm:$0xff]   ;;  %v391_v5 = vld [vmem:[%s505_s1 + $0x10] sm:$0xff]  }
   0x3   :  { %343 = vmatpush3.bf16.msra.mxu0 %v387_v1  ;;  %378 = vmatpush3.bf16.msra.mxu1 %v387_v1  ;;  %v392_v6 = vld [vmem:[%s505_s1 + $0x58] sm:$0xff]   ;;  %v394_v8 = vld [vmem:[%s505_s1 + $0x60] sm:$0xff]   ;;  %v396_v10 = vld [vmem:[%s505_s1 + $0x68] sm:$0xff]  }
   0x4   :  { %344 = vmatprep.subr.bf16.mxu0 %v388_v2  ;;  %371 = vmatprep.subr.bf16.mxu1 %v388_v2  ;;  %v393_v7 = vld [vmem:[%s505_s1 + $0x18] sm:$0xff]   ;;  %v395_v9 = vld [vmem:[%s505_s1 + $0x20] sm:$0xff]   ;;  %v397_v13 = vld [vmem:[%s505_s1 + $0x28] sm:$0xff]  }
   0x5   :  { %v404_v11 = vld [vmem:[%s506_s0 + $0x4] ss:$8 sps:$4 sm:$0xff]   ;;  %v407_v12 = vld [vmem:[%s506_s0 + $0x14] ss:$8 sps:$4 sm:$0xff]   ;;  %v402_v18 = vld [vmem:[%s506_s0] ss:$8 sps:$4 sm:$0xff]  }
   0x6   :  { %v398_v14 = vld [vmem:[%s505_s1 + $0x70] sm:$0xff]   ;;  %218 = vmatprep.mubr.bf16.mxu0 %v404_v11  ;;  %226 = vmatprep.mubr.bf16.mxu1 %v407_v12  ;;  %v400_v16 = vld [vmem:[%s505_s1 + $0x78] sm:$0xff]   ;;  %v298_v22 = vld [vmem:[%s507_s2] ss:$0 sm:$0xff] }
   0x7   :  { %345 = vmatpush3.bf16.msra.mxu0 %v389_v3  ;;  %379 = vmatpush3.bf16.msra.mxu1 %v389_v3  ;;  %v399_v15 = vld [vmem:[%s505_s1 + $0x30] sm:$0xff]   ;;  %v401_v17 = vld [vmem:[%s505_s1 + $0x38] sm:$0xff]  }
   0x8   :  { %346 = vmatprep.subr.bf16.mxu0 %v390_v4  ;;  %372 = vmatprep.subr.bf16.mxu1 %v390_v4  ;;  %v405_v19 = vld [vmem:[%s506_s0 + $0x10] ss:$8 sps:$4 sm:$0xff]  }
   0xb   :  { %347 = vmatpush3.bf16.msra.mxu0 %v391_v5  ;;  %380 = vmatpush3.bf16.msra.mxu1 %v391_v5 }
   0xc   :  { %348 = vmatprep.subr.bf16.mxu0 %v392_v6  ;;  %373 = vmatprep.subr.bf16.mxu1 %v392_v6 }
   0xf   :  { %349 = vmatpush3.bf16.msra.mxu0 %v393_v7  ;;  %381 = vmatpush3.bf16.msra.mxu1 %v393_v7 }
  0x10   :  { %350 = vmatprep.subr.bf16.mxu0 %v394_v8  ;;  %374 = vmatprep.subr.bf16.mxu1 %v394_v8 }
  0x13   :  { %351 = vmatpush3.bf16.msra.mxu0 %v395_v9  ;;  %382 = vmatpush3.bf16.msra.mxu1 %v395_v9 }
  0x14   :  { %352 = vmatprep.subr.bf16.mxu0 %v396_v10  ;;  %375 = vmatprep.subr.bf16.mxu1 %v396_v10 }
  0x17   :  { %353 = vmatpush3.bf16.msra.mxu0 %v397_v13  ;;  %383 = vmatpush3.bf16.msra.mxu1 %v397_v13 }
  0x18   :  { %354 = vmatprep.subr.bf16.mxu0 %v398_v14  ;;  %376 = vmatprep.subr.bf16.mxu1 %v398_v14 }
  0x1b   :  { %355 = vmatpush3.bf16.msra.mxu0 %v399_v15  ;;  %384 = vmatpush3.bf16.msra.mxu1 %v399_v15 }
  0x1c   :  { %356 = vmatprep.subr.bf16.mxu0 %v400_v16  ;;  %377 = vmatprep.subr.bf16.mxu1 %v400_v16 }
  0x1f   :  { %357 = vmatpush3.bf16.msra.mxu0 %v401_v17  ;;  %385 = vmatpush3.bf16.msra.mxu1 %v401_v17 }
  0x22   :  { %219 = vmatmul.mubr.bf16.vlgmr.msra.gmra.mrb[0].mxu0 %v402_v18  ;;  %227 = vmatmul.mubr.bf16.vlgmr.msra.gmra.mrb[0].mxu1 %v405_v19 }
  0xf5   :  { %v358_v20 = vpop.f32.mrb[0].mxu0  ;;  %v364_v21 = vpop.f32.mrb[0].mxu1 }
  0xf6   :  { %v359_v23 = vpop.f32.mrb[1].mxu0  ;;  %v365_v24 = vpop.f32.mrb[1].mxu1 }
  0xf7   :  { %v360_v25 = vadd.f32 %v359_v23, %v358_v20  ;;  %v366_v26 = vadd.f32 %v365_v24, %v364_v21  ;;  %v361_v27 = vpop.f32.mrb[2].mxu0  ;;  %v367_v28 = vpop.f32.mrb[2].mxu1 }
  0xf8   :  { %v362_v29 = vpop.f32.mrb[3].mxu0  ;;  %v368_v30 = vpop.f32.mrb[3].mxu1 }
  0xf9   :  { %v235_v31 = vadd.f32 %v360_v25, %v298_v22  ;;  %v237_v32 = vadd.f32 %v366_v26, %v298_v22  ;;  %v363_v33 = vadd.f32 %v362_v29, %v361_v27  ;;  %v369_v34 = vadd.f32 %v368_v30, %v367_v28 }
  0xfb   :  { %v254_v35 = vmin.f32 %v235_v31, 0.0  ;;  %v256_v36 = vmin.f32 %v237_v32, 0.0  ;;  %v236_v37 = vadd.f32 %v363_v33, %v298_v22  ;;  %v238_v38 = vadd.f32 %v369_v34, %v298_v22 }
  0xfc   :  { %vm250_vm0 = vcmp.gt.f32.partialorder %v235_v31, 0.0  ;;  %vm252_vm2 = vcmp.gt.f32.partialorder %v237_v32, 0.0 }
  0xfd   :  { %v258_v39 = vmul.f32 1.442695, %v254_v35  ;;  %v262_v40 = vmul.f32 1.442695, %v256_v36  ;;  %v255_v41 = vmin.f32 %v236_v37, 0.0  ;;  %v257_v42 = vmin.f32 %v238_v38, 0.0 }
  0xfe   :  { %vm251_vm1 = vcmp.gt.f32.partialorder %v236_v37, 0.0  ;;  %vm253_vm3 = vcmp.gt.f32.partialorder %v238_v38, 0.0 }
  0xff   :  { %408 = vpow2.f32 %v258_v39  ;;  %v260_v43 = vmul.f32 1.442695, %v255_v41  ;;  %v264_v44 = vmul.f32 1.442695, %v257_v42 }
 0x100   :  { %410 = vpow2.f32 %v262_v40 }
 0x101   :  { %412 = vpow2.f32 %v260_v43 }
 0x102   :  { %414 = vpow2.f32 %v264_v44 }
 0x109   :  { %v409_v45 = vpop.eup %408 }
 0x10a   :  { %v411_v46 = vpop.eup %410  ;;  %v319_v47 = vadd.f32 -1.0, %v409_v45 }
 0x10b   :  { %v413_v48 = vpop.eup %412  ;;  %v321_v49 = vadd.f32 -1.0, %v411_v46 }
 0x10c   :  { %v415_v50 = vpop.eup %414  ;;  %v320_v51 = vadd.f32 -1.0, %v413_v48  ;;  %v270_v53 = vsel %vm250_vm0, %v235_v31, %v319_v47 }
 0x10d   :  { %v322_v52 = vadd.f32 -1.0, %v415_v50  ;;  %v272_v55 = vsel %vm252_vm2, %v237_v32, %v321_v49 }
 0x10e   :  { %v271_v54 = vsel %vm251_vm1, %v236_v37, %v320_v51 }
 0x10f   :  { %v334_v56 = vpack.c.bf16 %v271_v54, %v270_v53  ;;  %v273_v57 = vsel %vm253_vm3, %v238_v38, %v322_v52 }
 0x110   :  { %v339_v58 = vpack.c.bf16 %v273_v57, %v272_v55 }
 0x111   :  { %335 = vst [vmem:[%s508_s3] sm:$0xff] %v334_v56  }
 0x112   :  { %341 = vst [vmem:[%s508_s3 + $0x8] sm:$0xff] %v339_v58  }

// kernel: _lambda_.26
= control target key start
LH: loop header
LB: loop body
LE: loop exit
PB: predicated region body
PF: predicated region fallthrough
CT: control target
= control target key end

     0   :  { %s698_s1 = inlined_call_operand.vmem [shape: bf16[384,128], index: 1, kind: input, shape index: {}]   ;;  %s699_s0 = inlined_call_operand.vmem [shape: bf16[32,384], index: 0, kind: input, shape index: {}]   ;;  %s700_s2 = inlined_call_operand.vmem [shape: f32[1,128], index: 2, kind: input, shape index: {}]   ;;  %s701_s3 = inlined_call_operand.vmem [shape: bf16[32,128], index: 3, kind: output, shape index: {}]  }
   0x1   :  { %v539_v0 = vld [vmem:[%s698_s1 + $0x40] sm:$0xff]   ;;  %v542_v3 = vld [vmem:[%s698_s1 + $0x48] sm:$0xff]   ;;  %v545_v6 = vld [vmem:[%s698_s1 + $0x50] sm:$0xff]  }
   0x2   :  { %v540_v1 = vld [vmem:[%s698_s1] sm:$0xff]   ;;  %481 = vmatprep.subr.bf16.mxu0 %v539_v0  ;;  %v543_v4 = vld [vmem:[%s698_s1 + $0x8] sm:$0xff]   ;;  %v546_v7 = vld [vmem:[%s698_s1 + $0x10] sm:$0xff]  }
   0x3   :  { %v541_v2 = vld [vmem:[%s698_s1 + $0x80] sm:$0xff]   ;;  %482 = vmatpush3.bf16.msra.mxu0 %v540_v1  ;;  %v544_v5 = vld [vmem:[%s698_s1 + $0x88] sm:$0xff]   ;;  %v547_v8 = vld [vmem:[%s698_s1 + $0x90] sm:$0xff]  }
   0x4   :  { %519 = vmatprep.subr.bf16.mxu1 %v541_v2  ;;  %483 = vmatprep.subr.bf16.mxu0 %v542_v3  ;;  %v548_v9 = vld [vmem:[%s698_s1 + $0x58] sm:$0xff]   ;;  %v551_v12 = vld [vmem:[%s698_s1 + $0x60] sm:$0xff]   ;;  %v554_v15 = vld [vmem:[%s698_s1 + $0x68] sm:$0xff]  }
   0x5   :  { %520 = vmatpush3.bf16.msra.mxu1 %v541_v2  ;;  %v549_v10 = vld [vmem:[%s698_s1 + $0x18] sm:$0xff]   ;;  %v553_v13 = vld [vmem:[%s698_s1 + $0xa0] sm:$0xff]   ;;  %v556_v16 = vld [vmem:[%s698_s1 + $0xa8] sm:$0xff]  }
   0x6   :  { %521 = vmatprep.subr.bf16.mxu1 %v544_v5  ;;  %v550_v11 = vld [vmem:[%s698_s1 + $0x98] sm:$0xff]   ;;  %v552_v14 = vld [vmem:[%s698_s1 + $0x20] sm:$0xff]   ;;  %v555_v17 = vld [vmem:[%s698_s1 + $0x28] sm:$0xff]  }
   0x7   :  { %484 = vmatpush3.bf16.msra.mxu0 %v543_v4  ;;  %v557_v18 = vld [vmem:[%s698_s1 + $0x70] sm:$0xff]   ;;  %v560_v21 = vld [vmem:[%s698_s1 + $0x78] sm:$0xff]   ;;  %v563_v26 = vld [vmem:[%s699_s0] ss:$12 sps:$4 sm:$0xff]  }
   0x8   :  { %485 = vmatprep.subr.bf16.mxu0 %v545_v6  ;;  %v558_v19 = vld [vmem:[%s698_s1 + $0x30] sm:$0xff]   ;;  %v562_v22 = vld [vmem:[%s698_s1 + $0xb8] sm:$0xff]   ;;  %v567_v28 = vld [vmem:[%s699_s0 + $0x20] ss:$12 sps:$4 sm:$0xff]  }
   0x9   :  { %522 = vmatpush3.bf16.msra.mxu1 %v544_v5  ;;  %v559_v20 = vld [vmem:[%s698_s1 + $0xb0] sm:$0xff]   ;;  %v561_v25 = vld [vmem:[%s698_s1 + $0x38] sm:$0xff]   ;;  %v427_v36 = vld [vmem:[%s700_s2] ss:$0 sm:$0xff] }
   0xa   :  { %523 = vmatprep.subr.bf16.mxu1 %v547_v8  ;;  %v565_v23 = vld [vmem:[%s699_s0 + $0x4] ss:$12 sps:$4 sm:$0xff]   ;;  %v566_v24 = vld [vmem:[%s699_s0 + $0x8] ss:$12 sps:$4 sm:$0xff]  }
   0xb   :  { %486 = vmatpush3.bf16.msra.mxu0 %v546_v7  ;;  %298 = vmatprep.mubr.bf16.mxu0 %v565_v23  ;;  %v568_v27 = vld [vmem:[%s699_s0 + $0x1c] ss:$12 sps:$4 sm:$0xff]   ;;  %v570_v29 = vld [vmem:[%s699_s0 + $0x18] ss:$12 sps:$4 sm:$0xff]  }
   0xc   :  { %487 = vmatprep.subr.bf16.mxu0 %v548_v9  ;;  %535 = vmatprep.mubr.bf16.mxu1 %v566_v24 }
   0xd   :  { %524 = vmatpush3.bf16.msra.mxu1 %v547_v8 }
   0xe   :  { %525 = vmatprep.subr.bf16.mxu1 %v550_v11 }
   0xf   :  { %488 = vmatpush3.bf16.msra.mxu0 %v549_v10 }
  0x10   :  { %489 = vmatprep.subr.bf16.mxu0 %v551_v12 }
  0x11   :  { %526 = vmatpush3.bf16.msra.mxu1 %v550_v11 }
  0x12   :  { %527 = vmatprep.subr.bf16.mxu1 %v553_v13 }
  0x13   :  { %490 = vmatpush3.bf16.msra.mxu0 %v552_v14 }
  0x14   :  { %491 = vmatprep.subr.bf16.mxu0 %v554_v15 }
  0x15   :  { %528 = vmatpush3.bf16.msra.mxu1 %v553_v13 }
  0x16   :  { %529 = vmatprep.subr.bf16.mxu1 %v556_v16 }
  0x17   :  { %492 = vmatpush3.bf16.msra.mxu0 %v555_v17 }
  0x18   :  { %493 = vmatprep.subr.bf16.mxu0 %v557_v18 }
  0x19   :  { %530 = vmatpush3.bf16.msra.mxu1 %v556_v16 }
  0x1a   :  { %531 = vmatprep.subr.bf16.mxu1 %v559_v20 }
  0x1b   :  { %494 = vmatpush3.bf16.msra.mxu0 %v558_v19 }
  0x1c   :  { %495 = vmatprep.subr.bf16.mxu0 %v560_v21 }
  0x1d   :  { %532 = vmatpush3.bf16.msra.mxu1 %v559_v20 }
  0x1e   :  { %533 = vmatprep.subr.bf16.mxu1 %v562_v22 }
  0x1f   :  { %496 = vmatpush3.bf16.msra.mxu0 %v561_v25 }
  0x21   :  { %534 = vmatpush3.bf16.msra.mxu1 %v562_v22 }
  0x22   :  { %299 = vmatmul.mubr.bf16.vlgmr.msra.gmra.mrb[0].mxu0 %v563_v26 }
  0x23   :  { %306 = vmatprep.mubr.bf16.mxu0 %v568_v27 }
  0x24   :  { %536 = vmatmul.mubr.bf16.vlgmr.msra.gmra.mrb[0].mxu1 %v567_v28 }
  0x2a   :  { %307 = vmatmul.mubr.bf16.gmra.mrb[4].mxu0 %v570_v29 }
  0xf5   :  { %v497_v30 = vpop.f32.mrb[0].mxu0 }
  0xf6   :  { %v498_v31 = vpop.f32.mrb[1].mxu0 }
  0xf7   :  { %v499_v32 = vadd.f32 %v498_v31, %v497_v30  ;;  %v500_v33 = vpop.f32.mrb[2].mxu0  ;;  %v537_v34 = vpop.f32.mrb[0].mxu1 }
  0xf8   :  { %v501_v35 = vpop.f32.mrb[3].mxu0  ;;  %v349_v37 = vpop.f32.mrb[1].mxu1 }
  0xf9   :  { %v502_v38 = vadd.f32 %v501_v35, %v500_v33  ;;  %v350_v39 = vadd.f32 %v499_v32, %v349_v37  ;;  %v538_v40 = vpop.f32.mrb[2].mxu1 }
  0xfa   :  { %v352_v41 = vpop.f32.mrb[3].mxu1 }
  0xfb   :  { %v364_v42 = vadd.f32 %v427_v36, %v350_v39  ;;  %v353_v43 = vadd.f32 %v502_v38, %v352_v41 }
  0xfd   :  { %v383_v44 = vmin.f32 %v364_v42, 0.0  ;;  %v365_v45 = vadd.f32 %v427_v36, %v353_v43  ;;  %v503_v46 = vpop.f32.mrb[4].mxu0  ;;  %vm379_vm0 = vcmp.gt.f32.partialorder %v364_v42, 0.0 }
  0xfe   :  { %v504_v47 = vpop.f32.mrb[5].mxu0 }
  0xff   :  { %v387_v48 = vmul.f32 1.442695, %v383_v44  ;;  %v384_v49 = vmin.f32 %v365_v45, 0.0  ;;  %v505_v50 = vadd.f32 %v504_v47, %v503_v46  ;;  %v506_v51 = vpop.f32.mrb[6].mxu0  ;;  %vm380_vm1 = vcmp.gt.f32.partialorder %v365_v45, 0.0 }
 0x100   :  { %v507_v52 = vpop.f32.mrb[7].mxu0 }
 0x101   :  { %571 = vpow2.f32 %v387_v48  ;;  %v389_v53 = vmul.f32 1.442695, %v384_v49  ;;  %v358_v54 = vadd.f32 %v537_v34, %v505_v50  ;;  %v508_v55 = vadd.f32 %v507_v52, %v506_v51 }
 0x103   :  { %573 = vpow2.f32 %v389_v53  ;;  %v366_v56 = vadd.f32 %v427_v36, %v358_v54  ;;  %v361_v57 = vadd.f32 %v538_v40, %v508_v55 }
 0x105   :  { %v385_v58 = vmin.f32 %v366_v56, 0.0  ;;  %v367_v59 = vadd.f32 %v427_v36, %v361_v57  ;;  %vm381_vm2 = vcmp.gt.f32.partialorder %v366_v56, 0.0 }
 0x107   :  { %v391_v60 = vmul.f32 1.442695, %v385_v58  ;;  %v386_v61 = vmin.f32 %v367_v59, 0.0  ;;  %vm382_vm3 = vcmp.gt.f32.partialorder %v367_v59, 0.0 }
 0x109   :  { %575 = vpow2.f32 %v391_v60  ;;  %v393_v62 = vmul.f32 1.442695, %v386_v61 }
 0x10b   :  { %v572_v63 = vpop.eup %571  ;;  %577 = vpow2.f32 %v393_v62 }
 0x10c   :  { %v458_v0 = vadd.f32 -1.0, %v572_v63 }
 0x10d   :  { %v574_v1 = vpop.eup %573 }
 0x10e   :  { %v459_v2 = vadd.f32 -1.0, %v574_v1  ;;  %v399_v3 = vsel %vm379_vm0, %v364_v42, %v458_v0 }
 0x110   :  { %v400_v4 = vsel %vm380_vm1, %v365_v45, %v459_v2 }
 0x111   :  { %v473_v5 = vpack.c.bf16 %v400_v4, %v399_v3 }
 0x113   :  { %v576_v6 = vpop.eup %575  ;;  %474 = vst [vmem:[%s701_s3] sm:$0xff] %v473_v5  }
 0x114   :  { %v460_v7 = vadd.f32 -1.0, %v576_v6 }
 0x115   :  { %v578_v8 = vpop.eup %577 }
 0x116   :  { %v461_v9 = vadd.f32 -1.0, %v578_v8  ;;  %v401_v10 = vsel %vm381_vm2, %v366_v56, %v460_v7 }
 0x118   :  { %v402_v11 = vsel %vm382_vm3, %v367_v59, %v461_v9 }
 0x119   :  { %v478_v12 = vpack.c.bf16 %v402_v11, %v401_v10 }
 0x11b   :  { %480 = vst [vmem:[%s701_s3 + $0x8] sm:$0xff] %v478_v12  }

// kernel: _lambda_.28
= control target key start
LH: loop header
LB: loop body
LE: loop exit
PB: predicated region body
PF: predicated region fallthrough
CT: control target
= control target key end

     0   :  { %v483_v1 = vmov 0.0   ;;  %vm484_vm0 = vmmov 0   ;;  %s592_s1 = inlined_call_operand.vmem [shape: bf16[384,128], index: 1, kind: input, shape index: {}]   ;;  %s593_s0 = inlined_call_operand.vmem [shape: bf16[16,384], index: 0, kind: input, shape index: {}]   ;;  %s594_s2 = inlined_call_operand.vmem [shape: f32[1,128], index: 2, kind: input, shape index: {}]   ;;  %s595_s3 = inlined_call_operand.vmem [shape: bf16[16,128], index: 3, kind: output, shape index: {}]  }
   0x1   :  { %v451_v0 = vld [vmem:[%s592_s1 + $0x40] sm:$0xff]   ;;  %429 = vmatprep.subr.bf16.mxu1 %v483_v1  ;;  %445 = vmatprep.mubr.msk.bf16.mxu1 %vm484_vm0, %v483_v1  ;;  %v454_v4 = vld [vmem:[%s592_s1 + $0x48] sm:$0xff]   ;;  %v457_v7 = vld [vmem:[%s592_s1 + $0x50] sm:$0xff]  }
   0x2   :  { %v452_v2 = vld [vmem:[%s592_s1] sm:$0xff]   ;;  %398 = vmatprep.subr.bf16.mxu0 %v451_v0  ;;  %v455_v5 = vld [vmem:[%s592_s1 + $0x8] sm:$0xff]   ;;  %v458_v8 = vld [vmem:[%s592_s1 + $0x10] sm:$0xff]  }
   0x3   :  { %v453_v3 = vld [vmem:[%s592_s1 + $0x80] sm:$0xff]   ;;  %399 = vmatpush3.bf16.msra.mxu0 %v452_v2  ;;  %v456_v6 = vld [vmem:[%s592_s1 + $0x88] sm:$0xff]   ;;  %v459_v9 = vld [vmem:[%s592_s1 + $0x90] sm:$0xff]  }
   0x4   :  { %430 = vmatpush3.bf16.msra.mxu1 %v453_v3  ;;  %400 = vmatprep.subr.bf16.mxu0 %v454_v4  ;;  %v460_v10 = vld [vmem:[%s592_s1 + $0x58] sm:$0xff]   ;;  %v463_v13 = vld [vmem:[%s592_s1 + $0x60] sm:$0xff]   ;;  %v466_v16 = vld [vmem:[%s592_s1 + $0x68] sm:$0xff]  }
   0x5   :  { %431 = vmatprep.subr.bf16.mxu1 %v483_v1  ;;  %v461_v11 = vld [vmem:[%s592_s1 + $0x18] sm:$0xff]   ;;  %v464_v14 = vld [vmem:[%s592_s1 + $0x20] sm:$0xff]   ;;  %v467_v17 = vld [vmem:[%s592_s1 + $0x28] sm:$0xff]  }
   0x6   :  { %v462_v12 = vld [vmem:[%s592_s1 + $0x98] sm:$0xff]   ;;  %v465_v15 = vld [vmem:[%s592_s1 + $0xa0] sm:$0xff]   ;;  %v468_v18 = vld [vmem:[%s592_s1 + $0xa8] sm:$0xff]  }
   0x7   :  { %401 = vmatpush3.bf16.msra.mxu0 %v455_v5  ;;  %v469_v19 = vld [vmem:[%s592_s1 + $0x70] sm:$0xff]   ;;  %v472_v22 = vld [vmem:[%s592_s1 + $0x78] sm:$0xff]   ;;  %v475_v26 = vld [vmem:[%s593_s0] ss:$12 sps:$4 sm:$0xff]  }
   0x8   :  { %432 = vmatpush3.bf16.msra.mxu1 %v456_v6  ;;  %402 = vmatprep.subr.bf16.mxu0 %v457_v7  ;;  %v470_v20 = vld [vmem:[%s592_s1 + $0x30] sm:$0xff]   ;;  %v473_v24 = vld [vmem:[%s592_s1 + $0x38] sm:$0xff]   ;;  %v359_v34 = vld [vmem:[%s594_s2] ss:$0 sm:$0xff] }
   0x9   :  { %433 = vmatprep.subr.bf16.mxu1 %v483_v1  ;;  %v471_v21 = vld [vmem:[%s592_s1 + $0xb0] sm:$0xff]   ;;  %v474_v25 = vld [vmem:[%s592_s1 + $0xb8] sm:$0xff]  }
   0xa   :  { %v477_v23 = vld [vmem:[%s593_s0 + $0x4] ss:$12 sps:$4 sm:$0xff]   ;;  %v478_v27 = vld [vmem:[%s593_s0 + $0x8] ss:$12 sps:$4 sm:$0xff]  }
   0xb   :  { %403 = vmatpush3.bf16.msra.mxu0 %v458_v8  ;;  %274 = vmatprep.mubr.bf16.mxu0 %v477_v23 }
   0xc   :  { %434 = vmatpush3.bf16.msra.mxu1 %v459_v9  ;;  %404 = vmatprep.subr.bf16.mxu0 %v460_v10 }
   0xd   :  { %435 = vmatprep.subr.bf16.mxu1 %v483_v1 }
   0xf   :  { %405 = vmatpush3.bf16.msra.mxu0 %v461_v11 }
  0x10   :  { %436 = vmatpush3.bf16.msra.mxu1 %v462_v12  ;;  %406 = vmatprep.subr.bf16.mxu0 %v463_v13 }
  0x11   :  { %437 = vmatprep.subr.bf16.mxu1 %v483_v1 }
  0x13   :  { %407 = vmatpush3.bf16.msra.mxu0 %v464_v14 }
  0x14   :  { %438 = vmatpush3.bf16.msra.mxu1 %v465_v15  ;;  %408 = vmatprep.subr.bf16.mxu0 %v466_v16 }
  0x15   :  { %439 = vmatprep.subr.bf16.mxu1 %v483_v1 }
  0x17   :  { %409 = vmatpush3.bf16.msra.mxu0 %v467_v17 }
  0x18   :  { %440 = vmatpush3.bf16.msra.mxu1 %v468_v18  ;;  %410 = vmatprep.subr.bf16.mxu0 %v469_v19 }
  0x19   :  { %441 = vmatprep.subr.bf16.mxu1 %v483_v1 }
  0x1b   :  { %411 = vmatpush3.bf16.msra.mxu0 %v470_v20 }
  0x1c   :  { %442 = vmatpush3.bf16.msra.mxu1 %v471_v21  ;;  %412 = vmatprep.subr.bf16.mxu0 %v472_v22 }
  0x1d   :  { %443 = vmatprep.subr.bf16.mxu1 %v483_v1 }
  0x1f   :  { %413 = vmatpush3.bf16.msra.mxu0 %v473_v24 }
  0x20   :  { %444 = vmatpush3.bf16.msra.mxu1 %v474_v25 }
  0x22   :  { %275 = vmatmul.mubr.bf16.vlgmr.msra.gmra.mrb[0].mxu0 %v475_v26 }
  0x23   :  { %446 = vmatmul.mubr.bf16.vlgmr.msra.gmra.mrb[0].mxu1 %v478_v27 }
  0xf5   :  { %v414_v28 = vpop.f32.mrb[0].mxu0 }
  0xf6   :  { %v317_v29 = vpop.f32.mrb[0].mxu1  ;;  %v415_v30 = vpop.f32.mrb[1].mxu0 }
  0xf7   :  { %v416_v31 = vadd.f32 %v415_v30, %v414_v28  ;;  %v447_v32 = vpop.f32.mrb[1].mxu1  ;;  %v417_v33 = vpop.f32.mrb[2].mxu0 }
  0xf8   :  { %v320_v35 = vpop.f32.mrb[2].mxu1  ;;  %v418_v36 = vpop.f32.mrb[3].mxu0 }
  0xf9   :  { %v318_v37 = vadd.f32 %v416_v31, %v317_v29  ;;  %v419_v38 = vadd.f32 %v418_v36, %v417_v33  ;;  %v448_v39 = vpop.f32.mrb[3].mxu1 }
  0xfb   :  { %v324_v40 = vadd.f32 %v359_v34, %v318_v37  ;;  %v321_v41 = vadd.f32 %v419_v38, %v320_v35 }
  0xfd   :  { %v335_v42 = vmin.f32 %v324_v40, 0.0  ;;  %v325_v43 = vadd.f32 %v359_v34, %v321_v41  ;;  %vm333_vm1 = vcmp.gt.f32.partialorder %v324_v40, 0.0 }
  0xff   :  { %v337_v44 = vmul.f32 1.442695, %v335_v42  ;;  %v336_v45 = vmin.f32 %v325_v43, 0.0  ;;  %vm334_vm2 = vcmp.gt.f32.partialorder %v325_v43, 0.0 }
 0x101   :  { %479 = vpow2.f32 %v337_v44  ;;  %v339_v46 = vmul.f32 1.442695, %v336_v45 }
 0x103   :  { %481 = vpow2.f32 %v339_v46 }
 0x10b   :  { %v480_v47 = vpop.eup %479 }
 0x10c   :  { %v387_v48 = vadd.f32 -1.0, %v480_v47 }
 0x10d   :  { %v482_v49 = vpop.eup %481 }
 0x10e   :  { %v388_v50 = vadd.f32 -1.0, %v482_v49  ;;  %v343_v51 = vsel %vm333_vm1, %v324_v40, %v387_v48 }
 0x110   :  { %v344_v52 = vsel %vm334_vm2, %v325_v43, %v388_v50 }
 0x111   :  { %v396_v53 = vpack.c.bf16 %v344_v52, %v343_v51 }
 0x113   :  { %397 = vst [vmem:[%s595_s3] sm:$0xff] %v396_v53  }

// kernel: _lambda_.29
= control target key start
LH: loop header
LB: loop body
LE: loop exit
PB: predicated region body
PF: predicated region fallthrough
CT: control target
= control target key end

     0   :  { %s991_s12 = smov 0   ;;  %s993_s13 = smov 0   ;;  %s1095_s0 = inlined_call_operand.vmem [shape: bf16[16,768], index: 0, kind: input, shape index: {}]   ;;  %s1096_s1 = inlined_call_operand.vmem [shape: bf16[768,128], index: 1, kind: input, shape index: {}]   ;;  %s1097_s2 = inlined_call_operand.vmem [shape: f32[1,128], index: 2, kind: input, shape index: {}]   ;;  %s1098_s3 = inlined_call_operand.vmem [shape: bf16[16,128], index: 3, kind: output, shape index: {}]  }
   0x1   :  { %s995_s14 = smov 0   ;;  %s997_s15 = smov 0  }
   0x2   :  { %s999_s16 = smov 0  }
   0x3 LB: > { %s25_s17 = sadd.s32 1, %s963_s15  ;;  %p48_p1 = scmp.ne.s32.totalorder %s955_s13, %s951_s12  ;;  %s967_s16 = sphi %s999_s16, %s13_s16   ;;  %s963_s15 = sphi %s997_s15, %s1102_s15   ;;  %s959_s14 = sphi %s995_s14, %s1101_s14   ;;  %s955_s13 = sphi %s993_s13, %s1100_s13   ;;  %s951_s12 = sphi %s991_s12, %s1099_s12  }
   0x4   : > { %p26_p0 = scmp.ge.s32.totalorder %s25_s17, 2  ;;  %p49_p2 = scmp.eq.s32.totalorder %s967_s16, 0 }
   0x5   : > { %s41_s19 = sadd.s32 1, %s955_s13  ;;  %p748_p5 = scmp.ge.s32.totalorder %s967_s16, 2 }
   0x6   : > { %s1104_s17 = smov (%p26_p0, %s25_s17), 0  ;;  %p50_p3 = por %p49_p2, %p48_p1 }
   0x7   : > { %s37_s18 = ssub.s32 %s963_s15, %s1104_s17  ;;  %162 = sbr.rel (%p748_p5) target bundleno = 21 (0x15), region = 20 }
   0x8   : > { %p39_p4 = scmp.eq.s32.totalorder %s37_s18, 0 }
   0xa   : > { %s1026_s20 = scalar_select %p39_p4, %s955_s13, %s41_s19  }
   0xe   : > { %165 = sbr.rel (!%p50_p3) target bundleno = 21 (0x15), region = 24  ;;  %s167_s21 = sand.u32 (%p50_p3), 1, %s955_s13  }
   0xf   : > { %s794_s22 = smul.u32 (%p50_p3), 12, %s963_s15 }
  0x10   : > { %s853_s23 = smul.u32 (%p50_p3), 24, %s167_s21 }
  0x11   : > { %s175_s26 = scalar_lea.vmem (%p50_p3), %s1095_s0, %s794_s22 }
  0x12   : > { %v190_v0 = vld [vmem:[%s175_s26] sm:$0xff] (%p50_p3)  ;;  %v192_v1 = vld [vmem:[%s175_s26 + $0x18] sm:$0xff] (%p50_p3)  ;;  %v750_v2 = vld [vmem:[%s175_s26 + $0x8] sm:$0xf] (%p50_p3)  ;;  %s169_s27 = scalar_lea.vmem (%p50_p3), [#allocation3], %s853_s23 }
  0x13   : > { %191 = vst [vmem:[%s169_s27] sm:$0xff] (%p50_p3), %v190_v0  ;;  %193 = vst [vmem:[%s169_s27 + $0xc] sm:$0xff] (%p50_p3), %v192_v1  ;;  %v752_v3 = vld [vmem:[%s175_s26 + $0x20] sm:$0xf] (%p50_p3) }
  0x14   : > { %751 = vst [vmem:[%s169_s27 + $0x8] sm:$0xf] (%p50_p3), %v750_v2  ;;  %753 = vst [vmem:[%s169_s27 + $0x14] sm:$0xf] (%p50_p3), %v752_v3 }
  0x15 PF: > { %p754_p6 = scmp.ge.s32.totalorder %s967_s16, 1  ;;  %p221_p7 = scmp.lt.s32.totalorder %s967_s16, 3 }
  0x17   : > { %p222_p8 = pnand %p754_p6, %p221_p7 }
  0x18   : > { %s228_s28 = sand.u32 (!%p222_p8), 1, %s951_s12   ;;  %s267_s29 = smul.u32 (!%p222_p8), 48, %s959_s14 }
  0x19   : > { %225 = sbr.rel (%p222_p8) target bundleno = 322 (0x142), region = 54  ;;  %p756_p10 = scmp.ne.s32.totalorder (!%p222_p8), %s959_s14, 0 }
  0x1a   : > { %s854_s30 = smul.u32 (!%p222_p8), 24, %s228_s28  ;;  %p268_p9 = scmp.lt.s32.totalorder (!%p222_p8), %s267_s29, 95 }
  0x1c   : > { %s1043_s8 = scalar_lea.vmem (!%p222_p8), [#allocation3], %s854_s30 }
  0x20   : > { %s1106_s29 = smov (!%p268_p9, %s267_s29), 95  ;;  %292 = sbr.rel (%p756_p10) target bundleno = 39 (0x27), region = 62 }
  0x21   : > { %s755_s4 = sshll.u32 %s1106_s29, 2  ;;  %v757_v4 = vld [vmem:[%s1097_s2] ss:$0 sm:$0xff] (!%p756_p10) }
  0x22   : > { %s1041_s7 = scalar_lea.vmem %s1096_s1, %s755_s4  ;;  %300 = vst [vmem:[#allocation2] sm:$0xff] (!%p756_p10), %v757_v4  ;;  %301 = vst [vmem:[#allocation2 + $0x8] sm:$0xff] (!%p756_p10), %v757_v4 }
  0x27 PF: > { %v897_v5 = vld [vmem:[%s1041_s7 + $0x40] sm:$0xff]   ;;  %v969_v6 = vmov 0.0   ;;  %vm970_vm0 = vmmov 0   ;;  %v900_v9 = vld [vmem:[%s1041_s7 + $0x48] sm:$0xff]   ;;  %v903_v12 = vld [vmem:[%s1041_s7 + $0x50] sm:$0xff]   ;;  %p785_p11 = scmp.ne.s32.totalorder %s959_s14, 1 }
  0x28   : > { %833 = vmatprep.subr.bf16.mxu1 %v969_v6  ;;  %v898_v7 = vld [vmem:[%s1041_s7] sm:$0xff]   ;;  %802 = vmatprep.subr.bf16.mxu0 %v897_v5  ;;  %v901_v10 = vld [vmem:[%s1041_s7 + $0x8] sm:$0xff]   ;;  %v904_v13 = vld [vmem:[%s1041_s7 + $0x10] sm:$0xff]  }
  0x29   : > { %v899_v8 = vld [vmem:[%s1041_s7 + $0x80] sm:$0xff]   ;;  %849 = vmatprep.mubr.msk.bf16.mxu1 %vm970_vm0, %v969_v6  ;;  %803 = vmatpush3.bf16.msra.mxu0 %v898_v7  ;;  %v902_v11 = vld [vmem:[%s1041_s7 + $0x88] sm:$0xff]   ;;  %v905_v14 = vld [vmem:[%s1041_s7 + $0x90] sm:$0xff]  }
  0x2a   : > { %834 = vmatpush3.bf16.msra.mxu1 %v899_v8  ;;  %804 = vmatprep.subr.bf16.mxu0 %v900_v9  ;;  %v906_v15 = vld [vmem:[%s1041_s7 + $0x58] sm:$0xff]   ;;  %v909_v18 = vld [vmem:[%s1041_s7 + $0x60] sm:$0xff]   ;;  %v912_v21 = vld [vmem:[%s1041_s7 + $0x68] sm:$0xff]  }
  0x2b   : > { %835 = vmatprep.subr.bf16.mxu1 %v969_v6  ;;  %v907_v16 = vld [vmem:[%s1041_s7 + $0x18] sm:$0xff]   ;;  %v910_v19 = vld [vmem:[%s1041_s7 + $0x20] sm:$0xff]   ;;  %v913_v22 = vld [vmem:[%s1041_s7 + $0x28] sm:$0xff]  }
  0x2c   : > { %v908_v17 = vld [vmem:[%s1041_s7 + $0x98] sm:$0xff]   ;;  %v911_v20 = vld [vmem:[%s1041_s7 + $0xa0] sm:$0xff]   ;;  %v914_v23 = vld [vmem:[%s1041_s7 + $0xa8] sm:$0xff]  }
  0x2d   : > { %805 = vmatpush3.bf16.msra.mxu0 %v901_v10  ;;  %v915_v24 = vld [vmem:[%s1041_s7 + $0x70] sm:$0xff]   ;;  %v918_v27 = vld [vmem:[%s1041_s7 + $0x78] sm:$0xff]   ;;  %v302_v39 = vld [vmem:[#allocation2] sm:$0xff] }
  0x2e   : > { %836 = vmatpush3.bf16.msra.mxu1 %v902_v11  ;;  %806 = vmatprep.subr.bf16.mxu0 %v903_v12  ;;  %v916_v25 = vld [vmem:[%s1041_s7 + $0x30] sm:$0xff]   ;;  %v919_v29 = vld [vmem:[%s1041_s7 + $0x38] sm:$0xff]   ;;  %v303_v45 = vld [vmem:[#allocation2 + $0x8] sm:$0xff] }
  0x2f   : > { %837 = vmatprep.subr.bf16.mxu1 %v969_v6  ;;  %v917_v26 = vld [vmem:[%s1041_s7 + $0xb0] sm:$0xff]   ;;  %v920_v30 = vld [vmem:[%s1041_s7 + $0xb8] sm:$0xff]  }
  0x30   : > { %v923_v28 = vld [vmem:[%s1043_s8 + $0x4] ss:$12 sps:$4 sm:$0xff]   ;;  %v921_v31 = vld [vmem:[%s1043_s8] ss:$12 sps:$4 sm:$0xff]   ;;  %v924_v32 = vld [vmem:[%s1043_s8 + $0x8] ss:$12 sps:$4 sm:$0xff]  }
  0x31   : > { %807 = vmatpush3.bf16.msra.mxu0 %v904_v13  ;;  %548 = vmatprep.mubr.bf16.mxu0 %v923_v28 }
  0x32   : > { %838 = vmatpush3.bf16.msra.mxu1 %v905_v14  ;;  %808 = vmatprep.subr.bf16.mxu0 %v906_v15 }
  0x33   : > { %839 = vmatprep.subr.bf16.mxu1 %v969_v6 }
  0x35   : > { %809 = vmatpush3.bf16.msra.mxu0 %v907_v16 }
  0x36   : > { %840 = vmatpush3.bf16.msra.mxu1 %v908_v17  ;;  %810 = vmatprep.subr.bf16.mxu0 %v909_v18 }
  0x37   : > { %841 = vmatprep.subr.bf16.mxu1 %v969_v6 }
  0x39   : > { %811 = vmatpush3.bf16.msra.mxu0 %v910_v19 }
  0x3a   : > { %842 = vmatpush3.bf16.msra.mxu1 %v911_v20  ;;  %812 = vmatprep.subr.bf16.mxu0 %v912_v21 }
  0x3b   : > { %843 = vmatprep.subr.bf16.mxu1 %v969_v6 }
  0x3d   : > { %813 = vmatpush3.bf16.msra.mxu0 %v913_v22 }
  0x3e   : > { %844 = vmatpush3.bf16.msra.mxu1 %v914_v23  ;;  %814 = vmatprep.subr.bf16.mxu0 %v915_v24 }
  0x3f   : > { %845 = vmatprep.subr.bf16.mxu1 %v969_v6 }
  0x41   : > { %815 = vmatpush3.bf16.msra.mxu0 %v916_v25 }
  0x42   : > { %846 = vmatpush3.bf16.msra.mxu1 %v917_v26  ;;  %816 = vmatprep.subr.bf16.mxu0 %v918_v27 }
  0x43   : > { %847 = vmatprep.subr.bf16.mxu1 %v969_v6 }
  0x45   : > { %817 = vmatpush3.bf16.msra.mxu0 %v919_v29 }
  0x46   : > { %848 = vmatpush3.bf16.msra.mxu1 %v920_v30 }
  0x48   : > { %549 = vmatmul.mubr.bf16.vlgmr.msra.gmra.mrb[0].mxu0 %v921_v31 }
  0x49   : > { %850 = vmatmul.mubr.bf16.vlgmr.msra.gmra.mrb[0].mxu1 %v924_v32 }
 0x11b   : > { %v818_v33 = vpop.f32.mrb[0].mxu0 }
 0x11c   : > { %v591_v34 = vpop.f32.mrb[0].mxu1  ;;  %v819_v35 = vpop.f32.mrb[1].mxu0 }
 0x11d   : > { %v820_v36 = vadd.f32 %v819_v35, %v818_v33  ;;  %v851_v37 = vpop.f32.mrb[1].mxu1  ;;  %v821_v38 = vpop.f32.mrb[2].mxu0 }
 0x11e   : > { %v594_v40 = vpop.f32.mrb[2].mxu1  ;;  %v822_v41 = vpop.f32.mrb[3].mxu0 }
 0x11f   : > { %v592_v42 = vadd.f32 %v820_v36, %v591_v34  ;;  %v823_v43 = vadd.f32 %v822_v41, %v821_v38  ;;  %v852_v44 = vpop.f32.mrb[3].mxu1  ;;  %605 = sbr.rel (%p785_p11) target bundleno = 322 (0x142), region = 66 }
 0x121   : > { %v598_v46 = vadd.f32 %v592_v42, %v302_v39  ;;  %v595_v47 = vadd.f32 %v823_v43, %v594_v40 }
 0x123   : > { %600 = vst [vmem:[#allocation2] sm:$0xff] %v598_v46  ;;  %v599_v48 = vadd.f32 %v595_v47, %v303_v45 }
 0x125   : > { %601 = vst [vmem:[#allocation2 + $0x8] sm:$0xff] %v599_v48 }
 0x12a   : > { %v606_v49 = vld [vmem:[#allocation2] sm:$0xff] }
 0x12b   : > { %v610_v51 = vmin.f32 %v606_v49, 0.0  ;;  %vm608_vm1 = vcmp.gt.f32.partialorder %v606_v49, 0.0 }
 0x12c   : > { %v607_v50 = vld [vmem:[#allocation2 + $0x8] sm:$0xff] }
 0x12d   : > { %v611_v52 = vmin.f32 %v607_v50, 0.0  ;;  %v612_v53 = vmul.f32 1.442695, %v610_v51  ;;  %vm609_vm2 = vcmp.gt.f32.partialorder %v607_v50, 0.0 }
 0x12f   : > { %v614_v54 = vmul.f32 1.442695, %v611_v52  ;;  %925 = vpow2.f32 %v612_v53 }
 0x131   : > { %927 = vpow2.f32 %v614_v54 }
 0x139   : > { %v926_v55 = vpop.eup %925 }
 0x13a   : > { %v786_v57 = vadd.f32 -1.0, %v926_v55 }
 0x13b   : > { %v928_v56 = vpop.eup %927 }
 0x13c   : > { %v787_v58 = vadd.f32 -1.0, %v928_v56  ;;  %v618_v59 = vsel %vm608_vm1, %v606_v49, %v786_v57 }
 0x13e   : > { %v619_v60 = vsel %vm609_vm2, %v607_v50, %v787_v58 }
 0x13f   : > { %v800_v61 = vpack.c.bf16 %v619_v60, %v618_v59 }
 0x141   : > { %801 = vst [vmem:[%s1098_s3] sm:$0xff] %v800_v61  }
 0x142 PF: > { %s13_s16 = sadd.s32 1, %s967_s16   ;;  %s1099_s12 = smov %s955_s13 }
 0x143   : > { %p10_p12 = scmp.ge.s32.totalorder %s13_s16, 4   ;;  %s1100_s13 = smov %s1026_s20 }
 0x144   : > { %s1101_s14 = smov %s963_s15  ;;  %s1102_s15 = smov %s1104_s17 }
 0x145   :  { %12 = sbr.rel (!%p10_p12) target bundleno = 3 (0x3), region = 113 }

// kernel: _lambda_.39
= control target key start
LH: loop header
LB: loop body
LE: loop exit
PB: predicated region body
PF: predicated region fallthrough
CT: control target
= control target key end

     0   :  { %s1244_s12 = smov 0   ;;  %s1246_s13 = smov 0   ;;  %s1394_s0 = inlined_call_operand.vmem [shape: bf16[512,128], index: 0, kind: input, shape index: {}]   ;;  %s1395_s1 = inlined_call_operand.vmem [shape: bf16[128,128], index: 1, kind: input, shape index: {}]   ;;  %s1396_s2 = inlined_call_operand.vmem [shape: f32[1,128], index: 2, kind: input, shape index: {}]   ;;  %s1397_s3 = inlined_call_operand.vmem [shape: f32[512,128], index: 3, kind: output, shape index: {}]  }
   0x1   :  { %s1248_s14 = smov 0  }
   0x2 LB: > { %s28_s15 = sadd.s32 1, %s1218_s13  ;;  %p1000_p0 = scmp.ge.s32.totalorder %s1222_s14, 1  ;;  %s1222_s14 = sphi %s1248_s14, %s13_s14   ;;  %s1218_s13 = sphi %s1246_s13, %s1399_s13   ;;  %s1214_s12 = sphi %s1244_s12, %s1398_s12  }
   0x3   : > { %p30_p1 = scmp.ge.s32.totalorder %s28_s15, 2  ;;  %p188_p2 = scmp.lt.s32.totalorder %s1222_s14, 3 }
   0x5   : > { %s1401_s15 = smov (%p30_p1, %s28_s15), 0  ;;  %p189_p3 = pnand %p1000_p0, %p188_p2 }
   0x6   : > { %v1176_v0 = vld [vmem:[%s1395_s1] sm:$0xff] (!%p189_p3)   ;;  %s1001_s18 = sshll.u32 (!%p189_p3), %s1214_s12, 5  ;;  %v1177_v1 = vld [vmem:[%s1395_s1 + $0x8] sm:$0xff] (!%p189_p3)   ;;  %v1178_v2 = vld [vmem:[%s1395_s1 + $0x10] sm:$0xff] (!%p189_p3)  }
   0x7   : > { %192 = sbr.rel (%p189_p3) target bundleno = 283 (0x11b), region = 32  ;;  %p230_p4 = scmp.lt.s32.totalorder (!%p189_p3), %s1001_s18, 63  ;;  %1088 = vmatprep.subr.bf16.mxu0 (!%p189_p3), %v1176_v0  ;;  %1136 = vmatprep.subr.bf16.mxu1 (!%p189_p3), %v1176_v0  ;;  %v1179_v3 = vld [vmem:[%s1395_s1 + $0x18] sm:$0xff] (!%p189_p3)   ;;  %v1180_v6 = vld [vmem:[%s1395_s1 + $0x20] sm:$0xff] (!%p189_p3)   ;;  %v1181_v7 = vld [vmem:[%s1395_s1 + $0x28] sm:$0xff] (!%p189_p3)  }
   0x8   : > { %1089 = vmatpush3.bf16.msra.mxu0 (!%p189_p3), %v1176_v0  ;;  %1144 = vmatpush3.bf16.msra.mxu1 (!%p189_p3), %v1176_v0  ;;  %v1182_v8 = vld [vmem:[%s1395_s1 + $0x30] sm:$0xff] (!%p189_p3)   ;;  %v1183_v9 = vld [vmem:[%s1395_s1 + $0x38] sm:$0xff] (!%p189_p3)   ;;  %v1313_v24 = vld [vmem:[%s1396_s2] ss:$0 sm:$0xff] (!%p189_p3) }
   0x9   : > { %1090 = vmatprep.subr.bf16.mxu0 (!%p189_p3), %v1177_v1  ;;  %1137 = vmatprep.subr.bf16.mxu1 (!%p189_p3), %v1177_v1 }
   0xc   : > { %1091 = vmatpush3.bf16.msra.mxu0 (!%p189_p3), %v1177_v1  ;;  %1145 = vmatpush3.bf16.msra.mxu1 (!%p189_p3), %v1177_v1 }
   0xd   : > { %1092 = vmatprep.subr.bf16.mxu0 (!%p189_p3), %v1178_v2  ;;  %1138 = vmatprep.subr.bf16.mxu1 (!%p189_p3), %v1178_v2 }
   0xe   : > { %s1403_s18 = smov (!%p230_p4, %s1001_s18), 63 }
   0xf   : > { %s1002_s23 = sshll.u32 %s1403_s18, 2  ;;  %s1004_s12 = sshll.u32 %s1403_s18, 3 }
  0x10   : > { %s1277_s26 = scalar_lea.vmem %s1394_s0, %s1002_s23  ;;  %1093 = vmatpush3.bf16.msra.mxu0 %v1178_v2  ;;  %1146 = vmatpush3.bf16.msra.mxu1 %v1178_v2  ;;  %s1321_s19 = scalar_lea.vmem %s1397_s3, %s1004_s12 }
  0x11   : > { %v1184_v4 = vld [vmem:[%s1277_s26] sm:$0xff]   ;;  %1094 = vmatprep.subr.bf16.mxu0 %v1179_v3  ;;  %1139 = vmatprep.subr.bf16.mxu1 %v1179_v3  ;;  %v1186_v10 = vld [vmem:[%s1277_s26 + $0x8] sm:$0xff]   ;;  %v1188_v12 = vld [vmem:[%s1277_s26 + $0x10] sm:$0xff]  }
  0x12   : > { %v1185_v5 = vld [vmem:[%s1277_s26 + $0x40] sm:$0xff]   ;;  %1104 = vmatprep.mubr.bf16.mxu0 %v1184_v4  ;;  %v1187_v11 = vld [vmem:[%s1277_s26 + $0x48] sm:$0xff]   ;;  %v1189_v13 = vld [vmem:[%s1277_s26 + $0x50] sm:$0xff]  }
  0x13   : > { %1120 = vmatprep.mubr.bf16.mxu1 %v1185_v5  ;;  %v1190_v14 = vld [vmem:[%s1277_s26 + $0x18] sm:$0xff]   ;;  %v1192_v16 = vld [vmem:[%s1277_s26 + $0x20] sm:$0xff]   ;;  %v1194_v18 = vld [vmem:[%s1277_s26 + $0x28] sm:$0xff]  }
  0x14   : > { %1095 = vmatpush3.bf16.msra.mxu0 %v1179_v3  ;;  %1147 = vmatpush3.bf16.msra.mxu1 %v1179_v3  ;;  %v1191_v15 = vld [vmem:[%s1277_s26 + $0x58] sm:$0xff]   ;;  %v1193_v17 = vld [vmem:[%s1277_s26 + $0x60] sm:$0xff]   ;;  %v1195_v19 = vld [vmem:[%s1277_s26 + $0x68] sm:$0xff]  }
  0x15   : > { %1096 = vmatprep.subr.bf16.mxu0 %v1180_v6  ;;  %1140 = vmatprep.subr.bf16.mxu1 %v1180_v6  ;;  %v1196_v20 = vld [vmem:[%s1277_s26 + $0x30] sm:$0xff]   ;;  %v1198_v22 = vld [vmem:[%s1277_s26 + $0x38] sm:$0xff]  }
  0x16   : > { %v1197_v21 = vld [vmem:[%s1277_s26 + $0x70] sm:$0xff]   ;;  %v1199_v23 = vld [vmem:[%s1277_s26 + $0x78] sm:$0xff]  }
  0x18   : > { %1097 = vmatpush3.bf16.msra.mxu0 %v1180_v6  ;;  %1148 = vmatpush3.bf16.msra.mxu1 %v1180_v6 }
  0x19   : > { %1098 = vmatprep.subr.bf16.mxu0 %v1181_v7  ;;  %1141 = vmatprep.subr.bf16.mxu1 %v1181_v7 }
  0x1c   : > { %1099 = vmatpush3.bf16.msra.mxu0 %v1181_v7  ;;  %1149 = vmatpush3.bf16.msra.mxu1 %v1181_v7 }
  0x1d   : > { %1100 = vmatprep.subr.bf16.mxu0 %v1182_v8  ;;  %1142 = vmatprep.subr.bf16.mxu1 %v1182_v8 }
  0x20   : > { %1101 = vmatpush3.bf16.msra.mxu0 %v1182_v8  ;;  %1150 = vmatpush3.bf16.msra.mxu1 %v1182_v8 }
  0x21   : > { %1102 = vmatprep.subr.bf16.mxu0 %v1183_v9  ;;  %1143 = vmatprep.subr.bf16.mxu1 %v1183_v9 }
  0x24   : > { %1103 = vmatpush3.bf16.msra.mxu0 %v1183_v9  ;;  %1151 = vmatpush3.bf16.msra.mxu1 %v1183_v9 }
  0x27   : > { %1105 = vmatmul.mubr.bf16.vlgmr.msra.gmra.mrb[0].mxu0 %v1186_v10  ;;  %1121 = vmatmul.mubr.bf16.vlgmr.msra.gmra.mrb[0].mxu1 %v1187_v11 }
  0x28   : > { %1108 = vmatprep.mubr.bf16.mxu0 %v1188_v12  ;;  %1124 = vmatprep.mubr.bf16.mxu1 %v1189_v13 }
  0x2f   : > { %1109 = vmatmul.mubr.bf16.gmra.mrb[4].mxu0 %v1190_v14  ;;  %1125 = vmatmul.mubr.bf16.gmra.mrb[4].mxu1 %v1191_v15 }
  0x30   : > { %1112 = vmatprep.mubr.bf16.mxu0 %v1192_v16  ;;  %1128 = vmatprep.mubr.bf16.mxu1 %v1193_v17 }
  0x37   : > { %1113 = vmatmul.mubr.bf16.gmra.mrb[8].mxu0 %v1194_v18  ;;  %1129 = vmatmul.mubr.bf16.gmra.mrb[8].mxu1 %v1195_v19 }
  0x38   : > { %1116 = vmatprep.mubr.bf16.mxu0 %v1196_v20  ;;  %1132 = vmatprep.mubr.bf16.mxu1 %v1197_v21 }
  0x3f   : > { %1117 = vmatmul.mubr.bf16.gmra.mrb[12].mxu0 %v1198_v22  ;;  %1133 = vmatmul.mubr.bf16.gmra.mrb[12].mxu1 %v1199_v23 }
  0xfa   : > { %v1106_v25 = vpop.f32.mrb[0].mxu0  ;;  %v1122_v26 = vpop.f32.mrb[0].mxu1 }
  0xfb   : > { %v690_v27 = vadd.f32 %v1106_v25, %v1313_v24  ;;  %v706_v28 = vadd.f32 %v1122_v26, %v1313_v24  ;;  %v561_v29 = vpop.f32.mrb[1].mxu0  ;;  %v625_v30 = vpop.f32.mrb[1].mxu1 }
  0xfc   : > { %v688_v31 = vadd.f32 %v1313_v24, %v561_v29  ;;  %v704_v32 = vadd.f32 %v1313_v24, %v625_v30  ;;  %v1107_v33 = vpop.f32.mrb[2].mxu0  ;;  %v1123_v34 = vpop.f32.mrb[2].mxu1 }
  0xfd   : > { %v1032_v35 = vclamps-f32 %v690_v27, 1.0  ;;  %v1048_v36 = vclamps-f32 %v706_v28, 1.0  ;;  %v691_v37 = vadd.f32 %v1107_v33, %v1313_v24  ;;  %v707_v38 = vadd.f32 %v1123_v34, %v1313_v24  ;;  %v564_v39 = vpop.f32.mrb[3].mxu0  ;;  %v628_v40 = vpop.f32.mrb[3].mxu1 }
  0xfe   : > { %v1030_v41 = vclamps-f32 %v688_v31, 1.0  ;;  %v1046_v42 = vclamps-f32 %v704_v32, 1.0  ;;  %v689_v43 = vadd.f32 %v1313_v24, %v564_v39  ;;  %v705_v44 = vadd.f32 %v1313_v24, %v628_v40 }
  0xff   : > { %853 = vst [vmem:[%s1321_s19 + $0x10] sm:$0xff] %v1032_v35  ;;  %869 = vst [vmem:[%s1321_s19 + $0x90] sm:$0xff] %v1048_v36  ;;  %v1033_v45 = vclamps-f32 %v691_v37, 1.0  ;;  %v1049_v46 = vclamps-f32 %v707_v38, 1.0 }
 0x100   : > { %851 = vst [vmem:[%s1321_s19] sm:$0xff] %v1030_v41  ;;  %867 = vst [vmem:[%s1321_s19 + $0x80] sm:$0xff] %v1046_v42  ;;  %v1031_v47 = vclamps-f32 %v689_v43, 1.0  ;;  %v1047_v48 = vclamps-f32 %v705_v44, 1.0 }
 0x101   : > { %854 = vst [vmem:[%s1321_s19 + $0x18] sm:$0xff] %v1033_v45  ;;  %870 = vst [vmem:[%s1321_s19 + $0x98] sm:$0xff] %v1049_v46 }
 0x102   : > { %852 = vst [vmem:[%s1321_s19 + $0x8] sm:$0xff] %v1031_v47  ;;  %868 = vst [vmem:[%s1321_s19 + $0x88] sm:$0xff] %v1047_v48  ;;  %v1110_v49 = vpop.f32.mrb[4].mxu0  ;;  %v1126_v50 = vpop.f32.mrb[4].mxu1 }
 0x103   : > { %v694_v51 = vadd.f32 %v1110_v49, %v1313_v24  ;;  %v710_v52 = vadd.f32 %v1126_v50, %v1313_v24  ;;  %v577_v53 = vpop.f32.mrb[5].mxu0  ;;  %v641_v54 = vpop.f32.mrb[5].mxu1 }
 0x104   : > { %v692_v55 = vadd.f32 %v1313_v24, %v577_v53  ;;  %v708_v56 = vadd.f32 %v1313_v24, %v641_v54  ;;  %v1111_v57 = vpop.f32.mrb[6].mxu0  ;;  %v1127_v58 = vpop.f32.mrb[6].mxu1 }
 0x105   : > { %v1036_v59 = vclamps-f32 %v694_v51, 1.0  ;;  %v1052_v60 = vclamps-f32 %v710_v52, 1.0  ;;  %v695_v61 = vadd.f32 %v1111_v57, %v1313_v24  ;;  %v711_v62 = vadd.f32 %v1127_v58, %v1313_v24  ;;  %v580_v63 = vpop.f32.mrb[7].mxu0  ;;  %v644_v0 = vpop.f32.mrb[7].mxu1 }
 0x106   : > { %v1034_v1 = vclamps-f32 %v692_v55, 1.0  ;;  %v1050_v2 = vclamps-f32 %v708_v56, 1.0  ;;  %v693_v3 = vadd.f32 %v1313_v24, %v580_v63  ;;  %v709_v4 = vadd.f32 %v1313_v24, %v644_v0 }
 0x107   : > { %857 = vst [vmem:[%s1321_s19 + $0x30] sm:$0xff] %v1036_v59  ;;  %873 = vst [vmem:[%s1321_s19 + $0xb0] sm:$0xff] %v1052_v60  ;;  %v1037_v5 = vclamps-f32 %v695_v61, 1.0  ;;  %v1053_v6 = vclamps-f32 %v711_v62, 1.0 }
 0x108   : > { %855 = vst [vmem:[%s1321_s19 + $0x20] sm:$0xff] %v1034_v1  ;;  %871 = vst [vmem:[%s1321_s19 + $0xa0] sm:$0xff] %v1050_v2  ;;  %v1035_v7 = vclamps-f32 %v693_v3, 1.0  ;;  %v1051_v8 = vclamps-f32 %v709_v4, 1.0 }
 0x109   : > { %858 = vst [vmem:[%s1321_s19 + $0x38] sm:$0xff] %v1037_v5  ;;  %874 = vst [vmem:[%s1321_s19 + $0xb8] sm:$0xff] %v1053_v6 }
 0x10a   : > { %856 = vst [vmem:[%s1321_s19 + $0x28] sm:$0xff] %v1035_v7  ;;  %872 = vst [vmem:[%s1321_s19 + $0xa8] sm:$0xff] %v1051_v8  ;;  %v1114_v9 = vpop.f32.mrb[8].mxu0  ;;  %v1130_v10 = vpop.f32.mrb[8].mxu1 }
 0x10b   : > { %v698_v11 = vadd.f32 %v1114_v9, %v1313_v24  ;;  %v714_v12 = vadd.f32 %v1130_v10, %v1313_v24  ;;  %v593_v13 = vpop.f32.mrb[9].mxu0  ;;  %v657_v14 = vpop.f32.mrb[9].mxu1 }
 0x10c   : > { %v696_v15 = vadd.f32 %v1313_v24, %v593_v13  ;;  %v712_v16 = vadd.f32 %v1313_v24, %v657_v14  ;;  %v1115_v17 = vpop.f32.mrb[10].mxu0  ;;  %v1131_v18 = vpop.f32.mrb[10].mxu1 }
 0x10d   : > { %v1040_v19 = vclamps-f32 %v698_v11, 1.0  ;;  %v1056_v20 = vclamps-f32 %v714_v12, 1.0  ;;  %v699_v21 = vadd.f32 %v1115_v17, %v1313_v24  ;;  %v715_v22 = vadd.f32 %v1131_v18, %v1313_v24  ;;  %v596_v23 = vpop.f32.mrb[11].mxu0  ;;  %v660_v25 = vpop.f32.mrb[11].mxu1 }
 0x10e   : > { %v1038_v26 = vclamps-f32 %v696_v15, 1.0  ;;  %v1054_v27 = vclamps-f32 %v712_v16, 1.0  ;;  %v697_v28 = vadd.f32 %v1313_v24, %v596_v23  ;;  %v713_v29 = vadd.f32 %v1313_v24, %v660_v25 }
 0x10f   : > { %861 = vst [vmem:[%s1321_s19 + $0x50] sm:$0xff] %v1040_v19  ;;  %877 = vst [vmem:[%s1321_s19 + $0xd0] sm:$0xff] %v1056_v20  ;;  %v1041_v30 = vclamps-f32 %v699_v21, 1.0  ;;  %v1057_v31 = vclamps-f32 %v715_v22, 1.0 }
 0x110   : > { %859 = vst [vmem:[%s1321_s19 + $0x40] sm:$0xff] %v1038_v26  ;;  %875 = vst [vmem:[%s1321_s19 + $0xc0] sm:$0xff] %v1054_v27  ;;  %v1039_v32 = vclamps-f32 %v697_v28, 1.0  ;;  %v1055_v33 = vclamps-f32 %v713_v29, 1.0 }
 0x111   : > { %862 = vst [vmem:[%s1321_s19 + $0x58] sm:$0xff] %v1041_v30  ;;  %878 = vst [vmem:[%s1321_s19 + $0xd8] sm:$0xff] %v1057_v31 }
 0x112   : > { %860 = vst [vmem:[%s1321_s19 + $0x48] sm:$0xff] %v1039_v32  ;;  %876 = vst [vmem:[%s1321_s19 + $0xc8] sm:$0xff] %v1055_v33  ;;  %v1118_v34 = vpop.f32.mrb[12].mxu0  ;;  %v1134_v35 = vpop.f32.mrb[12].mxu1 }
 0x113   : > { %v702_v36 = vadd.f32 %v1118_v34, %v1313_v24  ;;  %v718_v37 = vadd.f32 %v1134_v35, %v1313_v24  ;;  %v609_v38 = vpop.f32.mrb[13].mxu0  ;;  %v673_v39 = vpop.f32.mrb[13].mxu1 }
 0x114   : > { %v700_v40 = vadd.f32 %v1313_v24, %v609_v38  ;;  %v716_v41 = vadd.f32 %v1313_v24, %v673_v39  ;;  %v1119_v42 = vpop.f32.mrb[14].mxu0  ;;  %v1135_v43 = vpop.f32.mrb[14].mxu1 }
 0x115   : > { %v1044_v44 = vclamps-f32 %v702_v36, 1.0  ;;  %v1060_v45 = vclamps-f32 %v718_v37, 1.0  ;;  %v703_v46 = vadd.f32 %v1119_v42, %v1313_v24  ;;  %v719_v47 = vadd.f32 %v1135_v43, %v1313_v24  ;;  %v612_v48 = vpop.f32.mrb[15].mxu0  ;;  %v676_v49 = vpop.f32.mrb[15].mxu1 }
 0x116   : > { %v1042_v50 = vclamps-f32 %v700_v40, 1.0  ;;  %v1058_v51 = vclamps-f32 %v716_v41, 1.0  ;;  %v701_v52 = vadd.f32 %v1313_v24, %v612_v48  ;;  %v717_v53 = vadd.f32 %v1313_v24, %v676_v49 }
 0x117   : > { %865 = vst [vmem:[%s1321_s19 + $0x70] sm:$0xff] %v1044_v44  ;;  %881 = vst [vmem:[%s1321_s19 + $0xf0] sm:$0xff] %v1060_v45  ;;  %v1045_v54 = vclamps-f32 %v703_v46, 1.0  ;;  %v1061_v55 = vclamps-f32 %v719_v47, 1.0 }
 0x118   : > { %863 = vst [vmem:[%s1321_s19 + $0x60] sm:$0xff] %v1042_v50  ;;  %879 = vst [vmem:[%s1321_s19 + $0xe0] sm:$0xff] %v1058_v51  ;;  %v1043_v56 = vclamps-f32 %v701_v52, 1.0  ;;  %v1059_v57 = vclamps-f32 %v717_v53, 1.0 }
 0x119   : > { %866 = vst [vmem:[%s1321_s19 + $0x78] sm:$0xff] %v1045_v54  ;;  %882 = vst [vmem:[%s1321_s19 + $0xf8] sm:$0xff] %v1061_v55 }
 0x11a   : > { %864 = vst [vmem:[%s1321_s19 + $0x68] sm:$0xff] %v1043_v56  ;;  %880 = vst [vmem:[%s1321_s19 + $0xe8] sm:$0xff] %v1059_v57 }
 0x11b PF: > { %s13_s14 = sadd.s32 1, %s1222_s14   ;;  %s1398_s12 = smov %s1218_s13 }
 0x11c   : > { %p10_p5 = scmp.ge.s32.totalorder %s13_s14, 4   ;;  %s1399_s13 = smov %s1401_s15 }
 0x11e   :  { %12 = sbr.rel (!%p10_p5) target bundleno = 2 (0x2), region = 76 }

</bundles_post_ra>
